<compile_context>
chip_gen: v7x
topology: tpu7x:2x2x1
jax: 0.10.0
libtpu: 0.0.40
codegen_flags: <defaults>
</compile_context>

<pallas_src>
import functools
import math

import jax
import jax.numpy as jnp
from jax.experimental import pallas as pl
from jax.experimental.pallas import tpu as pltpu

_LANE = 128        # TPU lane width; channels padded to this once
_TM_MAX = 512      # max rows per block (~85% HBM roofline vs ~29% at 128)


def _round_up(x, m):
    return (x + m - 1) // m * m


def _detect_chip():
    """Best-effort TPU generation detection for tile / VMEM-budget choices."""
    try:
        kind = jax.devices()[0].device_kind.lower()
    except Exception:
        kind = ""
    is_v7 = ("v7" in kind) or ("7x" in kind)
    is_v5e = ("v5e" in kind) or ("v5 lite" in kind) or ("v5lite" in kind)
    big_vmem = (not is_v7) and any(t in kind for t in ("v4", "v5", "v6"))
    budget = (96 if big_vmem else 48) * 1024 * 1024   # v7x: 64 MiB physical
    return is_v7, is_v5e, budget


_IS_V7, _IS_V5E, _VMEM_BUDGET = _detect_chip()


def _row_tiling(m):
    """(padded_rows, row_block) for an [M, .] operand (16-row bf16 granularity)."""
    mp = _round_up(m, 16)
    if mp >= _TM_MAX:
        return _round_up(m, _TM_MAX), _TM_MAX
    return mp, mp


def _plan(m, sum_kp, np_, out_bytes):
    """Pick (padded_rows, row_block, col_block) for one conv_bn call so that both
    the matmul pass and the affine pass stay inside the per-chip VMEM budget."""
    tn = 256 if (np_ % 256 == 0 and not _IS_V5E) else 128
    mp, tm = _row_tiling(m)

    def fits(tm_, tn_):
        conv = (2 * (tm_ * sum_kp + sum_kp * tn_) * 2      # bf16 x/w segs, double-buffered
                + 2 * (tm_ * tn_ * 2 + 2 * tn_ * 4)        # bf16 y + f32 psum/psq, double-buffered
                + tm_ * tn_ * 4)                           # f32 accumulator (in-kernel)
        aff = 2 * (tm_ * np_ * 2 + 2 * np_ * 4 + tm_ * np_ * out_bytes)
        return max(conv, aff) <= _VMEM_BUDGET

    while not fits(tm, tn) and tm % 32 == 0 and tm > 16:
        tm //= 2
    if not fits(tm, tn) and tn == 256:
        tn = 128
    mp = _round_up(m, tm)
    # v7x shards 'parallel' grid axes over its two TensorCores: expose >=2 steps
    # on the big single-block calls.
    if _IS_V7 and (mp // tm) * (np_ // tn) == 1 and tm % 32 == 0 and tm > 16:
        tm //= 2
        mp = _round_up(m, tm)
    return mp, tm, tn


# ---------------------------------------------------------------------------
# Pallas kernel 1: fused (multi-segment) 1x1-conv matmul
#   acc = sum_s x_seg_s @ w_seg_s        (bf16 operands, f32 accumulation)
# The BatchNorm batch-statistic partials (per-row-block column sum and
# sum-of-squares of the conv output) are emitted from the epilogue while the
# tile is still on-chip; the conv result itself is written back as bf16.
# No bias: the following training-mode BN cancels a per-channel bias exactly.
# ---------------------------------------------------------------------------
def _make_conv_kernel(n_seg):
    def kernel(*refs):
        x_refs = refs[:n_seg]
        w_refs = refs[n_seg:2 * n_seg]
        y_ref, psum_ref, psq_ref = refs[2 * n_seg:]
        acc = jnp.dot(x_refs[0][...], w_refs[0][...],
                      preferred_element_type=jnp.float32)
        for s in range(1, n_seg):
            acc = acc + jnp.dot(x_refs[s][...], w_refs[s][...],
                                preferred_element_type=jnp.float32)
        # Zero-padded rows / channels contribute exactly zero to the stats.
        psum_ref[...] = jnp.sum(acc, axis=0, keepdims=True)[None]
        psq_ref[...] = jnp.sum(acc * acc, axis=0, keepdims=True)[None]
        y_ref[...] = acc.astype(y_ref.dtype)
    return kernel


@functools.lru_cache(maxsize=None)
def _conv_call(n_seg, mp, kps, np_, tm, tn):
    gm, gn = mp // tm, np_ // tn
    in_specs = ([pl.BlockSpec((tm, kp), lambda i, j: (i, 0)) for kp in kps]    # x segs
                + [pl.BlockSpec((kp, tn), lambda i, j: (0, j)) for kp in kps])  # w segs
    out_specs = [pl.BlockSpec((tm, tn), lambda i, j: (i, j)),                  # y (bf16)
                 pl.BlockSpec((1, 1, tn), lambda i, j: (i, 0, j)),             # col sums
                 pl.BlockSpec((1, 1, tn), lambda i, j: (i, 0, j))]             # col sum-sq
    out_shape = [jax.ShapeDtypeStruct((mp, np_), jnp.bfloat16),
                 jax.ShapeDtypeStruct((gm, 1, np_), jnp.float32),
                 jax.ShapeDtypeStruct((gm, 1, np_), jnp.float32)]
    return pl.pallas_call(
        _make_conv_kernel(n_seg),
        out_shape=out_shape,
        grid_spec=pltpu.PrefetchScalarGridSpec(
            num_scalar_prefetch=0,
            grid=(gm, gn),
            in_specs=in_specs,
            out_specs=out_specs),
        compiler_params=pltpu.CompilerParams(
            dimension_semantics=("parallel", "parallel"),
            vmem_limit_bytes=_VMEM_BUDGET),
    )


# ---------------------------------------------------------------------------
# Pallas kernel 2: BatchNorm affine apply (per-channel scale/shift) on the bf16
# conv result, big row blocks, lane-dense output.  A second pass is unavoidable
# because the batch statistics are global.
# ---------------------------------------------------------------------------
def _affine_kernel(x_ref, s_ref, b_ref, o_ref):
    o_ref[...] = (x_ref[...].astype(jnp.float32) * s_ref[...]
                  + b_ref[...]).astype(o_ref.dtype)


@functools.lru_cache(maxsize=None)
def _affine_call(mp, np_, tm, out_dtype):
    return pl.pallas_call(
        _affine_kernel,
        out_shape=jax.ShapeDtypeStruct((mp, np_), out_dtype),
        grid_spec=pltpu.PrefetchScalarGridSpec(
            num_scalar_prefetch=0,
            grid=(mp // tm,),
            in_specs=[pl.BlockSpec((tm, np_), lambda i: (i, 0)),
                      pl.BlockSpec((1, np_), lambda i: (0, 0)),
                      pl.BlockSpec((1, np_), lambda i: (0, 0))],
            out_specs=pl.BlockSpec((tm, np_), lambda i: (i, 0))),
        compiler_params=pltpu.CompilerParams(
            dimension_semantics=("parallel",),
            vmem_limit_bytes=_VMEM_BUDGET),
    )


# ---------------------------------------------------------------------------
# Fused "(concat ->) 1x1 conv -> BatchNorm (training-mode batch stats)" block.
# The conv bias is intentionally omitted: BN subtracts the batch mean, so a
# per-channel bias cancels exactly and never needs to be added.
# ---------------------------------------------------------------------------
def conv_bn(x_segs, w_segs, gamma, beta, *, out_dtype=jnp.float32, eps=1e-5):
    """x_segs: list of (M, Kp_i) arrays, channels already lane-padded with zeros.
    w_segs: list of (Kin_i, Cout) un-padded weights (rows of the concat weight).
    Returns an (M, Np) array, Np = round_up(Cout, 128); padded channels stay 0."""
    m = x_segs[0].shape[0]
    cout = w_segs[0].shape[1]
    np_ = _round_up(cout, _LANE)
    kps = tuple(int(x2d.shape[1]) for x2d in x_segs)
    out_bytes = jnp.dtype(out_dtype).itemsize
    mp, tm, tn = _plan(m, sum(kps), np_, out_bytes)

    xs, ws = [], []
    for x2d, wgt in zip(x_segs, w_segs):
        kp = x2d.shape[1]
        assert kp % _LANE == 0
        if mp != m:
            x2d = jnp.pad(x2d, ((0, mp - m), (0, 0)))
        xs.append(x2d.astype(jnp.bfloat16))                       # no-op if bf16
        wp = jnp.pad(wgt.astype(jnp.float32),
                     ((0, kp - wgt.shape[0]), (0, np_ - cout)))
        ws.append(wp.astype(jnp.bfloat16))

    y, psum, psq = _conv_call(len(xs), mp, kps, np_, tm, tn)(*xs, *ws)

    # Finish the BN statistics from the tiny per-block partials (XLA, ~KB).
    s1 = jnp.sum(psum, axis=(0, 1))
    s2 = jnp.sum(psq, axis=(0, 1))
    mean = s1 / m
    var = jnp.maximum(s2 / m - mean * mean, 0.0)
    gamma_p = jnp.pad(gamma.astype(jnp.float32), (0, np_ - cout))
    beta_p = jnp.pad(beta.astype(jnp.float32), (0, np_ - cout))
    scale = gamma_p * jax.lax.rsqrt(var + eps)
    shift = beta_p - mean * scale          # padded channels: scale=shift=0 -> 0

    out = _affine_call(mp, np_, tm, out_dtype)(
        y, scale.reshape(1, np_), shift.reshape(1, np_))
    return out[:m] if mp != m else out


# ---------------------------------------------------------------------------
# Pooling / upsampling glue (XLA; cheap reshapes & gathers, bf16 throughout).
# ---------------------------------------------------------------------------
def _maxpool(x, k):
    if k == 1:
        return x
    n, h, w, c = x.shape
    hc, wc = (h // k) * k, (w // k) * k
    x = x[:, :hc, :wc, :]
    x = x.reshape(n, h // k, k, w // k, k, c)
    return x.max(axis=(2, 4))


def _upsample(x, k):
    if k == 1:
        return x
    return jnp.repeat(jnp.repeat(x, k, axis=1), k, axis=2)


def _resize_nearest(x, size):
    # nn.Upsample(size=s) with an int size: BOTH spatial dims -> s, nearest.
    n, h, w, c = x.shape
    hi = (jnp.arange(size) * h // size).astype(jnp.int32)
    wi = (jnp.arange(size) * w // size).astype(jnp.int32)
    return x[:, hi][:, :, wi]


# ---------------------------------------------------------------------------
# Forward pass of ResUnet_PSPPooling.
# ---------------------------------------------------------------------------
def psp_forward(params, x_nchw, factors, eps=1e-5):
    # NCHW -> NHWC, bf16 cast ONCE, channel lane-padding ONCE.
    x = jnp.transpose(x_nchw, (0, 2, 3, 1)).astype(jnp.bfloat16)
    b, h, w, c = x.shape
    cp = _round_up(c, _LANE)
    nf = len(factors)
    cb = c // 4
    cbp = _round_up(cb, _LANE)
    x_pad = jnp.pad(x, ((0, 0), (0, 0), (0, 0), (0, cp - c)))
    x_flat = x_pad.reshape(b * h * w, cp)

    # When C//4 is far below one 128-lane tile, pack all branch outputs into a
    # single lane-padded segment for the final conv instead of carrying four
    # 128-padded segments (shrinks the final conv's K and its DMA streams).
    pack = _round_up(nf * cb, _LANE) < nf * cbp

    branches = []
    for p, f in zip(params['parallel'], factors):
        pooled = _maxpool(x_pad, f)
        if h % f == 0 and w % f == 0:
            # 1x1 conv and training-mode BN commute exactly with an exact
            # integer-factor nearest upsample -> do them at low resolution.
            z2d = conv_bn([pooled.reshape(-1, cp)], [p['w']],
                          p['gamma'], p['beta'], out_dtype=jnp.bfloat16, eps=eps)
            z = z2d.reshape(b, h // f, w // f, cbp)
            if pack:
                z = z[..., :cb]
            z = _upsample(z, f)
        else:
            # General path, op-for-op like the PyTorch module (incl. its
            # width-only size fix).  TODO(synk): like the PyTorch reference this
            # assumes square inputs whenever h % f != 0.
            z = _upsample(pooled, f)
            hz, wz = z.shape[1], z.shape[2]
            z2d = conv_bn([z.reshape(-1, cp)], [p['w']],
                          p['gamma'], p['beta'], out_dtype=jnp.bfloat16, eps=eps)
            z = z2d.reshape(b, hz, wz, cbp)
            if pack:
                z = z[..., :cb]
            if z.shape[2] != w:
                z = _resize_nearest(z, w)
        branches.append(z)

    # Final 1x1 conv over concat([x, b1..b4], channel): multi-segment matmul,
    # the fully concatenated/128-padded tensor is never written to HBM.
    wf = params['final']['w']                                   # (c + nf*cb, c)
    if pack:
        packed = jnp.concatenate(branches, axis=-1)             # (b,h,w, nf*cb)
        kpk = _round_up(nf * cb, _LANE)
        packed = jnp.pad(packed, ((0, 0), (0, 0), (0, 0), (0, kpk - nf * cb)))
        x_segs = [x_flat, packed.reshape(b * h * w, kpk)]
        w_segs = [wf[:c], wf[c:]]
    else:
        x_segs = [x_flat] + [z.reshape(b * h * w, cbp) for z in branches]
        w_segs = [wf[:c]] + [wf[c + i * cb: c + (i + 1) * cb] for i in range(nf)]

    y2d = conv_bn(x_segs, w_segs, params['final']['gamma'], params['final']['beta'],
                  out_dtype=jnp.float32, eps=eps)
    y = y2d[:, :c].reshape(b, h, w, c)
    return jnp.transpose(y, (0, 3, 1, 2))                       # back to NCHW


# ---------------------------------------------------------------------------
# Deterministic synthetic parameters + pure-JAX float32 reference.
# ---------------------------------------------------------------------------
def init_params(key, c, factors):
    cb = c // 4
    keys = jax.random.split(key, 4 * len(factors) + 4)
    it = iter(range(len(keys)))

    def nrm(shape, scale):
        return scale * jax.random.normal(keys[next(it)], shape, dtype=jnp.float32)

    params = {'parallel': []}
    for _ in factors:
        params['parallel'].append({
            'w': nrm((c, cb), 1.0 / math.sqrt(c)),
            'b': nrm((cb,), 0.01),
            'gamma': 1.0 + nrm((cb,), 0.05),
            'beta': nrm((cb,), 0.05),
        })
    cin_total = c + len(factors) * cb
    params['final'] = {
        'w': nrm((cin_total, c), 1.0 / math.sqrt(cin_total)),
        'b': nrm((c,), 0.01),
        'gamma': 1.0 + nrm((c,), 0.05),
        'beta': nrm((c,), 0.05),
    }
    return params


def psp_reference(params, x_nchw, factors, eps=1e-5):
    """Pure-JAX float32 reference, mirroring the PyTorch module op-for-op
    (the conv bias is applied here; training-mode BN cancels it exactly)."""
    x = jnp.transpose(x_nchw, (0, 2, 3, 1)).astype(jnp.float32)
    _, _, w, _ = x.shape

    def conv1x1(t, wgt, bias):
        return jnp.einsum('bhwc,cd->bhwd', t, wgt) + bias

    def bn(t, gamma, beta):
        m = jnp.mean(t, axis=(0, 1, 2))
        v = jnp.mean(jnp.square(t - m), axis=(0, 1, 2))
        return (t - m) * jax.lax.rsqrt(v + eps) * gamma + beta

    outs = [x]
    for p, f in zip(params['parallel'], factors):
        z = _maxpool(x, f)
        z = _upsample(z, f)
        z = conv1x1(z, p['w'], p['b'])
        z = bn(z, p['gamma'], p['beta'])
        if z.shape[2] != w:
            z = _resize_nearest(z, w)
        outs.append(z)
    cat = jnp.concatenate(outs, axis=-1)
    y = conv1x1(cat, params['final']['w'], params['final']['b'])
    y = bn(y, params['final']['gamma'], params['final']['beta'])
    return jnp.transpose(y, (0, 3, 1, 2))


# ---------------------------------------------------------------------------
if __name__ == "__main__":
    key = jax.random.PRNGKey(0)
    B, C, H, W = 2, 16, 16, 16
    FACTORS = (1, 2, 4, 8)       # canonical ResUNet-a d6 PSP factors

    params = init_params(jax.random.fold_in(key, 1), C, FACTORS)
    x = jax.random.normal(jax.random.fold_in(key, 2), (B, C, H, W),
                          dtype=jnp.float32)

    fwd = jax.jit(functools.partial(psp_forward, factors=FACTORS))
    out = jax.block_until_ready(fwd(params, x))

    assert out.shape == (B, C, H, W), out.shape
    assert bool(jnp.all(jnp.isfinite(out)))

    # Correctness against the float32 reference (kernel keeps activations and
    # the pre-BN conv result in bf16, so allow a small tolerance; structural
    # bugs would show up as O(1) errors).
    ref = psp_reference(params, x, FACTORS)
    err = out - ref
    rms = float(jnp.sqrt(jnp.mean(err * err)))
    mx = float(jnp.max(jnp.abs(err)))
    assert rms < 2e-2 and mx < 1e-1, (rms, mx)

    print("KERNEL_OK")
</pallas_src>

<mosaic_0001>
module attributes {stable_mosaic.version = 11 : i64} {
  func.func @kernel(%arg0: i32, %arg1: i32, %arg2: memref<512x128xbf16, #tpu.memory_space<vmem>>, %arg3: memref<128x128xbf16, #tpu.memory_space<vmem>>, %arg4: memref<512x128xbf16, #tpu.memory_space<vmem>>, %arg5: memref<1x1x128xf32, #tpu.memory_space<vmem>>, %arg6: memref<1x1x128xf32, #tpu.memory_space<vmem>>) attributes {dimension_semantics = [#tpu.dimension_semantics<parallel>, #tpu.dimension_semantics<parallel>], iteration_bounds = array<i64: 1, 1>, scalar_prefetch = 0 : i64, scratch_operands = 0 : i64, tpu.core_type = #tpu.core_type<tc>, window_params = [{transform_indices = @transform_0, window_bounds = array<i64: 512, 128>}, {transform_indices = @transform_1, window_bounds = array<i64: 128, 128>}, {transform_indices = @transform_2, window_bounds = array<i64: 512, 128>}, {transform_indices = @transform_3, window_bounds = array<i64: 1, 1, 128>}, {transform_indices = @transform_4, window_bounds = array<i64: 1, 1, 128>}]} {
    %c0 = arith.constant 0 : index
    %c0_0 = arith.constant 0 : index
    %0 = vector.load %arg2[%c0, %c0_0] : memref<512x128xbf16, #tpu.memory_space<vmem>>, vector<512x128xbf16>
    %c0_1 = arith.constant 0 : index
    %c0_2 = arith.constant 0 : index
    %1 = vector.load %arg3[%c0_1, %c0_2] : memref<128x128xbf16, #tpu.memory_space<vmem>>, vector<128x128xbf16>
    %cst = arith.constant dense<0.000000e+00> : vector<512x128xf32>
    %2 = tpu.matmul %0, %1, %cst {dimension_numbers = #tpu.dot_dimension_numbers<[1], [0], [0], [1], [0, 0, 1, 1], [], []>} : vector<512x128xbf16>, vector<128x128xbf16>, vector<512x128xf32> -> vector<512x128xf32>
    %cst_3 = arith.constant dense<0.000000e+00> : vector<128xf32>
    %3 = vector.multi_reduction <add>, %2, %cst_3 [0] : vector<512x128xf32> to vector<128xf32>
    %4 = vector.shape_cast %3 : vector<128xf32> to vector<1x128xf32>
    %5 = vector.shape_cast %4 : vector<1x128xf32> to vector<1x1x128xf32>
    %c0_4 = arith.constant 0 : index
    %c0_5 = arith.constant 0 : index
    %c0_6 = arith.constant 0 : index
    %6 = vector.load %arg5[%c0_4, %c0_5, %c0_6] : memref<1x1x128xf32, #tpu.memory_space<vmem>>, vector<1x1x128xf32>
    tpu.vector_store %arg5[%c0_4, %c0_5, %c0_6], %5 {strides = array<i32>} : memref<1x1x128xf32, #tpu.memory_space<vmem>>, vector<1x1x128xf32>,
    %7 = arith.mulf %2, %2 : vector<512x128xf32>
    %cst_7 = arith.constant dense<0.000000e+00> : vector<128xf32>
    %8 = vector.multi_reduction <add>, %7, %cst_7 [0] : vector<512x128xf32> to vector<128xf32>
    %9 = vector.shape_cast %8 : vector<128xf32> to vector<1x128xf32>
    %10 = vector.shape_cast %9 : vector<1x128xf32> to vector<1x1x128xf32>
    %c0_8 = arith.constant 0 : index
    %c0_9 = arith.constant 0 : index
    %c0_10 = arith.constant 0 : index
    %11 = vector.load %arg6[%c0_8, %c0_9, %c0_10] : memref<1x1x128xf32, #tpu.memory_space<vmem>>, vector<1x1x128xf32>
    tpu.vector_store %arg6[%c0_8, %c0_9, %c0_10], %10 {strides = array<i32>} : memref<1x1x128xf32, #tpu.memory_space<vmem>>, vector<1x1x128xf32>,
    %12 = arith.truncf %2 : vector<512x128xf32> to vector<512x128xbf16>
    %c0_11 = arith.constant 0 : index
    %c0_12 = arith.constant 0 : index
    %13 = vector.load %arg4[%c0_11, %c0_12] : memref<512x128xbf16, #tpu.memory_space<vmem>>, vector<512x128xbf16>
    tpu.vector_store %arg4[%c0_11, %c0_12], %12 {strides = array<i32>} : memref<512x128xbf16, #tpu.memory_space<vmem>>, vector<512x128xbf16>,
    return
  }
  func.func @transform_0(%arg0: i32, %arg1: i32) -> (i32, i32) {
    %c0_i32 = arith.constant 0 : i32
    %c0_i32_0 = arith.constant 0 : i32
    return %arg0, %c0_i32 : i32, i32
  }
  func.func @transform_1(%arg0: i32, %arg1: i32) -> (i32, i32) {
    %c0_i32 = arith.constant 0 : i32
    %c0_i32_0 = arith.constant 0 : i32
    return %c0_i32, %arg1 : i32, i32
  }
  func.func @transform_2(%arg0: i32, %arg1: i32) -> (i32, i32) {
    %c0_i32 = arith.constant 0 : i32
    return %arg0, %arg1 : i32, i32
  }
  func.func @transform_3(%arg0: i32, %arg1: i32) -> (i32, i32, i32) {
    %c0_i32 = arith.constant 0 : i32
    %c0_i32_0 = arith.constant 0 : i32
    return %arg0, %c0_i32, %arg1 : i32, i32, i32
  }
  func.func @transform_4(%arg0: i32, %arg1: i32) -> (i32, i32, i32) {
    %c0_i32 = arith.constant 0 : i32
    %c0_i32_0 = arith.constant 0 : i32
    return %arg0, %c0_i32, %arg1 : i32, i32, i32
  }
}

module attributes {stable_mosaic.version = 11 : i64} {
  func.func @_affine_kernel(%arg0: i32, %arg1: memref<512x128xbf16, #tpu.memory_space<vmem>>, %arg2: memref<1x128xf32, #tpu.memory_space<vmem>>, %arg3: memref<1x128xf32, #tpu.memory_space<vmem>>, %arg4: memref<512x128xbf16, #tpu.memory_space<vmem>>) attributes {dimension_semantics = [#tpu.dimension_semantics<parallel>], iteration_bounds = array<i64: 1>, scalar_prefetch = 0 : i64, scratch_operands = 0 : i64, tpu.core_type = #tpu.core_type<tc>, window_params = [{transform_indices = @transform_0, window_bounds = array<i64: 512, 128>}, {pipeline_mode = #tpu.pipeline_mode<synchronous>, transform_indices = @transform_1, window_bounds = array<i64: 1, 128>}, {pipeline_mode = #tpu.pipeline_mode<synchronous>, transform_indices = @transform_2, window_bounds = array<i64: 1, 128>}, {transform_indices = @transform_3, window_bounds = array<i64: 512, 128>}]} {
    %c0 = arith.constant 0 : index
    %c0_0 = arith.constant 0 : index
    %0 = vector.load %arg1[%c0, %c0_0] : memref<512x128xbf16, #tpu.memory_space<vmem>>, vector<512x128xbf16>
    %1 = arith.extf %0 : vector<512x128xbf16> to vector<512x128xf32>
    %c0_1 = arith.constant 0 : index
    %c0_2 = arith.constant 0 : index
    %2 = vector.load %arg2[%c0_1, %c0_2] : memref<1x128xf32, #tpu.memory_space<vmem>>, vector<1x128xf32>
    %3 = vector.broadcast %2 : vector<1x128xf32> to vector<512x128xf32>
    %4 = arith.mulf %1, %3 : vector<512x128xf32>
    %c0_3 = arith.constant 0 : index
    %c0_4 = arith.constant 0 : index
    %5 = vector.load %arg3[%c0_3, %c0_4] : memref<1x128xf32, #tpu.memory_space<vmem>>, vector<1x128xf32>
    %6 = vector.broadcast %5 : vector<1x128xf32> to vector<512x128xf32>
    %7 = arith.addf %4, %6 : vector<512x128xf32>
    %8 = arith.truncf %7 : vector<512x128xf32> to vector<512x128xbf16>
    %c0_5 = arith.constant 0 : index
    %c0_6 = arith.constant 0 : index
    %9 = vector.load %arg4[%c0_5, %c0_6] : memref<512x128xbf16, #tpu.memory_space<vmem>>, vector<512x128xbf16>
    tpu.vector_store %arg4[%c0_5, %c0_6], %8 {strides = array<i32>} : memref<512x128xbf16, #tpu.memory_space<vmem>>, vector<512x128xbf16>,
    return
  }
  func.func @transform_0(%arg0: i32) -> (i32, i32) {
    %c0_i32 = arith.constant 0 : i32
    %c0_i32_0 = arith.constant 0 : i32
    return %arg0, %c0_i32 : i32, i32
  }
  func.func @transform_1(%arg0: i32) -> (i32, i32) {
    %c0_i32 = arith.constant 0 : i32
    %c0_i32_0 = arith.constant 0 : i32
    %c0_i32_1 = arith.constant 0 : i32
    return %c0_i32, %c0_i32_0 : i32, i32
  }
  func.func @transform_2(%arg0: i32) -> (i32, i32) {
    %c0_i32 = arith.constant 0 : i32
    %c0_i32_0 = arith.constant 0 : i32
    %c0_i32_1 = arith.constant 0 : i32
    return %c0_i32, %c0_i32_0 : i32, i32
  }
  func.func @transform_3(%arg0: i32) -> (i32, i32) {
    %c0_i32 = arith.constant 0 : i32
    %c0_i32_0 = arith.constant 0 : i32
    return %arg0, %c0_i32 : i32, i32
  }
}

module attributes {stable_mosaic.version = 11 : i64} {
  func.func @kernel(%arg0: i32, %arg1: i32, %arg2: memref<128x128xbf16, #tpu.memory_space<vmem>>, %arg3: memref<128x128xbf16, #tpu.memory_space<vmem>>, %arg4: memref<128x128xbf16, #tpu.memory_space<vmem>>, %arg5: memref<1x1x128xf32, #tpu.memory_space<vmem>>, %arg6: memref<1x1x128xf32, #tpu.memory_space<vmem>>) attributes {dimension_semantics = [#tpu.dimension_semantics<parallel>, #tpu.dimension_semantics<parallel>], iteration_bounds = array<i64: 1, 1>, scalar_prefetch = 0 : i64, scratch_operands = 0 : i64, tpu.core_type = #tpu.core_type<tc>, window_params = [{transform_indices = @transform_0, window_bounds = array<i64: 128, 128>}, {transform_indices = @transform_1, window_bounds = array<i64: 128, 128>}, {transform_indices = @transform_2, window_bounds = array<i64: 128, 128>}, {transform_indices = @transform_3, window_bounds = array<i64: 1, 1, 128>}, {transform_indices = @transform_4, window_bounds = array<i64: 1, 1, 128>}]} {
    %c0 = arith.constant 0 : index
    %c0_0 = arith.constant 0 : index
    %0 = vector.load %arg2[%c0, %c0_0] : memref<128x128xbf16, #tpu.memory_space<vmem>>, vector<128x128xbf16>
    %c0_1 = arith.constant 0 : index
    %c0_2 = arith.constant 0 : index
    %1 = vector.load %arg3[%c0_1, %c0_2] : memref<128x128xbf16, #tpu.memory_space<vmem>>, vector<128x128xbf16>
    %cst = arith.constant dense<0.000000e+00> : vector<128x128xf32>
    %2 = tpu.matmul %0, %1, %cst {dimension_numbers = #tpu.dot_dimension_numbers<[1], [0], [0], [1], [0, 0, 1, 1], [], []>} : vector<128x128xbf16>, vector<128x128xbf16>, vector<128x128xf32> -> vector<128x128xf32>
    %cst_3 = arith.constant dense<0.000000e+00> : vector<128xf32>
    %3 = vector.multi_reduction <add>, %2, %cst_3 [0] : vector<128x128xf32> to vector<128xf32>
    %4 = vector.shape_cast %3 : vector<128xf32> to vector<1x128xf32>
    %5 = vector.shape_cast %4 : vector<1x128xf32> to vector<1x1x128xf32>
    %c0_4 = arith.constant 0 : index
    %c0_5 = arith.constant 0 : index
    %c0_6 = arith.constant 0 : index
    %6 = vector.load %arg5[%c0_4, %c0_5, %c0_6] : memref<1x1x128xf32, #tpu.memory_space<vmem>>, vector<1x1x128xf32>
    tpu.vector_store %arg5[%c0_4, %c0_5, %c0_6], %5 {strides = array<i32>} : memref<1x1x128xf32, #tpu.memory_space<vmem>>, vector<1x1x128xf32>,
    %7 = arith.mulf %2, %2 : vector<128x128xf32>
    %cst_7 = arith.constant dense<0.000000e+00> : vector<128xf32>
    %8 = vector.multi_reduction <add>, %7, %cst_7 [0] : vector<128x128xf32> to vector<128xf32>
    %9 = vector.shape_cast %8 : vector<128xf32> to vector<1x128xf32>
    %10 = vector.shape_cast %9 : vector<1x128xf32> to vector<1x1x128xf32>
    %c0_8 = arith.constant 0 : index
    %c0_9 = arith.constant 0 : index
    %c0_10 = arith.constant 0 : index
    %11 = vector.load %arg6[%c0_8, %c0_9, %c0_10] : memref<1x1x128xf32, #tpu.memory_space<vmem>>, vector<1x1x128xf32>
    tpu.vector_store %arg6[%c0_8, %c0_9, %c0_10], %10 {strides = array<i32>} : memref<1x1x128xf32, #tpu.memory_space<vmem>>, vector<1x1x128xf32>,
    %12 = arith.truncf %2 : vector<128x128xf32> to vector<128x128xbf16>
    %c0_11 = arith.constant 0 : index
    %c0_12 = arith.constant 0 : index
    %13 = vector.load %arg4[%c0_11, %c0_12] : memref<128x128xbf16, #tpu.memory_space<vmem>>, vector<128x128xbf16>
    tpu.vector_store %arg4[%c0_11, %c0_12], %12 {strides = array<i32>} : memref<128x128xbf16, #tpu.memory_space<vmem>>, vector<128x128xbf16>,
    return
  }
  func.func @transform_0(%arg0: i32, %arg1: i32) -> (i32, i32) {
    %c0_i32 = arith.constant 0 : i32
    %c0_i32_0 = arith.constant 0 : i32
    return %arg0, %c0_i32 : i32, i32
  }
  func.func @transform_1(%arg0: i32, %arg1: i32) -> (i32, i32) {
    %c0_i32 = arith.constant 0 : i32
    %c0_i32_0 = arith.constant 0 : i32
    return %c0_i32, %arg1 : i32, i32
  }
  func.func @transform_2(%arg0: i32, %arg1: i32) -> (i32, i32) {
    %c0_i32 = arith.constant 0 : i32
    return %arg0, %arg1 : i32, i32
  }
  func.func @transform_3(%arg0: i32, %arg1: i32) -> (i32, i32, i32) {
    %c0_i32 = arith.constant 0 : i32
    %c0_i32_0 = arith.constant 0 : i32
    return %arg0, %c0_i32, %arg1 : i32, i32, i32
  }
  func.func @transform_4(%arg0: i32, %arg1: i32) -> (i32, i32, i32) {
    %c0_i32 = arith.constant 0 : i32
    %c0_i32_0 = arith.constant 0 : i32
    return %arg0, %c0_i32, %arg1 : i32, i32, i32
  }
}

module attributes {stable_mosaic.version = 11 : i64} {
  func.func @_affine_kernel(%arg0: i32, %arg1: memref<128x128xbf16, #tpu.memory_space<vmem>>, %arg2: memref<1x128xf32, #tpu.memory_space<vmem>>, %arg3: memref<1x128xf32, #tpu.memory_space<vmem>>, %arg4: memref<128x128xbf16, #tpu.memory_space<vmem>>) attributes {dimension_semantics = [#tpu.dimension_semantics<parallel>], iteration_bounds = array<i64: 1>, scalar_prefetch = 0 : i64, scratch_operands = 0 : i64, tpu.core_type = #tpu.core_type<tc>, window_params = [{transform_indices = @transform_0, window_bounds = array<i64: 128, 128>}, {pipeline_mode = #tpu.pipeline_mode<synchronous>, transform_indices = @transform_1, window_bounds = array<i64: 1, 128>}, {pipeline_mode = #tpu.pipeline_mode<synchronous>, transform_indices = @transform_2, window_bounds = array<i64: 1, 128>}, {transform_indices = @transform_3, window_bounds = array<i64: 128, 128>}]} {
    %c0 = arith.constant 0 : index
    %c0_0 = arith.constant 0 : index
    %0 = vector.load %arg1[%c0, %c0_0] : memref<128x128xbf16, #tpu.memory_space<vmem>>, vector<128x128xbf16>
    %1 = arith.extf %0 : vector<128x128xbf16> to vector<128x128xf32>
    %c0_1 = arith.constant 0 : index
    %c0_2 = arith.constant 0 : index
    %2 = vector.load %arg2[%c0_1, %c0_2] : memref<1x128xf32, #tpu.memory_space<vmem>>, vector<1x128xf32>
    %3 = vector.broadcast %2 : vector<1x128xf32> to vector<128x128xf32>
    %4 = arith.mulf %1, %3 : vector<128x128xf32>
    %c0_3 = arith.constant 0 : index
    %c0_4 = arith.constant 0 : index
    %5 = vector.load %arg3[%c0_3, %c0_4] : memref<1x128xf32, #tpu.memory_space<vmem>>, vector<1x128xf32>
    %6 = vector.broadcast %5 : vector<1x128xf32> to vector<128x128xf32>
    %7 = arith.addf %4, %6 : vector<128x128xf32>
    %8 = arith.truncf %7 : vector<128x128xf32> to vector<128x128xbf16>
    %c0_5 = arith.constant 0 : index
    %c0_6 = arith.constant 0 : index
    %9 = vector.load %arg4[%c0_5, %c0_6] : memref<128x128xbf16, #tpu.memory_space<vmem>>, vector<128x128xbf16>
    tpu.vector_store %arg4[%c0_5, %c0_6], %8 {strides = array<i32>} : memref<128x128xbf16, #tpu.memory_space<vmem>>, vector<128x128xbf16>,
    return
  }
  func.func @transform_0(%arg0: i32) -> (i32, i32) {
    %c0_i32 = arith.constant 0 : i32
    %c0_i32_0 = arith.constant 0 : i32
    return %arg0, %c0_i32 : i32, i32
  }
  func.func @transform_1(%arg0: i32) -> (i32, i32) {
    %c0_i32 = arith.constant 0 : i32
    %c0_i32_0 = arith.constant 0 : i32
    %c0_i32_1 = arith.constant 0 : i32
    return %c0_i32, %c0_i32_0 : i32, i32
  }
  func.func @transform_2(%arg0: i32) -> (i32, i32) {
    %c0_i32 = arith.constant 0 : i32
    %c0_i32_0 = arith.constant 0 : i32
    %c0_i32_1 = arith.constant 0 : i32
    return %c0_i32, %c0_i32_0 : i32, i32
  }
  func.func @transform_3(%arg0: i32) -> (i32, i32) {
    %c0_i32 = arith.constant 0 : i32
    %c0_i32_0 = arith.constant 0 : i32
    return %arg0, %c0_i32 : i32, i32
  }
}

module attributes {stable_mosaic.version = 11 : i64} {
  func.func @kernel(%arg0: i32, %arg1: i32, %arg2: memref<32x128xbf16, #tpu.memory_space<vmem>>, %arg3: memref<128x128xbf16, #tpu.memory_space<vmem>>, %arg4: memref<32x128xbf16, #tpu.memory_space<vmem>>, %arg5: memref<1x1x128xf32, #tpu.memory_space<vmem>>, %arg6: memref<1x1x128xf32, #tpu.memory_space<vmem>>) attributes {dimension_semantics = [#tpu.dimension_semantics<parallel>, #tpu.dimension_semantics<parallel>], iteration_bounds = array<i64: 1, 1>, scalar_prefetch = 0 : i64, scratch_operands = 0 : i64, tpu.core_type = #tpu.core_type<tc>, window_params = [{transform_indices = @transform_0, window_bounds = array<i64: 32, 128>}, {transform_indices = @transform_1, window_bounds = array<i64: 128, 128>}, {transform_indices = @transform_2, window_bounds = array<i64: 32, 128>}, {transform_indices = @transform_3, window_bounds = array<i64: 1, 1, 128>}, {transform_indices = @transform_4, window_bounds = array<i64: 1, 1, 128>}]} {
    %c0 = arith.constant 0 : index
    %c0_0 = arith.constant 0 : index
    %0 = vector.load %arg2[%c0, %c0_0] : memref<32x128xbf16, #tpu.memory_space<vmem>>, vector<32x128xbf16>
    %c0_1 = arith.constant 0 : index
    %c0_2 = arith.constant 0 : index
    %1 = vector.load %arg3[%c0_1, %c0_2] : memref<128x128xbf16, #tpu.memory_space<vmem>>, vector<128x128xbf16>
    %cst = arith.constant dense<0.000000e+00> : vector<32x128xf32>
    %2 = tpu.matmul %0, %1, %cst {dimension_numbers = #tpu.dot_dimension_numbers<[1], [0], [0], [1], [0, 0, 1, 1], [], []>} : vector<32x128xbf16>, vector<128x128xbf16>, vector<32x128xf32> -> vector<32x128xf32>
    %cst_3 = arith.constant dense<0.000000e+00> : vector<128xf32>
    %3 = vector.multi_reduction <add>, %2, %cst_3 [0] : vector<32x128xf32> to vector<128xf32>
    %4 = vector.shape_cast %3 : vector<128xf32> to vector<1x128xf32>
    %5 = vector.shape_cast %4 : vector<1x128xf32> to vector<1x1x128xf32>
    %c0_4 = arith.constant 0 : index
    %c0_5 = arith.constant 0 : index
    %c0_6 = arith.constant 0 : index
    %6 = vector.load %arg5[%c0_4, %c0_5, %c0_6] : memref<1x1x128xf32, #tpu.memory_space<vmem>>, vector<1x1x128xf32>
    tpu.vector_store %arg5[%c0_4, %c0_5, %c0_6], %5 {strides = array<i32>} : memref<1x1x128xf32, #tpu.memory_space<vmem>>, vector<1x1x128xf32>,
    %7 = arith.mulf %2, %2 : vector<32x128xf32>
    %cst_7 = arith.constant dense<0.000000e+00> : vector<128xf32>
    %8 = vector.multi_reduction <add>, %7, %cst_7 [0] : vector<32x128xf32> to vector<128xf32>
    %9 = vector.shape_cast %8 : vector<128xf32> to vector<1x128xf32>
    %10 = vector.shape_cast %9 : vector<1x128xf32> to vector<1x1x128xf32>
    %c0_8 = arith.constant 0 : index
    %c0_9 = arith.constant 0 : index
    %c0_10 = arith.constant 0 : index
    %11 = vector.load %arg6[%c0_8, %c0_9, %c0_10] : memref<1x1x128xf32, #tpu.memory_space<vmem>>, vector<1x1x128xf32>
    tpu.vector_store %arg6[%c0_8, %c0_9, %c0_10], %10 {strides = array<i32>} : memref<1x1x128xf32, #tpu.memory_space<vmem>>, vector<1x1x128xf32>,
    %12 = arith.truncf %2 : vector<32x128xf32> to vector<32x128xbf16>
    %c0_11 = arith.constant 0 : index
    %c0_12 = arith.constant 0 : index
    %13 = vector.load %arg4[%c0_11, %c0_12] : memref<32x128xbf16, #tpu.memory_space<vmem>>, vector<32x128xbf16>
    tpu.vector_store %arg4[%c0_11, %c0_12], %12 {strides = array<i32>} : memref<32x128xbf16, #tpu.memory_space<vmem>>, vector<32x128xbf16>,
    return
  }
  func.func @transform_0(%arg0: i32, %arg1: i32) -> (i32, i32) {
    %c0_i32 = arith.constant 0 : i32
    %c0_i32_0 = arith.constant 0 : i32
    return %arg0, %c0_i32 : i32, i32
  }
  func.func @transform_1(%arg0: i32, %arg1: i32) -> (i32, i32) {
    %c0_i32 = arith.constant 0 : i32
    %c0_i32_0 = arith.constant 0 : i32
    return %c0_i32, %arg1 : i32, i32
  }
  func.func @transform_2(%arg0: i32, %arg1: i32) -> (i32, i32) {
    %c0_i32 = arith.constant 0 : i32
    return %arg0, %arg1 : i32, i32
  }
  func.func @transform_3(%arg0: i32, %arg1: i32) -> (i32, i32, i32) {
    %c0_i32 = arith.constant 0 : i32
    %c0_i32_0 = arith.constant 0 : i32
    return %arg0, %c0_i32, %arg1 : i32, i32, i32
  }
  func.func @transform_4(%arg0: i32, %arg1: i32) -> (i32, i32, i32) {
    %c0_i32 = arith.constant 0 : i32
    %c0_i32_0 = arith.constant 0 : i32
    return %arg0, %c0_i32, %arg1 : i32, i32, i32
  }
}

module attributes {stable_mosaic.version = 11 : i64} {
  func.func @_affine_kernel(%arg0: i32, %arg1: memref<32x128xbf16, #tpu.memory_space<vmem>>, %arg2: memref<1x128xf32, #tpu.memory_space<vmem>>, %arg3: memref<1x128xf32, #tpu.memory_space<vmem>>, %arg4: memref<32x128xbf16, #tpu.memory_space<vmem>>) attributes {dimension_semantics = [#tpu.dimension_semantics<parallel>], iteration_bounds = array<i64: 1>, scalar_prefetch = 0 : i64, scratch_operands = 0 : i64, tpu.core_type = #tpu.core_type<tc>, window_params = [{transform_indices = @transform_0, window_bounds = array<i64: 32, 128>}, {pipeline_mode = #tpu.pipeline_mode<synchronous>, transform_indices = @transform_1, window_bounds = array<i64: 1, 128>}, {pipeline_mode = #tpu.pipeline_mode<synchronous>, transform_indices = @transform_2, window_bounds = array<i64: 1, 128>}, {transform_indices = @transform_3, window_bounds = array<i64: 32, 128>}]} {
    %c0 = arith.constant 0 : index
    %c0_0 = arith.constant 0 : index
    %0 = vector.load %arg1[%c0, %c0_0] : memref<32x128xbf16, #tpu.memory_space<vmem>>, vector<32x128xbf16>
    %1 = arith.extf %0 : vector<32x128xbf16> to vector<32x128xf32>
    %c0_1 = arith.constant 0 : index
    %c0_2 = arith.constant 0 : index
    %2 = vector.load %arg2[%c0_1, %c0_2] : memref<1x128xf32, #tpu.memory_space<vmem>>, vector<1x128xf32>
    %3 = vector.broadcast %2 : vector<1x128xf32> to vector<32x128xf32>
    %4 = arith.mulf %1, %3 : vector<32x128xf32>
    %c0_3 = arith.constant 0 : index
    %c0_4 = arith.constant 0 : index
    %5 = vector.load %arg3[%c0_3, %c0_4] : memref<1x128xf32, #tpu.memory_space<vmem>>, vector<1x128xf32>
    %6 = vector.broadcast %5 : vector<1x128xf32> to vector<32x128xf32>
    %7 = arith.addf %4, %6 : vector<32x128xf32>
    %8 = arith.truncf %7 : vector<32x128xf32> to vector<32x128xbf16>
    %c0_5 = arith.constant 0 : index
    %c0_6 = arith.constant 0 : index
    %9 = vector.load %arg4[%c0_5, %c0_6] : memref<32x128xbf16, #tpu.memory_space<vmem>>, vector<32x128xbf16>
    tpu.vector_store %arg4[%c0_5, %c0_6], %8 {strides = array<i32>} : memref<32x128xbf16, #tpu.memory_space<vmem>>, vector<32x128xbf16>,
    return
  }
  func.func @transform_0(%arg0: i32) -> (i32, i32) {
    %c0_i32 = arith.constant 0 : i32
    %c0_i32_0 = arith.constant 0 : i32
    return %arg0, %c0_i32 : i32, i32
  }
  func.func @transform_1(%arg0: i32) -> (i32, i32) {
    %c0_i32 = arith.constant 0 : i32
    %c0_i32_0 = arith.constant 0 : i32
    %c0_i32_1 = arith.constant 0 : i32
    return %c0_i32, %c0_i32_0 : i32, i32
  }
  func.func @transform_2(%arg0: i32) -> (i32, i32) {
    %c0_i32 = arith.constant 0 : i32
    %c0_i32_0 = arith.constant 0 : i32
    %c0_i32_1 = arith.constant 0 : i32
    return %c0_i32, %c0_i32_0 : i32, i32
  }
  func.func @transform_3(%arg0: i32) -> (i32, i32) {
    %c0_i32 = arith.constant 0 : i32
    %c0_i32_0 = arith.constant 0 : i32
    return %arg0, %c0_i32 : i32, i32
  }
}

module attributes {stable_mosaic.version = 11 : i64} {
  func.func @kernel(%arg0: i32, %arg1: i32, %arg2: memref<16x128xbf16, #tpu.memory_space<vmem>>, %arg3: memref<128x128xbf16, #tpu.memory_space<vmem>>, %arg4: memref<16x128xbf16, #tpu.memory_space<vmem>>, %arg5: memref<1x1x128xf32, #tpu.memory_space<vmem>>, %arg6: memref<1x1x128xf32, #tpu.memory_space<vmem>>) attributes {dimension_semantics = [#tpu.dimension_semantics<parallel>, #tpu.dimension_semantics<parallel>], iteration_bounds = array<i64: 1, 1>, scalar_prefetch = 0 : i64, scratch_operands = 0 : i64, tpu.core_type = #tpu.core_type<tc>, window_params = [{transform_indices = @transform_0, window_bounds = array<i64: 16, 128>}, {transform_indices = @transform_1, window_bounds = array<i64: 128, 128>}, {transform_indices = @transform_2, window_bounds = array<i64: 16, 128>}, {transform_indices = @transform_3, window_bounds = array<i64: 1, 1, 128>}, {transform_indices = @transform_4, window_bounds = array<i64: 1, 1, 128>}]} {
    %c0 = arith.constant 0 : index
    %c0_0 = arith.constant 0 : index
    %0 = vector.load %arg2[%c0, %c0_0] : memref<16x128xbf16, #tpu.memory_space<vmem>>, vector<16x128xbf16>
    %c0_1 = arith.constant 0 : index
    %c0_2 = arith.constant 0 : index
    %1 = vector.load %arg3[%c0_1, %c0_2] : memref<128x128xbf16, #tpu.memory_space<vmem>>, vector<128x128xbf16>
    %cst = arith.constant dense<0.000000e+00> : vector<16x128xf32>
    %2 = tpu.matmul %0, %1, %cst {dimension_numbers = #tpu.dot_dimension_numbers<[1], [0], [0], [1], [0, 0, 1, 1], [], []>} : vector<16x128xbf16>, vector<128x128xbf16>, vector<16x128xf32> -> vector<16x128xf32>
    %cst_3 = arith.constant dense<0.000000e+00> : vector<128xf32>
    %3 = vector.multi_reduction <add>, %2, %cst_3 [0] : vector<16x128xf32> to vector<128xf32>
    %4 = vector.shape_cast %3 : vector<128xf32> to vector<1x128xf32>
    %5 = vector.shape_cast %4 : vector<1x128xf32> to vector<1x1x128xf32>
    %c0_4 = arith.constant 0 : index
    %c0_5 = arith.constant 0 : index
    %c0_6 = arith.constant 0 : index
    %6 = vector.load %arg5[%c0_4, %c0_5, %c0_6] : memref<1x1x128xf32, #tpu.memory_space<vmem>>, vector<1x1x128xf32>
    tpu.vector_store %arg5[%c0_4, %c0_5, %c0_6], %5 {strides = array<i32>} : memref<1x1x128xf32, #tpu.memory_space<vmem>>, vector<1x1x128xf32>,
    %7 = arith.mulf %2, %2 : vector<16x128xf32>
    %cst_7 = arith.constant dense<0.000000e+00> : vector<128xf32>
    %8 = vector.multi_reduction <add>, %7, %cst_7 [0] : vector<16x128xf32> to vector<128xf32>
    %9 = vector.shape_cast %8 : vector<128xf32> to vector<1x128xf32>
    %10 = vector.shape_cast %9 : vector<1x128xf32> to vector<1x1x128xf32>
    %c0_8 = arith.constant 0 : index
    %c0_9 = arith.constant 0 : index
    %c0_10 = arith.constant 0 : index
    %11 = vector.load %arg6[%c0_8, %c0_9, %c0_10] : memref<1x1x128xf32, #tpu.memory_space<vmem>>, vector<1x1x128xf32>
    tpu.vector_store %arg6[%c0_8, %c0_9, %c0_10], %10 {strides = array<i32>} : memref<1x1x128xf32, #tpu.memory_space<vmem>>, vector<1x1x128xf32>,
    %12 = arith.truncf %2 : vector<16x128xf32> to vector<16x128xbf16>
    %c0_11 = arith.constant 0 : index
    %c0_12 = arith.constant 0 : index
    %13 = vector.load %arg4[%c0_11, %c0_12] : memref<16x128xbf16, #tpu.memory_space<vmem>>, vector<16x128xbf16>
    tpu.vector_store %arg4[%c0_11, %c0_12], %12 {strides = array<i32>} : memref<16x128xbf16, #tpu.memory_space<vmem>>, vector<16x128xbf16>,
    return
  }
  func.func @transform_0(%arg0: i32, %arg1: i32) -> (i32, i32) {
    %c0_i32 = arith.constant 0 : i32
    %c0_i32_0 = arith.constant 0 : i32
    return %arg0, %c0_i32 : i32, i32
  }
  func.func @transform_1(%arg0: i32, %arg1: i32) -> (i32, i32) {
    %c0_i32 = arith.constant 0 : i32
    %c0_i32_0 = arith.constant 0 : i32
    return %c0_i32, %arg1 : i32, i32
  }
  func.func @transform_2(%arg0: i32, %arg1: i32) -> (i32, i32) {
    %c0_i32 = arith.constant 0 : i32
    return %arg0, %arg1 : i32, i32
  }
  func.func @transform_3(%arg0: i32, %arg1: i32) -> (i32, i32, i32) {
    %c0_i32 = arith.constant 0 : i32
    %c0_i32_0 = arith.constant 0 : i32
    return %arg0, %c0_i32, %arg1 : i32, i32, i32
  }
  func.func @transform_4(%arg0: i32, %arg1: i32) -> (i32, i32, i32) {
    %c0_i32 = arith.constant 0 : i32
    %c0_i32_0 = arith.constant 0 : i32
    return %arg0, %c0_i32, %arg1 : i32, i32, i32
  }
}

module attributes {stable_mosaic.version = 11 : i64} {
  func.func @_affine_kernel(%arg0: i32, %arg1: memref<16x128xbf16, #tpu.memory_space<vmem>>, %arg2: memref<1x128xf32, #tpu.memory_space<vmem>>, %arg3: memref<1x128xf32, #tpu.memory_space<vmem>>, %arg4: memref<16x128xbf16, #tpu.memory_space<vmem>>) attributes {dimension_semantics = [#tpu.dimension_semantics<parallel>], iteration_bounds = array<i64: 1>, scalar_prefetch = 0 : i64, scratch_operands = 0 : i64, tpu.core_type = #tpu.core_type<tc>, window_params = [{transform_indices = @transform_0, window_bounds = array<i64: 16, 128>}, {pipeline_mode = #tpu.pipeline_mode<synchronous>, transform_indices = @transform_1, window_bounds = array<i64: 1, 128>}, {pipeline_mode = #tpu.pipeline_mode<synchronous>, transform_indices = @transform_2, window_bounds = array<i64: 1, 128>}, {transform_indices = @transform_3, window_bounds = array<i64: 16, 128>}]} {
    %c0 = arith.constant 0 : index
    %c0_0 = arith.constant 0 : index
    %0 = vector.load %arg1[%c0, %c0_0] : memref<16x128xbf16, #tpu.memory_space<vmem>>, vector<16x128xbf16>
    %1 = arith.extf %0 : vector<16x128xbf16> to vector<16x128xf32>
    %c0_1 = arith.constant 0 : index
    %c0_2 = arith.constant 0 : index
    %2 = vector.load %arg2[%c0_1, %c0_2] : memref<1x128xf32, #tpu.memory_space<vmem>>, vector<1x128xf32>
    %3 = vector.broadcast %2 : vector<1x128xf32> to vector<16x128xf32>
    %4 = arith.mulf %1, %3 : vector<16x128xf32>
    %c0_3 = arith.constant 0 : index
    %c0_4 = arith.constant 0 : index
    %5 = vector.load %arg3[%c0_3, %c0_4] : memref<1x128xf32, #tpu.memory_space<vmem>>, vector<1x128xf32>
    %6 = vector.broadcast %5 : vector<1x128xf32> to vector<16x128xf32>
    %7 = arith.addf %4, %6 : vector<16x128xf32>
    %8 = arith.truncf %7 : vector<16x128xf32> to vector<16x128xbf16>
    %c0_5 = arith.constant 0 : index
    %c0_6 = arith.constant 0 : index
    %9 = vector.load %arg4[%c0_5, %c0_6] : memref<16x128xbf16, #tpu.memory_space<vmem>>, vector<16x128xbf16>
    tpu.vector_store %arg4[%c0_5, %c0_6], %8 {strides = array<i32>} : memref<16x128xbf16, #tpu.memory_space<vmem>>, vector<16x128xbf16>,
    return
  }
  func.func @transform_0(%arg0: i32) -> (i32, i32) {
    %c0_i32 = arith.constant 0 : i32
    %c0_i32_0 = arith.constant 0 : i32
    return %arg0, %c0_i32 : i32, i32
  }
  func.func @transform_1(%arg0: i32) -> (i32, i32) {
    %c0_i32 = arith.constant 0 : i32
    %c0_i32_0 = arith.constant 0 : i32
    %c0_i32_1 = arith.constant 0 : i32
    return %c0_i32, %c0_i32_0 : i32, i32
  }
  func.func @transform_2(%arg0: i32) -> (i32, i32) {
    %c0_i32 = arith.constant 0 : i32
    %c0_i32_0 = arith.constant 0 : i32
    %c0_i32_1 = arith.constant 0 : i32
    return %c0_i32, %c0_i32_0 : i32, i32
  }
  func.func @transform_3(%arg0: i32) -> (i32, i32) {
    %c0_i32 = arith.constant 0 : i32
    %c0_i32_0 = arith.constant 0 : i32
    return %arg0, %c0_i32 : i32, i32
  }
}

module attributes {stable_mosaic.version = 11 : i64} {
  func.func @_affine_kernel(%arg0: i32, %arg1: memref<512x128xbf16, #tpu.memory_space<vmem>>, %arg2: memref<1x128xf32, #tpu.memory_space<vmem>>, %arg3: memref<1x128xf32, #tpu.memory_space<vmem>>, %arg4: memref<512x128xf32, #tpu.memory_space<vmem>>) attributes {dimension_semantics = [#tpu.dimension_semantics<parallel>], iteration_bounds = array<i64: 1>, scalar_prefetch = 0 : i64, scratch_operands = 0 : i64, tpu.core_type = #tpu.core_type<tc>, window_params = [{transform_indices = @transform_0, window_bounds = array<i64: 512, 128>}, {pipeline_mode = #tpu.pipeline_mode<synchronous>, transform_indices = @transform_1, window_bounds = array<i64: 1, 128>}, {pipeline_mode = #tpu.pipeline_mode<synchronous>, transform_indices = @transform_2, window_bounds = array<i64: 1, 128>}, {transform_indices = @transform_3, window_bounds = array<i64: 512, 128>}]} {
    %c0 = arith.constant 0 : index
    %c0_0 = arith.constant 0 : index
    %0 = vector.load %arg1[%c0, %c0_0] : memref<512x128xbf16, #tpu.memory_space<vmem>>, vector<512x128xbf16>
    %1 = arith.extf %0 : vector<512x128xbf16> to vector<512x128xf32>
    %c0_1 = arith.constant 0 : index
    %c0_2 = arith.constant 0 : index
    %2 = vector.load %arg2[%c0_1, %c0_2] : memref<1x128xf32, #tpu.memory_space<vmem>>, vector<1x128xf32>
    %3 = vector.broadcast %2 : vector<1x128xf32> to vector<512x128xf32>
    %4 = arith.mulf %1, %3 : vector<512x128xf32>
    %c0_3 = arith.constant 0 : index
    %c0_4 = arith.constant 0 : index
    %5 = vector.load %arg3[%c0_3, %c0_4] : memref<1x128xf32, #tpu.memory_space<vmem>>, vector<1x128xf32>
    %6 = vector.broadcast %5 : vector<1x128xf32> to vector<512x128xf32>
    %7 = arith.addf %4, %6 : vector<512x128xf32>
    %c0_5 = arith.constant 0 : index
    %c0_6 = arith.constant 0 : index
    %8 = vector.load %arg4[%c0_5, %c0_6] : memref<512x128xf32, #tpu.memory_space<vmem>>, vector<512x128xf32>
    tpu.vector_store %arg4[%c0_5, %c0_6], %7 {strides = array<i32>} : memref<512x128xf32, #tpu.memory_space<vmem>>, vector<512x128xf32>,
    return
  }
  func.func @transform_0(%arg0: i32) -> (i32, i32) {
    %c0_i32 = arith.constant 0 : i32
    %c0_i32_0 = arith.constant 0 : i32
    return %arg0, %c0_i32 : i32, i32
  }
  func.func @transform_1(%arg0: i32) -> (i32, i32) {
    %c0_i32 = arith.constant 0 : i32
    %c0_i32_0 = arith.constant 0 : i32
    %c0_i32_1 = arith.constant 0 : i32
    return %c0_i32, %c0_i32_0 : i32, i32
  }
  func.func @transform_2(%arg0: i32) -> (i32, i32) {
    %c0_i32 = arith.constant 0 : i32
    %c0_i32_0 = arith.constant 0 : i32
    %c0_i32_1 = arith.constant 0 : i32
    return %c0_i32, %c0_i32_0 : i32, i32
  }
  func.func @transform_3(%arg0: i32) -> (i32, i32) {
    %c0_i32 = arith.constant 0 : i32
    %c0_i32_0 = arith.constant 0 : i32
    return %arg0, %c0_i32 : i32, i32
  }
}

module attributes {stable_mosaic.version = 11 : i64} {
  func.func @kernel(%arg0: i32, %arg1: i32, %arg2: memref<512x128xbf16, #tpu.memory_space<vmem>>, %arg3: memref<512x128xbf16, #tpu.memory_space<vmem>>, %arg4: memref<128x128xbf16, #tpu.memory_space<vmem>>, %arg5: memref<128x128xbf16, #tpu.memory_space<vmem>>, %arg6: memref<512x128xbf16, #tpu.memory_space<vmem>>, %arg7: memref<1x1x128xf32, #tpu.memory_space<vmem>>, %arg8: memref<1x1x128xf32, #tpu.memory_space<vmem>>) attributes {dimension_semantics = [#tpu.dimension_semantics<parallel>, #tpu.dimension_semantics<parallel>], iteration_bounds = array<i64: 1, 1>, scalar_prefetch = 0 : i64, scratch_operands = 0 : i64, tpu.core_type = #tpu.core_type<tc>, window_params = [{transform_indices = @transform_0, window_bounds = array<i64: 512, 128>}, {transform_indices = @transform_1, window_bounds = array<i64: 512, 128>}, {transform_indices = @transform_2, window_bounds = array<i64: 128, 128>}, {transform_indices = @transform_3, window_bounds = array<i64: 128, 128>}, {transform_indices = @transform_4, window_bounds = array<i64: 512, 128>}, {transform_indices = @transform_5, window_bounds = array<i64: 1, 1, 128>}, {transform_indices = @transform_6, window_bounds = array<i64: 1, 1, 128>}]} {
    %c0 = arith.constant 0 : index
    %c0_0 = arith.constant 0 : index
    %0 = vector.load %arg2[%c0, %c0_0] : memref<512x128xbf16, #tpu.memory_space<vmem>>, vector<512x128xbf16>
    %c0_1 = arith.constant 0 : index
    %c0_2 = arith.constant 0 : index
    %1 = vector.load %arg4[%c0_1, %c0_2] : memref<128x128xbf16, #tpu.memory_space<vmem>>, vector<128x128xbf16>
    %cst = arith.constant dense<0.000000e+00> : vector<512x128xf32>
    %2 = tpu.matmul %0, %1, %cst {dimension_numbers = #tpu.dot_dimension_numbers<[1], [0], [0], [1], [0, 0, 1, 1], [], []>} : vector<512x128xbf16>, vector<128x128xbf16>, vector<512x128xf32> -> vector<512x128xf32>
    %c0_3 = arith.constant 0 : index
    %c0_4 = arith.constant 0 : index
    %3 = vector.load %arg3[%c0_3, %c0_4] : memref<512x128xbf16, #tpu.memory_space<vmem>>, vector<512x128xbf16>
    %c0_5 = arith.constant 0 : index
    %c0_6 = arith.constant 0 : index
    %4 = vector.load %arg5[%c0_5, %c0_6] : memref<128x128xbf16, #tpu.memory_space<vmem>>, vector<128x128xbf16>
    %cst_7 = arith.constant dense<0.000000e+00> : vector<512x128xf32>
    %5 = tpu.matmul %3, %4, %cst_7 {dimension_numbers = #tpu.dot_dimension_numbers<[1], [0], [0], [1], [0, 0, 1, 1], [], []>} : vector<512x128xbf16>, vector<128x128xbf16>, vector<512x128xf32> -> vector<512x128xf32>
    %6 = arith.addf %2, %5 : vector<512x128xf32>
    %cst_8 = arith.constant dense<0.000000e+00> : vector<128xf32>
    %7 = vector.multi_reduction <add>, %6, %cst_8 [0] : vector<512x128xf32> to vector<128xf32>
    %8 = vector.shape_cast %7 : vector<128xf32> to vector<1x128xf32>
    %9 = vector.shape_cast %8 : vector<1x128xf32> to vector<1x1x128xf32>
    %c0_9 = arith.constant 0 : index
    %c0_10 = arith.constant 0 : index
    %c0_11 = arith.constant 0 : index
    %10 = vector.load %arg7[%c0_9, %c0_10, %c0_11] : memref<1x1x128xf32, #tpu.memory_space<vmem>>, vector<1x1x128xf32>
    tpu.vector_store %arg7[%c0_9, %c0_10, %c0_11], %9 {strides = array<i32>} : memref<1x1x128xf32, #tpu.memory_space<vmem>>, vector<1x1x128xf32>,
    %11 = arith.mulf %6, %6 : vector<512x128xf32>
    %cst_12 = arith.constant dense<0.000000e+00> : vector<128xf32>
    %12 = vector.multi_reduction <add>, %11, %cst_12 [0] : vector<512x128xf32> to vector<128xf32>
    %13 = vector.shape_cast %12 : vector<128xf32> to vector<1x128xf32>
    %14 = vector.shape_cast %13 : vector<1x128xf32> to vector<1x1x128xf32>
    %c0_13 = arith.constant 0 : index
    %c0_14 = arith.constant 0 : index
    %c0_15 = arith.constant 0 : index
    %15 = vector.load %arg8[%c0_13, %c0_14, %c0_15] : memref<1x1x128xf32, #tpu.memory_space<vmem>>, vector<1x1x128xf32>
    tpu.vector_store %arg8[%c0_13, %c0_14, %c0_15], %14 {strides = array<i32>} : memref<1x1x128xf32, #tpu.memory_space<vmem>>, vector<1x1x128xf32>,
    %16 = arith.truncf %6 : vector<512x128xf32> to vector<512x128xbf16>
    %c0_16 = arith.constant 0 : index
    %c0_17 = arith.constant 0 : index
    %17 = vector.load %arg6[%c0_16, %c0_17] : memref<512x128xbf16, #tpu.memory_space<vmem>>, vector<512x128xbf16>
    tpu.vector_store %arg6[%c0_16, %c0_17], %16 {strides = array<i32>} : memref<512x128xbf16, #tpu.memory_space<vmem>>, vector<512x128xbf16>,
    return
  }
  func.func @transform_0(%arg0: i32, %arg1: i32) -> (i32, i32) {
    %c0_i32 = arith.constant 0 : i32
    %c0_i32_0 = arith.constant 0 : i32
    return %arg0, %c0_i32 : i32, i32
  }
  func.func @transform_1(%arg0: i32, %arg1: i32) -> (i32, i32) {
    %c0_i32 = arith.constant 0 : i32
    %c0_i32_0 = arith.constant 0 : i32
    return %arg0, %c0_i32 : i32, i32
  }
  func.func @transform_2(%arg0: i32, %arg1: i32) -> (i32, i32) {
    %c0_i32 = arith.constant 0 : i32
    %c0_i32_0 = arith.constant 0 : i32
    return %c0_i32, %arg1 : i32, i32
  }
  func.func @transform_3(%arg0: i32, %arg1: i32) -> (i32, i32) {
    %c0_i32 = arith.constant 0 : i32
    %c0_i32_0 = arith.constant 0 : i32
    return %c0_i32, %arg1 : i32, i32
  }
  func.func @transform_4(%arg0: i32, %arg1: i32) -> (i32, i32) {
    %c0_i32 = arith.constant 0 : i32
    return %arg0, %arg1 : i32, i32
  }
  func.func @transform_5(%arg0: i32, %arg1: i32) -> (i32, i32, i32) {
    %c0_i32 = arith.constant 0 : i32
    %c0_i32_0 = arith.constant 0 : i32
    return %arg0, %c0_i32, %arg1 : i32, i32, i32
  }
  func.func @transform_6(%arg0: i32, %arg1: i32) -> (i32, i32, i32) {
    %c0_i32 = arith.constant 0 : i32
    %c0_i32_0 = arith.constant 0 : i32
    return %arg0, %c0_i32, %arg1 : i32, i32, i32
  }
}

</mosaic_0001>

<bundles_post_ra>
// kernel: psp_forward.11
= control target key start
LH: loop header
LB: loop body
LE: loop exit
PB: predicated region body
PF: predicated region fallthrough
CT: control target
= control target key end

     0   :  { %s1438_s0 = inlined_call_operand.vmem [shape: bf16[512,128], index: 0, kind: input, shape index: {}]   ;;  %s1439_s1 = inlined_call_operand.vmem [shape: f32[1,128], index: 1, kind: input, shape index: {}]   ;;  %s1440_s2 = inlined_call_operand.vmem [shape: f32[1,128], index: 2, kind: input, shape index: {}]   ;;  %s1441_s3 = inlined_call_operand.vmem [shape: bf16[512,128], index: 3, kind: output, shape index: {}]  }
   0x1   :  { %v739_v0 = vld [vmem:[%s1438_s0] sm:$0xff]   ;;  %v1026_v4 = vld [vmem:[%s1438_s0 + $0x8] sm:$0xff]   ;;  %v1027_v5 = vld [vmem:[%s1438_s0 + $0x10] sm:$0xff]  }
   0x2   :  { %v1114_v1 = vld [vmem:[%s1439_s1] ss:$0 sm:$0xff]  ;;  %v740_v2 = vunpack.c.l.bf16 %v739_v0  ;;  %v741_v3 = vunpack.c.h.bf16 %v739_v0  ;;  %v1028_v6 = vld [vmem:[%s1438_s0 + $0x18] sm:$0xff]   ;;  %v744_v8 = vunpack.c.l.bf16 %v1026_v4  ;;  %v745_v9 = vunpack.c.h.bf16 %v1026_v4  ;;  %v1030_v25 = vld [vmem:[%s1438_s0 + $0x28] sm:$0xff]  }
   0x3   :  { %v1128_v7 = vld [vmem:[%s1440_s2] ss:$0 sm:$0xff]  ;;  %v748_v10 = vunpack.c.l.bf16 %v1027_v5  ;;  %v749_v11 = vunpack.c.h.bf16 %v1027_v5  ;;  %v752_v14 = vunpack.c.l.bf16 %v1028_v6  ;;  %v753_v15 = vunpack.c.h.bf16 %v1028_v6  ;;  %v1031_v30 = vld [vmem:[%s1438_s0 + $0x30] sm:$0xff]   ;;  %v1032_v35 = vld [vmem:[%s1438_s0 + $0x38] sm:$0xff]  }
   0x4   :  { %v149_v12 = vmul.f32 %v740_v2, %v1114_v1  ;;  %v150_v13 = vmul.f32 %v741_v3, %v1114_v1  ;;  %v151_v16 = vmul.f32 %v744_v8, %v1114_v1  ;;  %v152_v17 = vmul.f32 %v745_v9, %v1114_v1  ;;  %v1029_v20 = vld [vmem:[%s1438_s0 + $0x20] sm:$0xff]   ;;  %v1034_v57 = vld [vmem:[%s1438_s0 + $0x48] sm:$0xff]   ;;  %v1035_v62 = vld [vmem:[%s1438_s0 + $0x50] sm:$0xff]  }
   0x5   :  { %v153_v18 = vmul.f32 %v748_v10, %v1114_v1  ;;  %v154_v19 = vmul.f32 %v749_v11, %v1114_v1  ;;  %v155_v23 = vmul.f32 %v752_v14, %v1114_v1  ;;  %v156_v24 = vmul.f32 %v753_v15, %v1114_v1  ;;  %v1033_v48 = vld [vmem:[%s1438_s0 + $0x40] sm:$0xff]   ;;  %v1036_v9 = vld [vmem:[%s1438_s0 + $0x58] sm:$0xff]  }
   0x6   :  { %v220_v21 = vadd.f32 %v1128_v7, %v149_v12  ;;  %v221_v22 = vadd.f32 %v1128_v7, %v150_v13  ;;  %v222_v26 = vadd.f32 %v1128_v7, %v151_v16  ;;  %v223_v27 = vadd.f32 %v1128_v7, %v152_v17  ;;  %v1037_v14 = vld [vmem:[%s1438_s0 + $0x60] sm:$0xff]  }
   0x7   :  { %v224_v28 = vadd.f32 %v1128_v7, %v153_v18  ;;  %v225_v29 = vadd.f32 %v1128_v7, %v154_v19  ;;  %v226_v32 = vadd.f32 %v1128_v7, %v155_v23  ;;  %v227_v33 = vadd.f32 %v1128_v7, %v156_v24 }
   0x8   :  { %v869_v31 = vpack.c.bf16 %v221_v22, %v220_v21  ;;  %v756_v34 = vunpack.c.l.bf16 %v1029_v20  ;;  %v874_v36 = vpack.c.bf16 %v223_v27, %v222_v26  ;;  %v757_v38 = vunpack.c.h.bf16 %v1029_v20  ;;  %v1038_v27 = vld [vmem:[%s1438_s0 + $0x68] sm:$0xff]  }
   0x9   :  { %v879_v37 = vpack.c.bf16 %v225_v29, %v224_v28  ;;  %v760_v39 = vunpack.c.l.bf16 %v1030_v25  ;;  %v884_v40 = vpack.c.bf16 %v227_v33, %v226_v32  ;;  %v761_v42 = vunpack.c.h.bf16 %v1030_v25 }
   0xa   :  { %870 = vst [vmem:[%s1441_s3] sm:$0xff] %v869_v31   ;;  %v157_v41 = vmul.f32 %v756_v34, %v1114_v1  ;;  %v764_v43 = vunpack.c.l.bf16 %v1031_v30  ;;  %1057 = vst [vmem:[%s1441_s3 + $0x8] sm:$0xff] %v874_v36   ;;  %v158_v44 = vmul.f32 %v757_v38, %v1114_v1  ;;  %v765_v46 = vunpack.c.h.bf16 %v1031_v30  ;;  %v1039_v36 = vld [vmem:[%s1438_s0 + $0x70] sm:$0xff]  }
   0xb   :  { %1058 = vst [vmem:[%s1441_s3 + $0x10] sm:$0xff] %v879_v37   ;;  %v159_v45 = vmul.f32 %v760_v39, %v1114_v1  ;;  %v768_v47 = vunpack.c.l.bf16 %v1032_v35  ;;  %1059 = vst [vmem:[%s1441_s3 + $0x18] sm:$0xff] %v884_v40   ;;  %v160_v50 = vmul.f32 %v761_v42, %v1114_v1  ;;  %v769_v52 = vunpack.c.h.bf16 %v1032_v35 }
   0xc   :  { %v228_v49 = vadd.f32 %v1128_v7, %v157_v41  ;;  %v161_v51 = vmul.f32 %v764_v43, %v1114_v1  ;;  %v229_v53 = vadd.f32 %v1128_v7, %v158_v44  ;;  %v162_v55 = vmul.f32 %v765_v46, %v1114_v1  ;;  %v1040_v41 = vld [vmem:[%s1438_s0 + $0x78] sm:$0xff]  }
   0xd   :  { %v230_v54 = vadd.f32 %v1128_v7, %v159_v45  ;;  %v163_v56 = vmul.f32 %v768_v47, %v1114_v1  ;;  %v231_v58 = vadd.f32 %v1128_v7, %v160_v50  ;;  %v164_v60 = vmul.f32 %v769_v52, %v1114_v1  ;;  %v1041_v50 = vld [vmem:[%s1438_s0 + $0x80] sm:$0xff]  }
   0xe   :  { %v232_v59 = vadd.f32 %v1128_v7, %v161_v51  ;;  %v772_v61 = vunpack.c.l.bf16 %v1033_v48  ;;  %v889_v63 = vpack.c.bf16 %v229_v53, %v228_v49  ;;  %v233_v0 = vadd.f32 %v1128_v7, %v162_v55 }
   0xf   :  { %v234_v2 = vadd.f32 %v1128_v7, %v163_v56  ;;  %v773_v3 = vunpack.c.h.bf16 %v1033_v48  ;;  %v894_v4 = vpack.c.bf16 %v231_v58, %v230_v54  ;;  %v235_v5 = vadd.f32 %v1128_v7, %v164_v60 }
  0x10   :  { %v165_v6 = vmul.f32 %v772_v61, %v1114_v1  ;;  %v776_v8 = vunpack.c.l.bf16 %v1034_v57  ;;  %1060 = vst [vmem:[%s1441_s3 + $0x20] sm:$0xff] %v889_v63   ;;  %v899_v10 = vpack.c.bf16 %v233_v0, %v232_v59  ;;  %v777_v12 = vunpack.c.h.bf16 %v1034_v57  ;;  %v1042_v59 = vld [vmem:[%s1438_s0 + $0x88] sm:$0xff]   ;;  %v1043_v0 = vld [vmem:[%s1438_s0 + $0x90] sm:$0xff]  }
  0x11   :  { %v166_v11 = vmul.f32 %v773_v3, %v1114_v1  ;;  %v780_v13 = vunpack.c.l.bf16 %v1035_v62  ;;  %1061 = vst [vmem:[%s1441_s3 + $0x28] sm:$0xff] %v894_v4   ;;  %v904_v15 = vpack.c.bf16 %v235_v5, %v234_v2  ;;  %v781_v18 = vunpack.c.h.bf16 %v1035_v62 }
  0x12   :  { %v236_v16 = vadd.f32 %v1128_v7, %v165_v6  ;;  %v167_v17 = vmul.f32 %v776_v8, %v1114_v1  ;;  %1062 = vst [vmem:[%s1441_s3 + $0x30] sm:$0xff] %v899_v10   ;;  %v168_v20 = vmul.f32 %v777_v12, %v1114_v1  ;;  %v784_v22 = vunpack.c.l.bf16 %v1036_v9 }
  0x13   :  { %v237_v19 = vadd.f32 %v1128_v7, %v166_v11  ;;  %v169_v21 = vmul.f32 %v780_v13, %v1114_v1  ;;  %1063 = vst [vmem:[%s1441_s3 + $0x38] sm:$0xff] %v904_v15   ;;  %v170_v24 = vmul.f32 %v781_v18, %v1114_v1  ;;  %v785_v25 = vunpack.c.h.bf16 %v1036_v9  ;;  %v1044_v11 = vld [vmem:[%s1438_s0 + $0x98] sm:$0xff]  }
  0x14   :  { %v238_v23 = vadd.f32 %v1128_v7, %v167_v17  ;;  %v788_v26 = vunpack.c.l.bf16 %v1037_v14  ;;  %v239_v29 = vadd.f32 %v1128_v7, %v168_v20  ;;  %v171_v31 = vmul.f32 %v784_v22, %v1114_v1 }
  0x15   :  { %v909_v28 = vpack.c.bf16 %v237_v19, %v236_v16  ;;  %v240_v30 = vadd.f32 %v1128_v7, %v169_v21  ;;  %v241_v32 = vadd.f32 %v1128_v7, %v170_v24  ;;  %v172_v33 = vmul.f32 %v785_v25, %v1114_v1  ;;  %v1045_v16 = vld [vmem:[%s1438_s0 + $0xa0] sm:$0xff]  }
  0x16   :  { %v789_v34 = vunpack.c.h.bf16 %v1037_v14  ;;  %v173_v35 = vmul.f32 %v788_v26, %v1114_v1  ;;  %v914_v37 = vpack.c.bf16 %v239_v29, %v238_v23  ;;  %v242_v38 = vadd.f32 %v1128_v7, %v171_v31  ;;  %v1046_v29 = vld [vmem:[%s1438_s0 + $0xa8] sm:$0xff]  }
  0x17   :  { %1064 = vst [vmem:[%s1441_s3 + $0x40] sm:$0xff] %v909_v28   ;;  %v792_v39 = vunpack.c.l.bf16 %v1038_v27  ;;  %v793_v40 = vunpack.c.h.bf16 %v1038_v27  ;;  %v919_v42 = vpack.c.bf16 %v241_v32, %v240_v30  ;;  %v243_v43 = vadd.f32 %v1128_v7, %v172_v33 }
  0x18   :  { %v174_v44 = vmul.f32 %v789_v34, %v1114_v1  ;;  %v244_v45 = vadd.f32 %v1128_v7, %v173_v35  ;;  %1065 = vst [vmem:[%s1441_s3 + $0x48] sm:$0xff] %v914_v37   ;;  %v796_v48 = vunpack.c.l.bf16 %v1039_v36  ;;  %v797_v49 = vunpack.c.h.bf16 %v1039_v36 }
  0x19   :  { %v175_v46 = vmul.f32 %v792_v39, %v1114_v1  ;;  %v176_v47 = vmul.f32 %v793_v40, %v1114_v1  ;;  %1066 = vst [vmem:[%s1441_s3 + $0x50] sm:$0xff] %v919_v42   ;;  %v924_v51 = vpack.c.bf16 %v243_v43, %v242_v38  ;;  %v800_v53 = vunpack.c.l.bf16 %v1040_v41  ;;  %v1047_v38 = vld [vmem:[%s1438_s0 + $0xb0] sm:$0xff]   ;;  %v1048_v43 = vld [vmem:[%s1438_s0 + $0xb8] sm:$0xff]  }
  0x1a   :  { %v245_v52 = vadd.f32 %v1128_v7, %v174_v44  ;;  %v801_v54 = vunpack.c.h.bf16 %v1040_v41  ;;  %v177_v57 = vmul.f32 %v796_v48, %v1114_v1  ;;  %v178_v58 = vmul.f32 %v797_v49, %v1114_v1 }
  0x1b   :  { %v246_v55 = vadd.f32 %v1128_v7, %v175_v46  ;;  %v247_v56 = vadd.f32 %v1128_v7, %v176_v47  ;;  %1067 = vst [vmem:[%s1441_s3 + $0x58] sm:$0xff] %v924_v51   ;;  %v179_v61 = vmul.f32 %v800_v53, %v1114_v1  ;;  %v804_v63 = vunpack.c.l.bf16 %v1041_v50 }
  0x1c   :  { %v929_v60 = vpack.c.bf16 %v245_v52, %v244_v45  ;;  %v180_v62 = vmul.f32 %v801_v54, %v1114_v1  ;;  %v248_v3 = vadd.f32 %v1128_v7, %v177_v57  ;;  %v249_v4 = vadd.f32 %v1128_v7, %v178_v58  ;;  %v1049_v52 = vld [vmem:[%s1438_s0 + $0xc0] sm:$0xff]  }
  0x1d   :  { %v934_v2 = vpack.c.bf16 %v247_v56, %v246_v55  ;;  %v805_v5 = vunpack.c.h.bf16 %v1041_v50  ;;  %v250_v6 = vadd.f32 %v1128_v7, %v179_v61  ;;  %v181_v9 = vmul.f32 %v804_v63, %v1114_v1  ;;  %v1050_v61 = vld [vmem:[%s1438_s0 + $0xc8] sm:$0xff]  }
  0x1e   :  { %1068 = vst [vmem:[%s1441_s3 + $0x60] sm:$0xff] %v929_v60   ;;  %v251_v8 = vadd.f32 %v1128_v7, %v180_v62  ;;  %v808_v10 = vunpack.c.l.bf16 %v1042_v59  ;;  %v939_v12 = vpack.c.bf16 %v249_v4, %v248_v3  ;;  %v809_v14 = vunpack.c.h.bf16 %v1042_v59  ;;  %v1051_v3 = vld [vmem:[%s1438_s0 + $0xd0] sm:$0xff]  }
  0x1f   :  { %1069 = vst [vmem:[%s1441_s3 + $0x68] sm:$0xff] %v934_v2   ;;  %v182_v13 = vmul.f32 %v805_v5, %v1114_v1  ;;  %v812_v15 = vunpack.c.l.bf16 %v1043_v0  ;;  %v252_v18 = vadd.f32 %v1128_v7, %v181_v9  ;;  %v813_v20 = vunpack.c.h.bf16 %v1043_v0 }
  0x20   :  { %v944_v17 = vpack.c.bf16 %v251_v8, %v250_v6  ;;  %v183_v19 = vmul.f32 %v808_v10, %v1114_v1  ;;  %1070 = vst [vmem:[%s1441_s3 + $0x70] sm:$0xff] %v939_v12   ;;  %v184_v22 = vmul.f32 %v809_v14, %v1114_v1  ;;  %v816_v24 = vunpack.c.l.bf16 %v1044_v11 }
  0x21   :  { %v253_v21 = vadd.f32 %v1128_v7, %v182_v13  ;;  %v185_v23 = vmul.f32 %v812_v15, %v1114_v1  ;;  %v186_v26 = vmul.f32 %v813_v20, %v1114_v1  ;;  %v817_v27 = vunpack.c.h.bf16 %v1044_v11  ;;  %v1052_v13 = vld [vmem:[%s1438_s0 + $0xd8] sm:$0xff]  }
  0x22   :  { %1071 = vst [vmem:[%s1441_s3 + $0x78] sm:$0xff] %v944_v17   ;;  %v254_v25 = vadd.f32 %v1128_v7, %v183_v19  ;;  %v820_v28 = vunpack.c.l.bf16 %v1045_v16  ;;  %v255_v31 = vadd.f32 %v1128_v7, %v184_v22  ;;  %v187_v33 = vmul.f32 %v816_v24, %v1114_v1 }
  0x23   :  { %v949_v30 = vpack.c.bf16 %v253_v21, %v252_v18  ;;  %v256_v32 = vadd.f32 %v1128_v7, %v185_v23  ;;  %v257_v34 = vadd.f32 %v1128_v7, %v186_v26  ;;  %v188_v35 = vmul.f32 %v817_v27, %v1114_v1  ;;  %v1053_v18 = vld [vmem:[%s1438_s0 + $0xe0] sm:$0xff]  }
  0x24   :  { %v821_v36 = vunpack.c.h.bf16 %v1045_v16  ;;  %v189_v37 = vmul.f32 %v820_v28, %v1114_v1  ;;  %v954_v39 = vpack.c.bf16 %v255_v31, %v254_v25  ;;  %v258_v40 = vadd.f32 %v1128_v7, %v187_v33  ;;  %v1054_v31 = vld [vmem:[%s1438_s0 + $0xe8] sm:$0xff]  }
  0x25   :  { %1072 = vst [vmem:[%s1441_s3 + $0x80] sm:$0xff] %v949_v30   ;;  %v824_v41 = vunpack.c.l.bf16 %v1046_v29  ;;  %v825_v42 = vunpack.c.h.bf16 %v1046_v29  ;;  %v959_v44 = vpack.c.bf16 %v257_v34, %v256_v32  ;;  %v259_v45 = vadd.f32 %v1128_v7, %v188_v35 }
  0x26   :  { %v190_v46 = vmul.f32 %v821_v36, %v1114_v1  ;;  %v260_v47 = vadd.f32 %v1128_v7, %v189_v37  ;;  %1073 = vst [vmem:[%s1441_s3 + $0x88] sm:$0xff] %v954_v39   ;;  %v828_v50 = vunpack.c.l.bf16 %v1047_v38  ;;  %v829_v51 = vunpack.c.h.bf16 %v1047_v38 }
  0x27   :  { %v191_v48 = vmul.f32 %v824_v41, %v1114_v1  ;;  %v192_v49 = vmul.f32 %v825_v42, %v1114_v1  ;;  %1074 = vst [vmem:[%s1441_s3 + $0x90] sm:$0xff] %v959_v44   ;;  %v964_v53 = vpack.c.bf16 %v259_v45, %v258_v40  ;;  %v832_v55 = vunpack.c.l.bf16 %v1048_v43  ;;  %v1055_v40 = vld [vmem:[%s1438_s0 + $0xf0] sm:$0xff]   ;;  %v1056_v45 = vld [vmem:[%s1438_s0 + $0xf8] sm:$0xff]  }
  0x28   :  { %v261_v54 = vadd.f32 %v1128_v7, %v190_v46  ;;  %v833_v56 = vunpack.c.h.bf16 %v1048_v43  ;;  %v193_v59 = vmul.f32 %v828_v50, %v1114_v1  ;;  %v194_v60 = vmul.f32 %v829_v51, %v1114_v1 }
  0x29   :  { %v262_v57 = vadd.f32 %v1128_v7, %v191_v48  ;;  %v263_v58 = vadd.f32 %v1128_v7, %v192_v49  ;;  %1075 = vst [vmem:[%s1441_s3 + $0x98] sm:$0xff] %v964_v53   ;;  %v195_v63 = vmul.f32 %v832_v55, %v1114_v1  ;;  %v836_v2 = vunpack.c.l.bf16 %v1049_v52 }
  0x2a   :  { %v969_v62 = vpack.c.bf16 %v261_v54, %v260_v47  ;;  %v196_v0 = vmul.f32 %v833_v56, %v1114_v1  ;;  %v264_v5 = vadd.f32 %v1128_v7, %v193_v59  ;;  %v265_v6 = vadd.f32 %v1128_v7, %v194_v60 }
  0x2b   :  { %v974_v4 = vpack.c.bf16 %v263_v58, %v262_v57  ;;  %v837_v8 = vunpack.c.h.bf16 %v1049_v52  ;;  %v266_v9 = vadd.f32 %v1128_v7, %v195_v63  ;;  %v197_v11 = vmul.f32 %v836_v2, %v1114_v1 }
  0x2c   :  { %1076 = vst [vmem:[%s1441_s3 + $0xa0] sm:$0xff] %v969_v62   ;;  %v267_v10 = vadd.f32 %v1128_v7, %v196_v0  ;;  %v840_v12 = vunpack.c.l.bf16 %v1050_v61  ;;  %v979_v14 = vpack.c.bf16 %v265_v6, %v264_v5  ;;  %v841_v16 = vunpack.c.h.bf16 %v1050_v61 }
  0x2d   :  { %1077 = vst [vmem:[%s1441_s3 + $0xa8] sm:$0xff] %v974_v4   ;;  %v198_v15 = vmul.f32 %v837_v8, %v1114_v1  ;;  %v844_v17 = vunpack.c.l.bf16 %v1051_v3  ;;  %v268_v20 = vadd.f32 %v1128_v7, %v197_v11  ;;  %v845_v22 = vunpack.c.h.bf16 %v1051_v3 }
  0x2e   :  { %v984_v19 = vpack.c.bf16 %v267_v10, %v266_v9  ;;  %v199_v21 = vmul.f32 %v840_v12, %v1114_v1  ;;  %1078 = vst [vmem:[%s1441_s3 + $0xb0] sm:$0xff] %v979_v14   ;;  %v200_v24 = vmul.f32 %v841_v16, %v1114_v1  ;;  %v848_v26 = vunpack.c.l.bf16 %v1052_v13 }
  0x2f   :  { %v269_v23 = vadd.f32 %v1128_v7, %v198_v15  ;;  %v201_v25 = vmul.f32 %v844_v17, %v1114_v1  ;;  %v202_v28 = vmul.f32 %v845_v22, %v1114_v1  ;;  %v849_v29 = vunpack.c.h.bf16 %v1052_v13 }
  0x30   :  { %1079 = vst [vmem:[%s1441_s3 + $0xb8] sm:$0xff] %v984_v19   ;;  %v270_v27 = vadd.f32 %v1128_v7, %v199_v21  ;;  %v852_v30 = vunpack.c.l.bf16 %v1053_v18  ;;  %v271_v33 = vadd.f32 %v1128_v7, %v200_v24  ;;  %v203_v35 = vmul.f32 %v848_v26, %v1114_v1 }
  0x31   :  { %v989_v32 = vpack.c.bf16 %v269_v23, %v268_v20  ;;  %v272_v34 = vadd.f32 %v1128_v7, %v201_v25  ;;  %v273_v36 = vadd.f32 %v1128_v7, %v202_v28  ;;  %v204_v37 = vmul.f32 %v849_v29, %v1114_v1 }
  0x32   :  { %v853_v38 = vunpack.c.h.bf16 %v1053_v18  ;;  %v205_v39 = vmul.f32 %v852_v30, %v1114_v1  ;;  %v994_v41 = vpack.c.bf16 %v271_v33, %v270_v27  ;;  %v274_v42 = vadd.f32 %v1128_v7, %v203_v35 }
  0x33   :  { %1080 = vst [vmem:[%s1441_s3 + $0xc0] sm:$0xff] %v989_v32   ;;  %v856_v43 = vunpack.c.l.bf16 %v1054_v31  ;;  %v857_v44 = vunpack.c.h.bf16 %v1054_v31  ;;  %v999_v46 = vpack.c.bf16 %v273_v36, %v272_v34  ;;  %v275_v47 = vadd.f32 %v1128_v7, %v204_v37 }
  0x34   :  { %v206_v48 = vmul.f32 %v853_v38, %v1114_v1  ;;  %v276_v49 = vadd.f32 %v1128_v7, %v205_v39  ;;  %1081 = vst [vmem:[%s1441_s3 + $0xc8] sm:$0xff] %v994_v41   ;;  %v860_v52 = vunpack.c.l.bf16 %v1055_v40  ;;  %v861_v53 = vunpack.c.h.bf16 %v1055_v40 }
  0x35   :  { %v207_v50 = vmul.f32 %v856_v43, %v1114_v1  ;;  %v208_v51 = vmul.f32 %v857_v44, %v1114_v1  ;;  %1082 = vst [vmem:[%s1441_s3 + $0xd0] sm:$0xff] %v999_v46   ;;  %v1004_v54 = vpack.c.bf16 %v275_v47, %v274_v42  ;;  %v864_v56 = vunpack.c.l.bf16 %v1056_v45 }
  0x36   :  { %v277_v55 = vadd.f32 %v1128_v7, %v206_v48  ;;  %v865_v57 = vunpack.c.h.bf16 %v1056_v45  ;;  %v209_v60 = vmul.f32 %v860_v52, %v1114_v1  ;;  %v210_v61 = vmul.f32 %v861_v53, %v1114_v1 }
  0x37   :  { %v278_v58 = vadd.f32 %v1128_v7, %v207_v50  ;;  %v279_v59 = vadd.f32 %v1128_v7, %v208_v51  ;;  %1083 = vst [vmem:[%s1441_s3 + $0xd8] sm:$0xff] %v1004_v54   ;;  %v211_v63 = vmul.f32 %v864_v56, %v1114_v1 }
  0x38   :  { %v1009_v62 = vpack.c.bf16 %v277_v55, %v276_v49  ;;  %v212_v0 = vmul.f32 %v865_v57, %v1114_v1  ;;  %v280_v3 = vadd.f32 %v1128_v7, %v209_v60  ;;  %v281_v4 = vadd.f32 %v1128_v7, %v210_v61 }
  0x39   :  { %v1014_v2 = vpack.c.bf16 %v279_v59, %v278_v58  ;;  %v282_v5 = vadd.f32 %v1128_v7, %v211_v63 }
  0x3a   :  { %1084 = vst [vmem:[%s1441_s3 + $0xe0] sm:$0xff] %v1009_v62   ;;  %v283_v6 = vadd.f32 %v1128_v7, %v212_v0  ;;  %v1019_v8 = vpack.c.bf16 %v281_v4, %v280_v3 }
  0x3b   :  { %1085 = vst [vmem:[%s1441_s3 + $0xe8] sm:$0xff] %v1014_v2  }
  0x3c   :  { %v1024_v9 = vpack.c.bf16 %v283_v6, %v282_v5  ;;  %1086 = vst [vmem:[%s1441_s3 + $0xf0] sm:$0xff] %v1019_v8  }
  0x3e   :  { %1087 = vst [vmem:[%s1441_s3 + $0xf8] sm:$0xff] %v1024_v9  }

// kernel: psp_forward.10
= control target key start
LH: loop header
LB: loop body
LE: loop exit
PB: predicated region body
PF: predicated region fallthrough
CT: control target
= control target key end

     0   :  { %s2134_s1 = inlined_call_operand.vmem [shape: bf16[128,128], index: 1, kind: input, shape index: {}]   ;;  %s2135_s0 = inlined_call_operand.vmem [shape: bf16[512,128], index: 0, kind: input, shape index: {}]   ;;  %s2136_s2 = inlined_call_operand.vmem [shape: bf16[512,128], index: 2, kind: output, shape index: {0}]   ;;  %s2137_s3 = inlined_call_operand.vmem [shape: f32[1,1,128], index: 3, kind: output, shape index: {1}]   ;;  %s2138_s4 = inlined_call_operand.vmem [shape: f32[1,1,128], index: 4, kind: output, shape index: {2}]  }
   0x1   :  { %v1655_v0 = vld [vmem:[%s2134_s1] sm:$0xff]   ;;  %v1656_v1 = vld [vmem:[%s2134_s1 + $0x8] sm:$0xff]   ;;  %v1657_v2 = vld [vmem:[%s2134_s1 + $0x10] sm:$0xff]  }
   0x2   :  { %1559 = vmatprep.subr.bf16.mxu0 %v1655_v0  ;;  %1639 = vmatprep.subr.bf16.mxu1 %v1655_v0  ;;  %v1658_v3 = vld [vmem:[%s2134_s1 + $0x18] sm:$0xff]   ;;  %v1663_v4 = vld [vmem:[%s2135_s0] sm:$0xff]   ;;  %v1660_v6 = vld [vmem:[%s2134_s1 + $0x28] sm:$0xff]  }
   0x3   :  { %1560 = vmatpush3.bf16.msra.mxu0 %v1655_v0  ;;  %1647 = vmatpush3.bf16.msra.mxu1 %v1655_v0  ;;  %v1659_v5 = vld [vmem:[%s2134_s1 + $0x20] sm:$0xff]   ;;  %v1661_v7 = vld [vmem:[%s2134_s1 + $0x30] sm:$0xff]   ;;  %v1662_v8 = vld [vmem:[%s2134_s1 + $0x38] sm:$0xff]  }
   0x4   :  { %1561 = vmatprep.subr.bf16.mxu0 %v1656_v1  ;;  %1640 = vmatprep.subr.bf16.mxu1 %v1656_v1  ;;  %v1679_v9 = vld [vmem:[%s2135_s0 + $0x80] sm:$0xff]   ;;  %v1664_v10 = vld [vmem:[%s2135_s0 + $0x8] sm:$0xff]   ;;  %v1665_v11 = vld [vmem:[%s2135_s0 + $0x10] sm:$0xff]  }
   0x5   :  { %1575 = vmatprep.mubr.bf16.mxu0 %v1663_v4  ;;  %1607 = vmatprep.mubr.bf16.mxu1 %v1679_v9  ;;  %v1680_v12 = vld [vmem:[%s2135_s0 + $0x88] sm:$0xff]   ;;  %v1681_v13 = vld [vmem:[%s2135_s0 + $0x90] sm:$0xff]   ;;  %v1666_v14 = vld [vmem:[%s2135_s0 + $0x18] sm:$0xff]  }
   0x6   :  { %v1667_v15 = vld [vmem:[%s2135_s0 + $0x20] sm:$0xff]   ;;  %v1682_v16 = vld [vmem:[%s2135_s0 + $0x98] sm:$0xff]   ;;  %v1668_v18 = vld [vmem:[%s2135_s0 + $0x28] sm:$0xff]  }
   0x7   :  { %1562 = vmatpush3.bf16.msra.mxu0 %v1656_v1  ;;  %1648 = vmatpush3.bf16.msra.mxu1 %v1656_v1  ;;  %v1683_v17 = vld [vmem:[%s2135_s0 + $0xa0] sm:$0xff]   ;;  %v1684_v19 = vld [vmem:[%s2135_s0 + $0xa8] sm:$0xff]   ;;  %v1669_v20 = vld [vmem:[%s2135_s0 + $0x30] sm:$0xff]  }
   0x8   :  { %1563 = vmatprep.subr.bf16.mxu0 %v1657_v2  ;;  %1641 = vmatprep.subr.bf16.mxu1 %v1657_v2  ;;  %v1685_v21 = vld [vmem:[%s2135_s0 + $0xb0] sm:$0xff]   ;;  %v1670_v22 = vld [vmem:[%s2135_s0 + $0x38] sm:$0xff]   ;;  %v1671_v24 = vld [vmem:[%s2135_s0 + $0x40] sm:$0xff]  }
   0x9   :  { %v1686_v23 = vld [vmem:[%s2135_s0 + $0xb8] sm:$0xff]   ;;  %v1687_v25 = vld [vmem:[%s2135_s0 + $0xc0] sm:$0xff]   ;;  %v1672_v26 = vld [vmem:[%s2135_s0 + $0x48] sm:$0xff]  }
   0xa   :  { %v1688_v27 = vld [vmem:[%s2135_s0 + $0xc8] sm:$0xff]   ;;  %v1673_v28 = vld [vmem:[%s2135_s0 + $0x50] sm:$0xff]   ;;  %v1674_v30 = vld [vmem:[%s2135_s0 + $0x58] sm:$0xff]  }
   0xb   :  { %1564 = vmatpush3.bf16.msra.mxu0 %v1657_v2  ;;  %1649 = vmatpush3.bf16.msra.mxu1 %v1657_v2  ;;  %v1689_v29 = vld [vmem:[%s2135_s0 + $0xd0] sm:$0xff]   ;;  %v1690_v31 = vld [vmem:[%s2135_s0 + $0xd8] sm:$0xff]   ;;  %v1675_v32 = vld [vmem:[%s2135_s0 + $0x60] sm:$0xff]  }
   0xc   :  { %1565 = vmatprep.subr.bf16.mxu0 %v1658_v3  ;;  %1642 = vmatprep.subr.bf16.mxu1 %v1658_v3  ;;  %v1691_v33 = vld [vmem:[%s2135_s0 + $0xe0] sm:$0xff]   ;;  %v1676_v34 = vld [vmem:[%s2135_s0 + $0x68] sm:$0xff]   ;;  %v1677_v36 = vld [vmem:[%s2135_s0 + $0x70] sm:$0xff]  }
   0xd   :  { %v1692_v35 = vld [vmem:[%s2135_s0 + $0xe8] sm:$0xff]   ;;  %v1693_v37 = vld [vmem:[%s2135_s0 + $0xf0] sm:$0xff]   ;;  %v1678_v38 = vld [vmem:[%s2135_s0 + $0x78] sm:$0xff]  }
   0xe   :  { %v1694_v39 = vld [vmem:[%s2135_s0 + $0xf8] sm:$0xff]  }
   0xf   :  { %1566 = vmatpush3.bf16.msra.mxu0 %v1658_v3  ;;  %1650 = vmatpush3.bf16.msra.mxu1 %v1658_v3 }
  0x10   :  { %1567 = vmatprep.subr.bf16.mxu0 %v1659_v5  ;;  %1643 = vmatprep.subr.bf16.mxu1 %v1659_v5 }
  0x13   :  { %1568 = vmatpush3.bf16.msra.mxu0 %v1659_v5  ;;  %1651 = vmatpush3.bf16.msra.mxu1 %v1659_v5 }
  0x14   :  { %1569 = vmatprep.subr.bf16.mxu0 %v1660_v6  ;;  %1644 = vmatprep.subr.bf16.mxu1 %v1660_v6 }
  0x17   :  { %1570 = vmatpush3.bf16.msra.mxu0 %v1660_v6  ;;  %1652 = vmatpush3.bf16.msra.mxu1 %v1660_v6 }
  0x18   :  { %1571 = vmatprep.subr.bf16.mxu0 %v1661_v7  ;;  %1645 = vmatprep.subr.bf16.mxu1 %v1661_v7 }
  0x1b   :  { %1572 = vmatpush3.bf16.msra.mxu0 %v1661_v7  ;;  %1653 = vmatpush3.bf16.msra.mxu1 %v1661_v7 }
  0x1c   :  { %1573 = vmatprep.subr.bf16.mxu0 %v1662_v8  ;;  %1646 = vmatprep.subr.bf16.mxu1 %v1662_v8 }
  0x1f   :  { %1574 = vmatpush3.bf16.msra.mxu0 %v1662_v8  ;;  %1654 = vmatpush3.bf16.msra.mxu1 %v1662_v8 }
  0x22   :  { %1576 = vmatmul.mubr.bf16.vlgmr.msra.gmra.mrb[0].mxu0 %v1664_v10  ;;  %1608 = vmatmul.mubr.bf16.vlgmr.msra.gmra.mrb[0].mxu1 %v1680_v12 }
  0x23   :  { %1579 = vmatprep.mubr.bf16.mxu0 %v1665_v11  ;;  %1611 = vmatprep.mubr.bf16.mxu1 %v1681_v13 }
  0x2a   :  { %1580 = vmatmul.mubr.bf16.gmra.mrb[4].mxu0 %v1666_v14  ;;  %1612 = vmatmul.mubr.bf16.gmra.mrb[4].mxu1 %v1682_v16 }
  0x2b   :  { %1583 = vmatprep.mubr.bf16.mxu0 %v1667_v15  ;;  %1615 = vmatprep.mubr.bf16.mxu1 %v1683_v17 }
  0x32   :  { %1584 = vmatmul.mubr.bf16.gmra.mrb[8].mxu0 %v1668_v18  ;;  %1616 = vmatmul.mubr.bf16.gmra.mrb[8].mxu1 %v1684_v19 }
  0x33   :  { %1587 = vmatprep.mubr.bf16.mxu0 %v1669_v20  ;;  %1619 = vmatprep.mubr.bf16.mxu1 %v1685_v21 }
  0x3a   :  { %1588 = vmatmul.mubr.bf16.gmra.mrb[12].mxu0 %v1670_v22  ;;  %1620 = vmatmul.mubr.bf16.gmra.mrb[12].mxu1 %v1686_v23 }
  0x3b   :  { %1591 = vmatprep.mubr.bf16.mxu0 %v1671_v24  ;;  %1623 = vmatprep.mubr.bf16.mxu1 %v1687_v25 }
  0x42   :  { %1592 = vmatmul.mubr.bf16.gmra.mrb[16].mxu0 %v1672_v26  ;;  %1624 = vmatmul.mubr.bf16.gmra.mrb[16].mxu1 %v1688_v27 }
  0x43   :  { %1595 = vmatprep.mubr.bf16.mxu0 %v1673_v28  ;;  %1627 = vmatprep.mubr.bf16.mxu1 %v1689_v29 }
  0x4a   :  { %1596 = vmatmul.mubr.bf16.gmra.mrb[20].mxu0 %v1674_v30  ;;  %1628 = vmatmul.mubr.bf16.gmra.mrb[20].mxu1 %v1690_v31 }
  0x4b   :  { %1599 = vmatprep.mubr.bf16.mxu0 %v1675_v32  ;;  %1631 = vmatprep.mubr.bf16.mxu1 %v1691_v33 }
  0x52   :  { %1600 = vmatmul.mubr.bf16.gmra.mrb[24].mxu0 %v1676_v34  ;;  %1632 = vmatmul.mubr.bf16.gmra.mrb[24].mxu1 %v1692_v35 }
  0x53   :  { %1603 = vmatprep.mubr.bf16.mxu0 %v1677_v36  ;;  %1635 = vmatprep.mubr.bf16.mxu1 %v1693_v37 }
  0x5a   :  { %1604 = vmatmul.mubr.bf16.gmra.mrb[28].mxu0 %v1678_v38  ;;  %1636 = vmatmul.mubr.bf16.gmra.mrb[28].mxu1 %v1694_v39 }
  0xf5   :  { %v1577_v40 = vpop.f32.mrb[0].mxu0  ;;  %v1840_v41 = vpop.f32.mrb[0].mxu1 }
  0xf6   :  { %v369_v42 = vpop.f32.mrb[1].mxu0  ;;  %v1842_v43 = vpop.f32.mrb[1].mxu1  ;;  %v696_v55 = vmul.f32 %v1577_v40, %v1577_v40 }
  0xf7   :  { %v1578_v44 = vpop.f32.mrb[2].mxu0  ;;  %v1844_v45 = vpop.f32.mrb[2].mxu1  ;;  %v694_v50 = vmul.f32 %v369_v42, %v369_v42 }
  0xf8   :  { %v1336_v46 = vpack.c.bf16 %v1578_v44, %v1577_v40  ;;  %v372_v47 = vpop.f32.mrb[3].mxu0  ;;  %v1416_v48 = vpack.c.bf16 %v1844_v45, %v1840_v41  ;;  %v1848_v49 = vpop.f32.mrb[3].mxu1  ;;  %v697_v58 = vmul.f32 %v1578_v44, %v1578_v44 }
  0xf9   :  { %v624_v51 = vadd.f32 %v372_v47, %v369_v42  ;;  %v695_v52 = vmul.f32 %v372_v47, %v372_v47  ;;  %v1331_v53 = vpack.c.bf16 %v372_v47, %v369_v42  ;;  %v1411_v54 = vpack.c.bf16 %v1848_v49, %v1842_v43 }
  0xfa   :  { %1488 = vst [vmem:[%s2136_s2 + $0x8] sm:$0xff] %v1336_v46   ;;  %1504 = vst [vmem:[%s2136_s2 + $0x88] sm:$0xff] %v1416_v48  }
  0xfb   :  { %v625_v56 = vadd.f32 %v1577_v40, %v624_v51  ;;  %v758_v57 = vadd.f32 %v695_v52, %v694_v50  ;;  %1332 = vst [vmem:[%s2136_s2] sm:$0xff] %v1331_v53   ;;  %1503 = vst [vmem:[%s2136_s2 + $0x80] sm:$0xff] %v1411_v54  }
  0xfd   :  { %v759_v59 = vadd.f32 %v758_v57, %v696_v55  ;;  %v1581_v60 = vpop.f32.mrb[4].mxu0  ;;  %v626_v61 = vadd.f32 %v1578_v44, %v625_v56  ;;  %v1864_v62 = vpop.f32.mrb[4].mxu1 }
  0xfe   :  { %v385_v63 = vpop.f32.mrb[5].mxu0  ;;  %v1866_v0 = vpop.f32.mrb[5].mxu1  ;;  %v700_v15 = vmul.f32 %v1581_v60, %v1581_v60 }
  0xff   :  { %v627_v1 = vadd.f32 %v626_v61, %v385_v63  ;;  %v698_v2 = vmul.f32 %v385_v63, %v385_v63  ;;  %v760_v3 = vadd.f32 %v759_v59, %v697_v58  ;;  %v1582_v4 = vpop.f32.mrb[6].mxu0  ;;  %v1868_v5 = vpop.f32.mrb[6].mxu1 }
 0x100   :  { %v1346_v6 = vpack.c.bf16 %v1582_v4, %v1581_v60  ;;  %v388_v7 = vpop.f32.mrb[7].mxu0  ;;  %v1426_v8 = vpack.c.bf16 %v1868_v5, %v1864_v62  ;;  %v1872_v9 = vpop.f32.mrb[7].mxu1  ;;  %v701_v18 = vmul.f32 %v1582_v4, %v1582_v4 }
 0x101   :  { %v761_v10 = vadd.f32 %v760_v3, %v698_v2  ;;  %v628_v11 = vadd.f32 %v627_v1, %v388_v7  ;;  %v699_v12 = vmul.f32 %v388_v7, %v388_v7  ;;  %v1341_v13 = vpack.c.bf16 %v388_v7, %v385_v63 }
 0x102   :  { %1490 = vst [vmem:[%s2136_s2 + $0x18] sm:$0xff] %v1346_v6   ;;  %1506 = vst [vmem:[%s2136_s2 + $0x98] sm:$0xff] %v1426_v8   ;;  %v1421_v14 = vpack.c.bf16 %v1872_v9, %v1866_v0 }
 0x103   :  { %v629_v16 = vadd.f32 %v1581_v60, %v628_v11  ;;  %v762_v17 = vadd.f32 %v761_v10, %v699_v12  ;;  %1489 = vst [vmem:[%s2136_s2 + $0x10] sm:$0xff] %v1341_v13  }
 0x104   :  { %1505 = vst [vmem:[%s2136_s2 + $0x90] sm:$0xff] %v1421_v14  }
 0x105   :  { %v763_v19 = vadd.f32 %v762_v17, %v700_v15  ;;  %v1585_v20 = vpop.f32.mrb[8].mxu0  ;;  %v630_v21 = vadd.f32 %v1582_v4, %v629_v16  ;;  %v1888_v22 = vpop.f32.mrb[8].mxu1 }
 0x106   :  { %v401_v23 = vpop.f32.mrb[9].mxu0  ;;  %v1890_v24 = vpop.f32.mrb[9].mxu1  ;;  %v704_v39 = vmul.f32 %v1585_v20, %v1585_v20 }
 0x107   :  { %v631_v25 = vadd.f32 %v630_v21, %v401_v23  ;;  %v702_v26 = vmul.f32 %v401_v23, %v401_v23  ;;  %v764_v27 = vadd.f32 %v763_v19, %v701_v18  ;;  %v1586_v28 = vpop.f32.mrb[10].mxu0  ;;  %v1892_v29 = vpop.f32.mrb[10].mxu1 }
 0x108   :  { %v1356_v30 = vpack.c.bf16 %v1586_v28, %v1585_v20  ;;  %v404_v31 = vpop.f32.mrb[11].mxu0  ;;  %v1436_v32 = vpack.c.bf16 %v1892_v29, %v1888_v22  ;;  %v1896_v33 = vpop.f32.mrb[11].mxu1  ;;  %v705_v44 = vmul.f32 %v1586_v28, %v1586_v28 }
 0x109   :  { %v765_v34 = vadd.f32 %v764_v27, %v702_v26  ;;  %v632_v35 = vadd.f32 %v631_v25, %v404_v31  ;;  %v703_v36 = vmul.f32 %v404_v31, %v404_v31  ;;  %v1351_v37 = vpack.c.bf16 %v404_v31, %v401_v23 }
 0x10a   :  { %1492 = vst [vmem:[%s2136_s2 + $0x28] sm:$0xff] %v1356_v30   ;;  %1508 = vst [vmem:[%s2136_s2 + $0xa8] sm:$0xff] %v1436_v32   ;;  %v1431_v38 = vpack.c.bf16 %v1896_v33, %v1890_v24 }
 0x10b   :  { %v633_v40 = vadd.f32 %v1585_v20, %v632_v35  ;;  %v766_v42 = vadd.f32 %v765_v34, %v703_v36  ;;  %1491 = vst [vmem:[%s2136_s2 + $0x20] sm:$0xff] %v1351_v37  }
 0x10c   :  { %1507 = vst [vmem:[%s2136_s2 + $0xa0] sm:$0xff] %v1431_v38  }
 0x10d   :  { %v767_v46 = vadd.f32 %v766_v42, %v704_v39  ;;  %v1589_v47 = vpop.f32.mrb[12].mxu0  ;;  %v634_v48 = vadd.f32 %v1586_v28, %v633_v40  ;;  %v1912_v50 = vpop.f32.mrb[12].mxu1 }
 0x10e   :  { %v417_v51 = vpop.f32.mrb[13].mxu0  ;;  %v1914_v52 = vpop.f32.mrb[13].mxu1  ;;  %v708_v6 = vmul.f32 %v1589_v47, %v1589_v47 }
 0x10f   :  { %v635_v53 = vadd.f32 %v634_v48, %v417_v51  ;;  %v706_v54 = vmul.f32 %v417_v51, %v417_v51  ;;  %v768_v55 = vadd.f32 %v767_v46, %v705_v44  ;;  %v1590_v56 = vpop.f32.mrb[14].mxu0  ;;  %v1916_v57 = vpop.f32.mrb[14].mxu1 }
 0x110   :  { %v1366_v58 = vpack.c.bf16 %v1590_v56, %v1589_v47  ;;  %v420_v59 = vpop.f32.mrb[15].mxu0  ;;  %v1446_v60 = vpack.c.bf16 %v1916_v57, %v1912_v50  ;;  %v1920_v61 = vpop.f32.mrb[15].mxu1  ;;  %v709_v10 = vmul.f32 %v1590_v56, %v1590_v56 }
 0x111   :  { %v769_v63 = vadd.f32 %v768_v55, %v706_v54  ;;  %v636_v1 = vadd.f32 %v635_v53, %v420_v59  ;;  %v707_v2 = vmul.f32 %v420_v59, %v420_v59  ;;  %v1361_v3 = vpack.c.bf16 %v420_v59, %v417_v51 }
 0x112   :  { %1494 = vst [vmem:[%s2136_s2 + $0x38] sm:$0xff] %v1366_v58   ;;  %1510 = vst [vmem:[%s2136_s2 + $0xb8] sm:$0xff] %v1446_v60   ;;  %v1441_v4 = vpack.c.bf16 %v1920_v61, %v1914_v52 }
 0x113   :  { %v637_v7 = vadd.f32 %v1589_v47, %v636_v1  ;;  %v770_v8 = vadd.f32 %v769_v63, %v707_v2  ;;  %1493 = vst [vmem:[%s2136_s2 + $0x30] sm:$0xff] %v1361_v3  }
 0x114   :  { %1509 = vst [vmem:[%s2136_s2 + $0xb0] sm:$0xff] %v1441_v4  }
 0x115   :  { %v771_v11 = vadd.f32 %v770_v8, %v708_v6  ;;  %v1593_v12 = vpop.f32.mrb[16].mxu0  ;;  %v638_v13 = vadd.f32 %v1590_v56, %v637_v7  ;;  %v1936_v14 = vpop.f32.mrb[16].mxu1 }
 0x116   :  { %v433_v15 = vpop.f32.mrb[17].mxu0  ;;  %v1938_v16 = vpop.f32.mrb[17].mxu1  ;;  %v712_v35 = vmul.f32 %v1593_v12, %v1593_v12 }
 0x117   :  { %v639_v17 = vadd.f32 %v638_v13, %v433_v15  ;;  %v710_v18 = vmul.f32 %v433_v15, %v433_v15  ;;  %v772_v19 = vadd.f32 %v771_v11, %v709_v10  ;;  %v1594_v20 = vpop.f32.mrb[18].mxu0  ;;  %v1940_v21 = vpop.f32.mrb[18].mxu1 }
 0x118   :  { %v1376_v23 = vpack.c.bf16 %v1594_v20, %v1593_v12  ;;  %v436_v25 = vpop.f32.mrb[19].mxu0  ;;  %v1456_v26 = vpack.c.bf16 %v1940_v21, %v1936_v14  ;;  %v1944_v27 = vpop.f32.mrb[19].mxu1  ;;  %v713_v38 = vmul.f32 %v1594_v20, %v1594_v20 }
 0x119   :  { %v773_v28 = vadd.f32 %v772_v19, %v710_v18  ;;  %v640_v30 = vadd.f32 %v639_v17, %v436_v25  ;;  %v711_v31 = vmul.f32 %v436_v25, %v436_v25  ;;  %v1371_v32 = vpack.c.bf16 %v436_v25, %v433_v15 }
 0x11a   :  { %1496 = vst [vmem:[%s2136_s2 + $0x48] sm:$0xff] %v1376_v23   ;;  %1512 = vst [vmem:[%s2136_s2 + $0xc8] sm:$0xff] %v1456_v26   ;;  %v1451_v34 = vpack.c.bf16 %v1944_v27, %v1938_v16 }
 0x11b   :  { %v641_v36 = vadd.f32 %v1593_v12, %v640_v30  ;;  %v774_v37 = vadd.f32 %v773_v28, %v711_v31  ;;  %1495 = vst [vmem:[%s2136_s2 + $0x40] sm:$0xff] %v1371_v32  }
 0x11c   :  { %1511 = vst [vmem:[%s2136_s2 + $0xc0] sm:$0xff] %v1451_v34  }
 0x11d   :  { %v775_v39 = vadd.f32 %v774_v37, %v712_v35  ;;  %v1597_v40 = vpop.f32.mrb[20].mxu0  ;;  %v642_v42 = vadd.f32 %v1594_v20, %v641_v36  ;;  %v1960_v44 = vpop.f32.mrb[20].mxu1 }
 0x11e   :  { %v449_v46 = vpop.f32.mrb[21].mxu0  ;;  %v1962_v47 = vpop.f32.mrb[21].mxu1  ;;  %v716_v6 = vmul.f32 %v1597_v40, %v1597_v40 }
 0x11f   :  { %v643_v48 = vadd.f32 %v642_v42, %v449_v46  ;;  %v714_v51 = vmul.f32 %v449_v46, %v449_v46  ;;  %v776_v53 = vadd.f32 %v775_v39, %v713_v38  ;;  %v1598_v54 = vpop.f32.mrb[22].mxu0  ;;  %v1964_v55 = vpop.f32.mrb[22].mxu1 }
 0x120   :  { %v1386_v56 = vpack.c.bf16 %v1598_v54, %v1597_v40  ;;  %v452_v58 = vpop.f32.mrb[23].mxu0  ;;  %v1466_v59 = vpack.c.bf16 %v1964_v55, %v1960_v44  ;;  %v1968_v60 = vpop.f32.mrb[23].mxu1  ;;  %v717_v10 = vmul.f32 %v1598_v54, %v1598_v54 }
 0x121   :  { %v777_v63 = vadd.f32 %v776_v53, %v714_v51  ;;  %v644_v1 = vadd.f32 %v643_v48, %v452_v58  ;;  %v715_v2 = vmul.f32 %v452_v58, %v452_v58  ;;  %v1381_v3 = vpack.c.bf16 %v452_v58, %v449_v46 }
 0x122   :  { %1498 = vst [vmem:[%s2136_s2 + $0x58] sm:$0xff] %v1386_v56   ;;  %1514 = vst [vmem:[%s2136_s2 + $0xd8] sm:$0xff] %v1466_v59   ;;  %v1461_v4 = vpack.c.bf16 %v1968_v60, %v1962_v47 }
 0x123   :  { %v645_v7 = vadd.f32 %v1597_v40, %v644_v1  ;;  %v778_v8 = vadd.f32 %v777_v63, %v715_v2  ;;  %1497 = vst [vmem:[%s2136_s2 + $0x50] sm:$0xff] %v1381_v3  }
 0x124   :  { %1513 = vst [vmem:[%s2136_s2 + $0xd0] sm:$0xff] %v1461_v4  }
 0x125   :  { %v779_v11 = vadd.f32 %v778_v8, %v716_v6  ;;  %v1601_v12 = vpop.f32.mrb[24].mxu0  ;;  %v646_v13 = vadd.f32 %v1598_v54, %v645_v7  ;;  %v1984_v15 = vpop.f32.mrb[24].mxu1 }
 0x126   :  { %v465_v17 = vpop.f32.mrb[25].mxu0  ;;  %v1986_v18 = vpop.f32.mrb[25].mxu1  ;;  %v720_v39 = vmul.f32 %v1601_v12, %v1601_v12 }
 0x127   :  { %v647_v19 = vadd.f32 %v646_v13, %v465_v17  ;;  %v718_v20 = vmul.f32 %v465_v17, %v465_v17  ;;  %v780_v23 = vadd.f32 %v779_v11, %v717_v10  ;;  %v1602_v25 = vpop.f32.mrb[26].mxu0  ;;  %v1988_v26 = vpop.f32.mrb[26].mxu1 }
 0x128   :  { %v1396_v28 = vpack.c.bf16 %v1602_v25, %v1601_v12  ;;  %v468_v30 = vpop.f32.mrb[27].mxu0  ;;  %v1476_v31 = vpack.c.bf16 %v1988_v26, %v1984_v15  ;;  %v1992_v32 = vpop.f32.mrb[27].mxu1  ;;  %v721_v46 = vmul.f32 %v1602_v25, %v1602_v25 }
 0x129   :  { %v781_v34 = vadd.f32 %v780_v23, %v718_v20  ;;  %v648_v35 = vadd.f32 %v647_v19, %v468_v30  ;;  %v719_v36 = vmul.f32 %v468_v30, %v468_v30  ;;  %v1391_v37 = vpack.c.bf16 %v468_v30, %v465_v17 }
 0x12a   :  { %1500 = vst [vmem:[%s2136_s2 + $0x68] sm:$0xff] %v1396_v28   ;;  %1516 = vst [vmem:[%s2136_s2 + $0xe8] sm:$0xff] %v1476_v31   ;;  %v1471_v38 = vpack.c.bf16 %v1992_v32, %v1986_v18  ;;  %v726_v31 = vmul.f32 %v1842_v43, %v1842_v43 }
 0x12b   :  { %v649_v40 = vadd.f32 %v1601_v12, %v648_v35  ;;  %v782_v42 = vadd.f32 %v781_v34, %v719_v36  ;;  %1499 = vst [vmem:[%s2136_s2 + $0x60] sm:$0xff] %v1391_v37  }
 0x12c   :  { %1515 = vst [vmem:[%s2136_s2 + $0xe0] sm:$0xff] %v1471_v38   ;;  %v727_v38 = vmul.f32 %v1848_v49, %v1848_v49 }
 0x12d   :  { %v783_v48 = vadd.f32 %v782_v42, %v720_v39  ;;  %v1605_v51 = vpop.f32.mrb[28].mxu0  ;;  %v650_v53 = vadd.f32 %v1602_v25, %v649_v40  ;;  %v2008_v54 = vpop.f32.mrb[28].mxu1  ;;  %v728_v39 = vmul.f32 %v1840_v41, %v1840_v41 }
 0x12e   :  { %v481_v56 = vpop.f32.mrb[29].mxu0  ;;  %v2010_v58 = vpop.f32.mrb[29].mxu1  ;;  %v724_v19 = vmul.f32 %v1605_v51, %v1605_v51 }
 0x12f   :  { %v651_v59 = vadd.f32 %v650_v53, %v481_v56  ;;  %v722_v63 = vmul.f32 %v481_v56, %v481_v56  ;;  %v784_v1 = vadd.f32 %v783_v48, %v721_v46  ;;  %v1606_v2 = vpop.f32.mrb[30].mxu0  ;;  %v2012_v3 = vpop.f32.mrb[30].mxu1  ;;  %v729_v46 = vmul.f32 %v1844_v45, %v1844_v45 }
 0x130   :  { %v1406_v4 = vpack.c.bf16 %v1606_v2, %v1605_v51  ;;  %v484_v6 = vpop.f32.mrb[31].mxu0  ;;  %v1486_v7 = vpack.c.bf16 %v2012_v3, %v2008_v54  ;;  %v2016_v8 = vpop.f32.mrb[31].mxu1  ;;  %v725_v25 = vmul.f32 %v1606_v2, %v1606_v2 }
 0x131   :  { %v785_v10 = vadd.f32 %v784_v1, %v722_v63  ;;  %v652_v11 = vadd.f32 %v651_v59, %v484_v6  ;;  %v723_v12 = vmul.f32 %v484_v6, %v484_v6  ;;  %v1401_v13 = vpack.c.bf16 %v484_v6, %v481_v56 }
 0x132   :  { %1502 = vst [vmem:[%s2136_s2 + $0x78] sm:$0xff] %v1406_v4   ;;  %1518 = vst [vmem:[%s2136_s2 + $0xf8] sm:$0xff] %v1486_v7   ;;  %v1481_v17 = vpack.c.bf16 %v2016_v8, %v2010_v58  ;;  %v731_v63 = vmul.f32 %v1872_v9, %v1872_v9 }
 0x133   :  { %v653_v20 = vadd.f32 %v1605_v51, %v652_v11  ;;  %v786_v23 = vadd.f32 %v785_v10, %v723_v12  ;;  %1501 = vst [vmem:[%s2136_s2 + $0x70] sm:$0xff] %v1401_v13   ;;  %v735_v12 = vmul.f32 %v1896_v33, %v1896_v33 }
 0x134   :  { %1517 = vst [vmem:[%s2136_s2 + $0xf0] sm:$0xff] %v1481_v17  }
 0x135   :  { %v787_v28 = vadd.f32 %v786_v23, %v724_v19  ;;  %v654_v30 = vadd.f32 %v1606_v2, %v653_v20 }
 0x137   :  { %v655_v34 = vadd.f32 %v654_v30, %v1842_v43  ;;  %v788_v35 = vadd.f32 %v787_v28, %v725_v25  ;;  %v730_v43 = vmul.f32 %v1866_v0, %v1866_v0  ;;  %v739_v30 = vmul.f32 %v1920_v61, %v1920_v61 }
 0x139   :  { %v789_v36 = vadd.f32 %v788_v35, %v726_v31  ;;  %v656_v37 = vadd.f32 %v655_v34, %v1848_v49 }
 0x13b   :  { %v657_v40 = vadd.f32 %v1840_v41, %v656_v37  ;;  %v790_v42 = vadd.f32 %v789_v36, %v727_v38  ;;  %v732_v41 = vmul.f32 %v1864_v62, %v1864_v62 }
 0x13d   :  { %v791_v48 = vadd.f32 %v790_v42, %v728_v39  ;;  %v658_v51 = vadd.f32 %v1844_v45, %v657_v40  ;;  %v733_v45 = vmul.f32 %v1868_v5, %v1868_v5  ;;  %v743_v40 = vmul.f32 %v1944_v27, %v1944_v27 }
 0x13f   :  { %v659_v53 = vadd.f32 %v658_v51, %v1866_v0  ;;  %v792_v56 = vadd.f32 %v791_v48, %v729_v46  ;;  %v734_v0 = vmul.f32 %v1890_v24, %v1890_v24 }
 0x141   :  { %v793_v59 = vadd.f32 %v792_v56, %v730_v43  ;;  %v660_v49 = vadd.f32 %v659_v53, %v1872_v9 }
 0x143   :  { %v661_v1 = vadd.f32 %v1864_v62, %v660_v49  ;;  %v794_v2 = vadd.f32 %v793_v59, %v731_v63  ;;  %v736_v62 = vmul.f32 %v1888_v22, %v1888_v22  ;;  %v747_v59 = vmul.f32 %v1968_v60, %v1968_v60 }
 0x145   :  { %v795_v4 = vadd.f32 %v794_v2, %v732_v41  ;;  %v662_v6 = vadd.f32 %v1868_v5, %v661_v1  ;;  %v737_v5 = vmul.f32 %v1892_v29, %v1892_v29 }
 0x147   :  { %v663_v7 = vadd.f32 %v662_v6, %v1890_v24  ;;  %v796_v10 = vadd.f32 %v795_v4, %v733_v45  ;;  %v738_v24 = vmul.f32 %v1914_v52, %v1914_v52  ;;  %v751_v6 = vmul.f32 %v1992_v32, %v1992_v32 }
 0x149   :  { %v797_v11 = vadd.f32 %v796_v10, %v734_v0  ;;  %v664_v9 = vadd.f32 %v663_v7, %v1896_v33 }
 0x14b   :  { %v665_v13 = vadd.f32 %v1888_v22, %v664_v9  ;;  %v798_v17 = vadd.f32 %v797_v11, %v735_v12  ;;  %v740_v22 = vmul.f32 %v1912_v50, %v1912_v50 }
 0x14d   :  { %v799_v19 = vadd.f32 %v798_v17, %v736_v62  ;;  %v666_v20 = vadd.f32 %v1892_v29, %v665_v13  ;;  %v741_v29 = vmul.f32 %v1916_v57, %v1916_v57  ;;  %v755_v13 = vmul.f32 %v2016_v8, %v2016_v8 }
 0x14f   :  { %v667_v23 = vadd.f32 %v666_v20, %v1914_v52  ;;  %v800_v25 = vadd.f32 %v799_v19, %v737_v5  ;;  %v742_v52 = vmul.f32 %v1938_v16, %v1938_v16 }
 0x151   :  { %v801_v28 = vadd.f32 %v800_v25, %v738_v24  ;;  %v668_v33 = vadd.f32 %v667_v23, %v1920_v61 }
 0x153   :  { %v669_v31 = vadd.f32 %v1912_v50, %v668_v33  ;;  %v802_v34 = vadd.f32 %v801_v28, %v739_v30  ;;  %v744_v50 = vmul.f32 %v1936_v14, %v1936_v14 }
 0x155   :  { %v803_v35 = vadd.f32 %v802_v34, %v740_v22  ;;  %v670_v36 = vadd.f32 %v1916_v57, %v669_v31  ;;  %v745_v57 = vmul.f32 %v1940_v21, %v1940_v21 }
 0x157   :  { %v671_v37 = vadd.f32 %v670_v36, %v1938_v16  ;;  %v804_v38 = vadd.f32 %v803_v35, %v741_v29  ;;  %v746_v16 = vmul.f32 %v1962_v47, %v1962_v47 }
 0x159   :  { %v805_v39 = vadd.f32 %v804_v38, %v742_v52  ;;  %v672_v61 = vadd.f32 %v671_v37, %v1944_v27 }
 0x15b   :  { %v673_v42 = vadd.f32 %v1936_v14, %v672_v61  ;;  %v806_v46 = vadd.f32 %v805_v39, %v743_v40  ;;  %v748_v14 = vmul.f32 %v1960_v44, %v1960_v44 }
 0x15d   :  { %v807_v48 = vadd.f32 %v806_v46, %v744_v50  ;;  %v674_v51 = vadd.f32 %v1940_v21, %v673_v42  ;;  %v749_v21 = vmul.f32 %v1964_v55, %v1964_v55 }
 0x15f   :  { %v675_v43 = vadd.f32 %v674_v51, %v1962_v47  ;;  %v808_v53 = vadd.f32 %v807_v48, %v745_v57  ;;  %v750_v47 = vmul.f32 %v1986_v18, %v1986_v18 }
 0x161   :  { %v809_v56 = vadd.f32 %v808_v53, %v746_v16  ;;  %v676_v27 = vadd.f32 %v675_v43, %v1968_v60 }
 0x163   :  { %v677_v49 = vadd.f32 %v1960_v44, %v676_v27  ;;  %v810_v63 = vadd.f32 %v809_v56, %v747_v59  ;;  %v752_v44 = vmul.f32 %v1984_v15, %v1984_v15 }
 0x165   :  { %v811_v41 = vadd.f32 %v810_v63, %v748_v14  ;;  %v678_v1 = vadd.f32 %v1964_v55, %v677_v49  ;;  %v753_v55 = vmul.f32 %v1988_v26, %v1988_v26 }
 0x167   :  { %v679_v2 = vadd.f32 %v678_v1, %v1986_v18  ;;  %v812_v45 = vadd.f32 %v811_v41, %v749_v21  ;;  %v754_v18 = vmul.f32 %v2010_v58, %v2010_v58 }
 0x169   :  { %v813_v4 = vadd.f32 %v812_v45, %v750_v47  ;;  %v680_v60 = vadd.f32 %v679_v2, %v1992_v32 }
 0x16b   :  { %v681_v0 = vadd.f32 %v1984_v15, %v680_v60  ;;  %v814_v7 = vadd.f32 %v813_v4, %v751_v6  ;;  %v756_v15 = vmul.f32 %v2008_v54, %v2008_v54 }
 0x16d   :  { %v815_v10 = vadd.f32 %v814_v7, %v752_v44  ;;  %v682_v11 = vadd.f32 %v1988_v26, %v681_v0  ;;  %v757_v26 = vmul.f32 %v2012_v3, %v2012_v3 }
 0x16f   :  { %v683_v9 = vadd.f32 %v682_v11, %v2010_v58  ;;  %v816_v12 = vadd.f32 %v815_v10, %v753_v55 }
 0x171   :  { %v817_v62 = vadd.f32 %v816_v12, %v754_v18  ;;  %v684_v32 = vadd.f32 %v683_v9, %v2016_v8 }
 0x173   :  { %v685_v17 = vadd.f32 %v2008_v54, %v684_v32  ;;  %v818_v5 = vadd.f32 %v817_v62, %v755_v13 }
 0x175   :  { %v686_v19 = vadd.f32 %v2012_v3, %v685_v17  ;;  %v819_v20 = vadd.f32 %v818_v5, %v756_v15 }
 0x177   :  { %v687_v58 = vrot.slane %v686_v19, 4  ;;  %v820_v24 = vadd.f32 %v819_v20, %v757_v26 }
 0x179   :  { %v688_v23 = vadd.f32 %v687_v58, %v686_v19  ;;  %v821_v25 = vrot.slane %v820_v24, 4 }
 0x17b   :  { %v689_v28 = vrot.slane %v688_v23, 2  ;;  %v822_v33 = vadd.f32 %v821_v25, %v820_v24 }
 0x17d   :  { %v690_v30 = vadd.f32 %v689_v28, %v688_v23  ;;  %v823_v8 = vrot.slane %v822_v33, 2 }
 0x17f   :  { %v691_v22 = vrot.slane %v690_v30, 1  ;;  %v824_v31 = vadd.f32 %v823_v8, %v822_v33 }
 0x181   :  { %v692_v34 = vadd.f32 %v691_v22, %v690_v30  ;;  %v825_v29 = vrot.slane %v824_v31, 1 }
 0x183   :  { %693 = vst [vmem:[%s2137_s3] sm:$0x1] %v692_v34  ;;  %v826_v54 = vadd.f32 %v825_v29, %v824_v31 }
 0x185   :  { %827 = vst [vmem:[%s2138_s4] sm:$0x1] %v826_v54 }

// kernel: psp_forward.12
= control target key start
LH: loop header
LB: loop body
LE: loop exit
PB: predicated region body
PF: predicated region fallthrough
CT: control target
= control target key end

     0   :  { %s670_s1 = inlined_call_operand.vmem [shape: bf16[128,128], index: 1, kind: input, shape index: {}]   ;;  %s671_s0 = inlined_call_operand.vmem [shape: bf16[128,128], index: 0, kind: input, shape index: {}]   ;;  %s672_s2 = inlined_call_operand.vmem [shape: bf16[128,128], index: 2, kind: output, shape index: {0}]   ;;  %s673_s3 = inlined_call_operand.vmem [shape: f32[1,1,128], index: 3, kind: output, shape index: {1}]   ;;  %s674_s4 = inlined_call_operand.vmem [shape: f32[1,1,128], index: 4, kind: output, shape index: {2}]  }
   0x1   :  { %v551_v0 = vld [vmem:[%s670_s1] sm:$0xff]   ;;  %v552_v1 = vld [vmem:[%s670_s1 + $0x8] sm:$0xff]   ;;  %v553_v2 = vld [vmem:[%s670_s1 + $0x10] sm:$0xff]  }
   0x2   :  { %503 = vmatprep.subr.bf16.mxu0 %v551_v0  ;;  %535 = vmatprep.subr.bf16.mxu1 %v551_v0  ;;  %v554_v3 = vld [vmem:[%s670_s1 + $0x18] sm:$0xff]   ;;  %v559_v4 = vld [vmem:[%s671_s0] sm:$0xff]   ;;  %v556_v7 = vld [vmem:[%s670_s1 + $0x28] sm:$0xff]  }
   0x3   :  { %504 = vmatpush3.bf16.msra.mxu0 %v551_v0  ;;  %543 = vmatpush3.bf16.msra.mxu1 %v551_v0  ;;  %v555_v5 = vld [vmem:[%s670_s1 + $0x20] sm:$0xff]   ;;  %v557_v8 = vld [vmem:[%s670_s1 + $0x30] sm:$0xff]   ;;  %v558_v9 = vld [vmem:[%s670_s1 + $0x38] sm:$0xff]  }
   0x4   :  { %505 = vmatprep.subr.bf16.mxu0 %v552_v1  ;;  %536 = vmatprep.subr.bf16.mxu1 %v552_v1  ;;  %v563_v6 = vld [vmem:[%s671_s0 + $0x20] sm:$0xff]   ;;  %v560_v10 = vld [vmem:[%s671_s0 + $0x8] sm:$0xff]   ;;  %v561_v12 = vld [vmem:[%s671_s0 + $0x10] sm:$0xff]  }
   0x5   :  { %519 = vmatprep.mubr.bf16.mxu0 %v559_v4  ;;  %527 = vmatprep.mubr.bf16.mxu1 %v563_v6  ;;  %v564_v11 = vld [vmem:[%s671_s0 + $0x28] sm:$0xff]   ;;  %v565_v13 = vld [vmem:[%s671_s0 + $0x30] sm:$0xff]   ;;  %v562_v14 = vld [vmem:[%s671_s0 + $0x18] sm:$0xff]  }
   0x6   :  { %v566_v15 = vld [vmem:[%s671_s0 + $0x38] sm:$0xff]  }
   0x7   :  { %506 = vmatpush3.bf16.msra.mxu0 %v552_v1  ;;  %544 = vmatpush3.bf16.msra.mxu1 %v552_v1 }
   0x8   :  { %507 = vmatprep.subr.bf16.mxu0 %v553_v2  ;;  %537 = vmatprep.subr.bf16.mxu1 %v553_v2 }
   0xb   :  { %508 = vmatpush3.bf16.msra.mxu0 %v553_v2  ;;  %545 = vmatpush3.bf16.msra.mxu1 %v553_v2 }
   0xc   :  { %509 = vmatprep.subr.bf16.mxu0 %v554_v3  ;;  %538 = vmatprep.subr.bf16.mxu1 %v554_v3 }
   0xf   :  { %510 = vmatpush3.bf16.msra.mxu0 %v554_v3  ;;  %546 = vmatpush3.bf16.msra.mxu1 %v554_v3 }
  0x10   :  { %511 = vmatprep.subr.bf16.mxu0 %v555_v5  ;;  %539 = vmatprep.subr.bf16.mxu1 %v555_v5 }
  0x13   :  { %512 = vmatpush3.bf16.msra.mxu0 %v555_v5  ;;  %547 = vmatpush3.bf16.msra.mxu1 %v555_v5 }
  0x14   :  { %513 = vmatprep.subr.bf16.mxu0 %v556_v7  ;;  %540 = vmatprep.subr.bf16.mxu1 %v556_v7 }
  0x17   :  { %514 = vmatpush3.bf16.msra.mxu0 %v556_v7  ;;  %548 = vmatpush3.bf16.msra.mxu1 %v556_v7 }
  0x18   :  { %515 = vmatprep.subr.bf16.mxu0 %v557_v8  ;;  %541 = vmatprep.subr.bf16.mxu1 %v557_v8 }
  0x1b   :  { %516 = vmatpush3.bf16.msra.mxu0 %v557_v8  ;;  %549 = vmatpush3.bf16.msra.mxu1 %v557_v8 }
  0x1c   :  { %517 = vmatprep.subr.bf16.mxu0 %v558_v9  ;;  %542 = vmatprep.subr.bf16.mxu1 %v558_v9 }
  0x1f   :  { %518 = vmatpush3.bf16.msra.mxu0 %v558_v9  ;;  %550 = vmatpush3.bf16.msra.mxu1 %v558_v9 }
  0x22   :  { %520 = vmatmul.mubr.bf16.vlgmr.msra.gmra.mrb[0].mxu0 %v560_v10  ;;  %528 = vmatmul.mubr.bf16.vlgmr.msra.gmra.mrb[0].mxu1 %v564_v11 }
  0x23   :  { %523 = vmatprep.mubr.bf16.mxu0 %v561_v12  ;;  %531 = vmatprep.mubr.bf16.mxu1 %v565_v13 }
  0x2a   :  { %524 = vmatmul.mubr.bf16.gmra.mrb[4].mxu0 %v562_v14  ;;  %532 = vmatmul.mubr.bf16.gmra.mrb[4].mxu1 %v566_v15 }
  0xf5   :  { %v521_v16 = vpop.f32.mrb[0].mxu0  ;;  %v529_v17 = vpop.f32.mrb[0].mxu1 }
  0xf6   :  { %v177_v18 = vpop.f32.mrb[1].mxu0  ;;  %v209_v19 = vpop.f32.mrb[1].mxu1  ;;  %v264_v31 = vmul.f32 %v521_v16, %v521_v16  ;;  %v272_v3 = vmul.f32 %v529_v17, %v529_v17 }
  0xf7   :  { %v522_v20 = vpop.f32.mrb[2].mxu0  ;;  %v530_v21 = vpop.f32.mrb[2].mxu1  ;;  %v262_v26 = vmul.f32 %v177_v18, %v177_v18  ;;  %v270_v61 = vmul.f32 %v209_v19, %v209_v19 }
  0xf8   :  { %v448_v22 = vpack.c.bf16 %v522_v20, %v521_v16  ;;  %v180_v23 = vpop.f32.mrb[3].mxu0  ;;  %v468_v24 = vpack.c.bf16 %v530_v21, %v529_v17  ;;  %v212_v25 = vpop.f32.mrb[3].mxu1  ;;  %v265_v34 = vmul.f32 %v522_v20, %v522_v20  ;;  %v273_v6 = vmul.f32 %v530_v21, %v530_v21 }
  0xf9   :  { %v240_v27 = vadd.f32 %v180_v23, %v177_v18  ;;  %v263_v28 = vmul.f32 %v180_v23, %v180_v23  ;;  %v443_v29 = vpack.c.bf16 %v180_v23, %v177_v18  ;;  %v463_v30 = vpack.c.bf16 %v212_v25, %v209_v19 }
  0xfa   :  { %480 = vst [vmem:[%s672_s2 + $0x8] sm:$0xff] %v448_v22   ;;  %484 = vst [vmem:[%s672_s2 + $0x28] sm:$0xff] %v468_v24   ;;  %v271_v2 = vmul.f32 %v212_v25, %v212_v25 }
  0xfb   :  { %v241_v32 = vadd.f32 %v521_v16, %v240_v27  ;;  %v278_v33 = vadd.f32 %v263_v28, %v262_v26  ;;  %444 = vst [vmem:[%s672_s2] sm:$0xff] %v443_v29   ;;  %483 = vst [vmem:[%s672_s2 + $0x20] sm:$0xff] %v463_v30  }
  0xfd   :  { %v279_v35 = vadd.f32 %v278_v33, %v264_v31  ;;  %v525_v36 = vpop.f32.mrb[4].mxu0  ;;  %v242_v37 = vadd.f32 %v522_v20, %v241_v32  ;;  %v533_v38 = vpop.f32.mrb[4].mxu1 }
  0xfe   :  { %v193_v39 = vpop.f32.mrb[5].mxu0  ;;  %v225_v40 = vpop.f32.mrb[5].mxu1  ;;  %v268_v55 = vmul.f32 %v525_v36, %v525_v36  ;;  %v276_v15 = vmul.f32 %v533_v38, %v533_v38 }
  0xff   :  { %v243_v41 = vadd.f32 %v242_v37, %v193_v39  ;;  %v266_v42 = vmul.f32 %v193_v39, %v193_v39  ;;  %v280_v43 = vadd.f32 %v279_v35, %v265_v34  ;;  %v526_v44 = vpop.f32.mrb[6].mxu0  ;;  %v534_v45 = vpop.f32.mrb[6].mxu1  ;;  %v274_v9 = vmul.f32 %v225_v40, %v225_v40 }
 0x100   :  { %v458_v46 = vpack.c.bf16 %v526_v44, %v525_v36  ;;  %v196_v47 = vpop.f32.mrb[7].mxu0  ;;  %v478_v48 = vpack.c.bf16 %v534_v45, %v533_v38  ;;  %v228_v49 = vpop.f32.mrb[7].mxu1  ;;  %v269_v58 = vmul.f32 %v526_v44, %v526_v44 }
 0x101   :  { %v281_v50 = vadd.f32 %v280_v43, %v266_v42  ;;  %v244_v51 = vadd.f32 %v243_v41, %v196_v47  ;;  %v267_v52 = vmul.f32 %v196_v47, %v196_v47  ;;  %v453_v53 = vpack.c.bf16 %v196_v47, %v193_v39 }
 0x102   :  { %482 = vst [vmem:[%s672_s2 + $0x18] sm:$0xff] %v458_v46   ;;  %486 = vst [vmem:[%s672_s2 + $0x38] sm:$0xff] %v478_v48   ;;  %v473_v54 = vpack.c.bf16 %v228_v49, %v225_v40  ;;  %v275_v14 = vmul.f32 %v228_v49, %v228_v49 }
 0x103   :  { %v245_v56 = vadd.f32 %v525_v36, %v244_v51  ;;  %v282_v57 = vadd.f32 %v281_v50, %v267_v52  ;;  %481 = vst [vmem:[%s672_s2 + $0x10] sm:$0xff] %v453_v53  }
 0x104   :  { %485 = vst [vmem:[%s672_s2 + $0x30] sm:$0xff] %v473_v54  }
 0x105   :  { %v283_v59 = vadd.f32 %v282_v57, %v268_v55  ;;  %v246_v60 = vadd.f32 %v526_v44, %v245_v56 }
 0x107   :  { %v247_v62 = vadd.f32 %v246_v60, %v209_v19  ;;  %v284_v63 = vadd.f32 %v283_v59, %v269_v58  ;;  %v277_v19 = vmul.f32 %v534_v45, %v534_v45 }
 0x109   :  { %v285_v0 = vadd.f32 %v284_v63, %v270_v61  ;;  %v248_v1 = vadd.f32 %v247_v62, %v212_v25 }
 0x10b   :  { %v249_v4 = vadd.f32 %v529_v17, %v248_v1  ;;  %v286_v5 = vadd.f32 %v285_v0, %v271_v2 }
 0x10d   :  { %v287_v7 = vadd.f32 %v286_v5, %v272_v3  ;;  %v250_v8 = vadd.f32 %v530_v21, %v249_v4 }
 0x10f   :  { %v251_v10 = vadd.f32 %v250_v8, %v225_v40  ;;  %v288_v11 = vadd.f32 %v287_v7, %v273_v6 }
 0x111   :  { %v289_v12 = vadd.f32 %v288_v11, %v274_v9  ;;  %v252_v13 = vadd.f32 %v251_v10, %v228_v49 }
 0x113   :  { %v253_v16 = vadd.f32 %v533_v38, %v252_v13  ;;  %v290_v18 = vadd.f32 %v289_v12, %v275_v14 }
 0x115   :  { %v254_v20 = vadd.f32 %v534_v45, %v253_v16  ;;  %v291_v22 = vadd.f32 %v290_v18, %v276_v15 }
 0x117   :  { %v255_v23 = vrot.slane %v254_v20, 4  ;;  %v292_v24 = vadd.f32 %v291_v22, %v277_v19 }
 0x119   :  { %v256_v25 = vadd.f32 %v255_v23, %v254_v20  ;;  %v293_v17 = vrot.slane %v292_v24, 4 }
 0x11b   :  { %v257_v26 = vrot.slane %v256_v25, 2  ;;  %v294_v27 = vadd.f32 %v293_v17, %v292_v24 }
 0x11d   :  { %v258_v28 = vadd.f32 %v257_v26, %v256_v25  ;;  %v295_v21 = vrot.slane %v294_v27, 2 }
 0x11f   :  { %v259_v29 = vrot.slane %v258_v28, 1  ;;  %v296_v30 = vadd.f32 %v295_v21, %v294_v27 }
 0x121   :  { %v260_v31 = vadd.f32 %v259_v29, %v258_v28  ;;  %v297_v32 = vrot.slane %v296_v30, 1 }
 0x123   :  { %261 = vst [vmem:[%s673_s3] sm:$0x1] %v260_v31  ;;  %v298_v33 = vadd.f32 %v297_v32, %v296_v30 }
 0x125   :  { %299 = vst [vmem:[%s674_s4] sm:$0x1] %v298_v33 }

// kernel: psp_forward.13
= control target key start
LH: loop header
LB: loop body
LE: loop exit
PB: predicated region body
PF: predicated region fallthrough
CT: control target
= control target key end

     0   :  { %s370_s0 = inlined_call_operand.vmem [shape: bf16[128,128], index: 0, kind: input, shape index: {}]   ;;  %s371_s1 = inlined_call_operand.vmem [shape: f32[1,128], index: 1, kind: input, shape index: {}]   ;;  %s372_s2 = inlined_call_operand.vmem [shape: f32[1,128], index: 2, kind: input, shape index: {}]   ;;  %s373_s3 = inlined_call_operand.vmem [shape: bf16[128,128], index: 3, kind: output, shape index: {}]  }
   0x1   :  { %v211_v0 = vld [vmem:[%s370_s0] sm:$0xff]   ;;  %v282_v4 = vld [vmem:[%s370_s0 + $0x8] sm:$0xff]   ;;  %v283_v5 = vld [vmem:[%s370_s0 + $0x10] sm:$0xff]  }
   0x2   :  { %v176_v1 = vld [vmem:[%s371_s1] ss:$0 sm:$0xff]  ;;  %v212_v2 = vunpack.c.l.bf16 %v211_v0  ;;  %v213_v3 = vunpack.c.h.bf16 %v211_v0  ;;  %v284_v6 = vld [vmem:[%s370_s0 + $0x18] sm:$0xff]   ;;  %v216_v8 = vunpack.c.l.bf16 %v282_v4  ;;  %v217_v9 = vunpack.c.h.bf16 %v282_v4  ;;  %v286_v25 = vld [vmem:[%s370_s0 + $0x28] sm:$0xff]  }
   0x3   :  { %v177_v7 = vld [vmem:[%s372_s2] ss:$0 sm:$0xff]  ;;  %v220_v10 = vunpack.c.l.bf16 %v283_v5  ;;  %v221_v11 = vunpack.c.h.bf16 %v283_v5  ;;  %v224_v14 = vunpack.c.l.bf16 %v284_v6  ;;  %v225_v15 = vunpack.c.h.bf16 %v284_v6  ;;  %v287_v30 = vld [vmem:[%s370_s0 + $0x30] sm:$0xff]   ;;  %v288_v35 = vld [vmem:[%s370_s0 + $0x38] sm:$0xff]  }
   0x4   :  { %v53_v12 = vmul.f32 %v212_v2, %v176_v1  ;;  %v54_v13 = vmul.f32 %v213_v3, %v176_v1  ;;  %v55_v16 = vmul.f32 %v216_v8, %v176_v1  ;;  %v56_v17 = vmul.f32 %v217_v9, %v176_v1  ;;  %v285_v20 = vld [vmem:[%s370_s0 + $0x20] sm:$0xff]  }
   0x5   :  { %v57_v18 = vmul.f32 %v220_v10, %v176_v1  ;;  %v58_v19 = vmul.f32 %v221_v11, %v176_v1  ;;  %v59_v23 = vmul.f32 %v224_v14, %v176_v1  ;;  %v60_v24 = vmul.f32 %v225_v15, %v176_v1 }
   0x6   :  { %v76_v21 = vadd.f32 %v177_v7, %v53_v12  ;;  %v77_v22 = vadd.f32 %v177_v7, %v54_v13  ;;  %v78_v26 = vadd.f32 %v177_v7, %v55_v16  ;;  %v79_v27 = vadd.f32 %v177_v7, %v56_v17 }
   0x7   :  { %v80_v28 = vadd.f32 %v177_v7, %v57_v18  ;;  %v81_v29 = vadd.f32 %v177_v7, %v58_v19  ;;  %v82_v32 = vadd.f32 %v177_v7, %v59_v23  ;;  %v83_v33 = vadd.f32 %v177_v7, %v60_v24 }
   0x8   :  { %v245_v31 = vpack.c.bf16 %v77_v22, %v76_v21  ;;  %v228_v34 = vunpack.c.l.bf16 %v285_v20  ;;  %v250_v36 = vpack.c.bf16 %v79_v27, %v78_v26  ;;  %v229_v38 = vunpack.c.h.bf16 %v285_v20 }
   0x9   :  { %v255_v37 = vpack.c.bf16 %v81_v29, %v80_v28  ;;  %v232_v39 = vunpack.c.l.bf16 %v286_v25  ;;  %v260_v40 = vpack.c.bf16 %v83_v33, %v82_v32  ;;  %v233_v42 = vunpack.c.h.bf16 %v286_v25 }
   0xa   :  { %246 = vst [vmem:[%s373_s3] sm:$0xff] %v245_v31   ;;  %v61_v41 = vmul.f32 %v228_v34, %v176_v1  ;;  %v236_v43 = vunpack.c.l.bf16 %v287_v30  ;;  %289 = vst [vmem:[%s373_s3 + $0x8] sm:$0xff] %v250_v36   ;;  %v62_v44 = vmul.f32 %v229_v38, %v176_v1  ;;  %v237_v46 = vunpack.c.h.bf16 %v287_v30 }
   0xb   :  { %290 = vst [vmem:[%s373_s3 + $0x10] sm:$0xff] %v255_v37   ;;  %v63_v45 = vmul.f32 %v232_v39, %v176_v1  ;;  %v240_v47 = vunpack.c.l.bf16 %v288_v35  ;;  %291 = vst [vmem:[%s373_s3 + $0x18] sm:$0xff] %v260_v40   ;;  %v64_v49 = vmul.f32 %v233_v42, %v176_v1  ;;  %v241_v51 = vunpack.c.h.bf16 %v288_v35 }
   0xc   :  { %v84_v48 = vadd.f32 %v177_v7, %v61_v41  ;;  %v65_v50 = vmul.f32 %v236_v43, %v176_v1  ;;  %v85_v52 = vadd.f32 %v177_v7, %v62_v44  ;;  %v66_v54 = vmul.f32 %v237_v46, %v176_v1 }
   0xd   :  { %v86_v53 = vadd.f32 %v177_v7, %v63_v45  ;;  %v67_v55 = vmul.f32 %v240_v47, %v176_v1  ;;  %v87_v56 = vadd.f32 %v177_v7, %v64_v49  ;;  %v68_v58 = vmul.f32 %v241_v51, %v176_v1 }
   0xe   :  { %v88_v57 = vadd.f32 %v177_v7, %v65_v50  ;;  %v265_v59 = vpack.c.bf16 %v85_v52, %v84_v48  ;;  %v89_v60 = vadd.f32 %v177_v7, %v66_v54 }
   0xf   :  { %v90_v61 = vadd.f32 %v177_v7, %v67_v55  ;;  %v270_v62 = vpack.c.bf16 %v87_v56, %v86_v53  ;;  %v91_v63 = vadd.f32 %v177_v7, %v68_v58 }
  0x10   :  { %292 = vst [vmem:[%s373_s3 + $0x20] sm:$0xff] %v265_v59   ;;  %v275_v0 = vpack.c.bf16 %v89_v60, %v88_v57 }
  0x11   :  { %293 = vst [vmem:[%s373_s3 + $0x28] sm:$0xff] %v270_v62   ;;  %v280_v2 = vpack.c.bf16 %v91_v63, %v90_v61 }
  0x12   :  { %294 = vst [vmem:[%s373_s3 + $0x30] sm:$0xff] %v275_v0  }
  0x13   :  { %295 = vst [vmem:[%s373_s3 + $0x38] sm:$0xff] %v280_v2  }

// kernel: psp_forward.14
= control target key start
LH: loop header
LB: loop body
LE: loop exit
PB: predicated region body
PF: predicated region fallthrough
CT: control target
= control target key end

     0   :  { %s336_s1 = inlined_call_operand.vmem [shape: bf16[128,128], index: 1, kind: input, shape index: {}]   ;;  %s337_s0 = inlined_call_operand.vmem [shape: bf16[32,128], index: 0, kind: input, shape index: {}]   ;;  %s338_s2 = inlined_call_operand.vmem [shape: bf16[32,128], index: 2, kind: output, shape index: {0}]   ;;  %s339_s3 = inlined_call_operand.vmem [shape: f32[1,1,128], index: 3, kind: output, shape index: {1}]   ;;  %s340_s4 = inlined_call_operand.vmem [shape: f32[1,1,128], index: 4, kind: output, shape index: {2}]  }
   0x1   :  { %v259_v0 = vld [vmem:[%s336_s1] sm:$0xff]   ;;  %v260_v1 = vld [vmem:[%s336_s1 + $0x8] sm:$0xff]   ;;  %v261_v2 = vld [vmem:[%s336_s1 + $0x10] sm:$0xff]  }
   0x2   :  { %239 = vmatprep.subr.bf16.mxu0 %v259_v0  ;;  %v262_v3 = vld [vmem:[%s336_s1 + $0x18] sm:$0xff]   ;;  %v267_v4 = vld [vmem:[%s337_s0] sm:$0xff]   ;;  %v264_v6 = vld [vmem:[%s336_s1 + $0x28] sm:$0xff]  }
   0x3   :  { %240 = vmatpush3.bf16.msra.mxu0 %v259_v0  ;;  %255 = vmatprep.mubr.bf16.mxu0 %v267_v4  ;;  %v263_v5 = vld [vmem:[%s336_s1 + $0x20] sm:$0xff]   ;;  %v265_v7 = vld [vmem:[%s336_s1 + $0x30] sm:$0xff]   ;;  %v266_v8 = vld [vmem:[%s336_s1 + $0x38] sm:$0xff]  }
   0x4   :  { %241 = vmatprep.subr.bf16.mxu0 %v260_v1  ;;  %v268_v9 = vld [vmem:[%s337_s0 + $0x8] sm:$0xff]  }
   0x7   :  { %242 = vmatpush3.bf16.msra.mxu0 %v260_v1 }
   0x8   :  { %243 = vmatprep.subr.bf16.mxu0 %v261_v2 }
   0xb   :  { %244 = vmatpush3.bf16.msra.mxu0 %v261_v2 }
   0xc   :  { %245 = vmatprep.subr.bf16.mxu0 %v262_v3 }
   0xf   :  { %246 = vmatpush3.bf16.msra.mxu0 %v262_v3 }
  0x10   :  { %247 = vmatprep.subr.bf16.mxu0 %v263_v5 }
  0x13   :  { %248 = vmatpush3.bf16.msra.mxu0 %v263_v5 }
  0x14   :  { %249 = vmatprep.subr.bf16.mxu0 %v264_v6 }
  0x17   :  { %250 = vmatpush3.bf16.msra.mxu0 %v264_v6 }
  0x18   :  { %251 = vmatprep.subr.bf16.mxu0 %v265_v7 }
  0x1b   :  { %252 = vmatpush3.bf16.msra.mxu0 %v265_v7 }
  0x1c   :  { %253 = vmatprep.subr.bf16.mxu0 %v266_v8 }
  0x1f   :  { %254 = vmatpush3.bf16.msra.mxu0 %v266_v8 }
  0x22   :  { %256 = vmatmul.mubr.bf16.vlgmr.msra.gmra.mrb[0].mxu0 %v268_v9 }
  0xf5   :  { %v257_v10 = vpop.f32.mrb[0].mxu0 }
  0xf6   :  { %v129_v11 = vpop.f32.mrb[1].mxu0  ;;  %v156_v19 = vmul.f32 %v257_v10, %v257_v10 }
  0xf7   :  { %v258_v12 = vpop.f32.mrb[2].mxu0  ;;  %v154_v15 = vmul.f32 %v129_v11, %v129_v11 }
  0xf8   :  { %v226_v13 = vpack.c.bf16 %v258_v12, %v257_v10  ;;  %v132_v14 = vpop.f32.mrb[3].mxu0  ;;  %v157_v22 = vmul.f32 %v258_v12, %v258_v12 }
  0xf9   :  { %v144_v16 = vadd.f32 %v132_v14, %v129_v11  ;;  %v155_v17 = vmul.f32 %v132_v14, %v132_v14  ;;  %v221_v18 = vpack.c.bf16 %v132_v14, %v129_v11 }
  0xfa   :  { %228 = vst [vmem:[%s338_s2 + $0x8] sm:$0xff] %v226_v13  }
  0xfb   :  { %v145_v20 = vadd.f32 %v257_v10, %v144_v16  ;;  %v158_v21 = vadd.f32 %v155_v17, %v154_v15  ;;  %222 = vst [vmem:[%s338_s2] sm:$0xff] %v221_v18  }
  0xfd   :  { %v146_v23 = vadd.f32 %v258_v12, %v145_v20  ;;  %v159_v24 = vadd.f32 %v158_v21, %v156_v19 }
  0xff   :  { %v147_v25 = vrot.slane %v146_v23, 4  ;;  %v160_v26 = vadd.f32 %v159_v24, %v157_v22 }
 0x101   :  { %v148_v27 = vadd.f32 %v147_v25, %v146_v23  ;;  %v161_v28 = vrot.slane %v160_v26, 4 }
 0x103   :  { %v149_v29 = vrot.slane %v148_v27, 2  ;;  %v162_v30 = vadd.f32 %v161_v28, %v160_v26 }
 0x105   :  { %v150_v31 = vadd.f32 %v149_v29, %v148_v27  ;;  %v163_v32 = vrot.slane %v162_v30, 2 }
 0x107   :  { %v151_v33 = vrot.slane %v150_v31, 1  ;;  %v164_v34 = vadd.f32 %v163_v32, %v162_v30 }
 0x109   :  { %v152_v35 = vadd.f32 %v151_v33, %v150_v31  ;;  %v165_v36 = vrot.slane %v164_v34, 1 }
 0x10b   :  { %153 = vst [vmem:[%s339_s3] sm:$0x1] %v152_v35  ;;  %v166_v37 = vadd.f32 %v165_v36, %v164_v34 }
 0x10d   :  { %167 = vst [vmem:[%s340_s4] sm:$0x1] %v166_v37 }

// kernel: psp_forward.15
= control target key start
LH: loop header
LB: loop body
LE: loop exit
PB: predicated region body
PF: predicated region fallthrough
CT: control target
= control target key end

     0   :  { %s136_s0 = inlined_call_operand.vmem [shape: bf16[32,128], index: 0, kind: input, shape index: {}]   ;;  %s137_s1 = inlined_call_operand.vmem [shape: f32[1,128], index: 1, kind: input, shape index: {}]   ;;  %s138_s2 = inlined_call_operand.vmem [shape: f32[1,128], index: 2, kind: input, shape index: {}]   ;;  %s139_s3 = inlined_call_operand.vmem [shape: bf16[32,128], index: 3, kind: output, shape index: {}]  }
   0x1   :  { %v79_v0 = vld [vmem:[%s136_s0] sm:$0xff]   ;;  %v96_v4 = vld [vmem:[%s136_s0 + $0x8] sm:$0xff]  }
   0x2   :  { %v68_v1 = vld [vmem:[%s137_s1] ss:$0 sm:$0xff]  ;;  %v80_v2 = vunpack.c.l.bf16 %v79_v0  ;;  %v81_v3 = vunpack.c.h.bf16 %v79_v0  ;;  %v84_v6 = vunpack.c.l.bf16 %v96_v4  ;;  %v85_v7 = vunpack.c.h.bf16 %v96_v4 }
   0x3   :  { %v69_v5 = vld [vmem:[%s138_s2] ss:$0 sm:$0xff] }
   0x4   :  { %v29_v8 = vmul.f32 %v80_v2, %v68_v1  ;;  %v30_v9 = vmul.f32 %v81_v3, %v68_v1  ;;  %v31_v10 = vmul.f32 %v84_v6, %v68_v1  ;;  %v32_v11 = vmul.f32 %v85_v7, %v68_v1 }
   0x6   :  { %v40_v12 = vadd.f32 %v69_v5, %v29_v8  ;;  %v41_v13 = vadd.f32 %v69_v5, %v30_v9  ;;  %v42_v14 = vadd.f32 %v69_v5, %v31_v10  ;;  %v43_v15 = vadd.f32 %v69_v5, %v32_v11 }
   0x8   :  { %v89_v16 = vpack.c.bf16 %v41_v13, %v40_v12  ;;  %v94_v17 = vpack.c.bf16 %v43_v15, %v42_v14 }
   0xa   :  { %90 = vst [vmem:[%s139_s3] sm:$0xff] %v89_v16   ;;  %97 = vst [vmem:[%s139_s3 + $0x8] sm:$0xff] %v94_v17  }

// kernel: psp_forward.17
= control target key start
LH: loop header
LB: loop body
LE: loop exit
PB: predicated region body
PF: predicated region fallthrough
CT: control target
= control target key end

     0   :  { %s97_s0 = inlined_call_operand.vmem [shape: bf16[16,128], index: 0, kind: input, shape index: {}]   ;;  %s98_s1 = inlined_call_operand.vmem [shape: f32[1,128], index: 1, kind: input, shape index: {}]   ;;  %s99_s2 = inlined_call_operand.vmem [shape: f32[1,128], index: 2, kind: input, shape index: {}]   ;;  %s100_s3 = inlined_call_operand.vmem [shape: bf16[16,128], index: 3, kind: output, shape index: {}]  }
   0x1   :  { %v57_v0 = vld [vmem:[%s97_s0] sm:$0xff]  }
   0x2   :  { %v50_v1 = vld [vmem:[%s98_s1] ss:$0 sm:$0xff]  ;;  %v58_v2 = vunpack.c.l.bf16 %v57_v0  ;;  %v59_v3 = vunpack.c.h.bf16 %v57_v0 }
   0x3   :  { %v51_v4 = vld [vmem:[%s99_s2] ss:$0 sm:$0xff] }
   0x4   :  { %v25_v5 = vmul.f32 %v58_v2, %v50_v1  ;;  %v26_v6 = vmul.f32 %v59_v3, %v50_v1 }
   0x6   :  { %v34_v7 = vadd.f32 %v51_v4, %v25_v5  ;;  %v35_v8 = vadd.f32 %v51_v4, %v26_v6 }
   0x8   :  { %v63_v9 = vpack.c.bf16 %v35_v8, %v34_v7 }
   0xa   :  { %64 = vst [vmem:[%s100_s3] sm:$0xff] %v63_v9  }

// kernel: psp_forward.16
= control target key start
LH: loop header
LB: loop body
LE: loop exit
PB: predicated region body
PF: predicated region fallthrough
CT: control target
= control target key end

     0   :  { %v226_v0 = vmov 0.0   ;;  %vm227_vm0 = vmmov 0   ;;  %s289_s1 = inlined_call_operand.vmem [shape: bf16[128,128], index: 1, kind: input, shape index: {}]   ;;  %s290_s0 = inlined_call_operand.vmem [shape: bf16[16,128], index: 0, kind: input, shape index: {}]   ;;  %s291_s2 = inlined_call_operand.vmem [shape: bf16[16,128], index: 2, kind: output, shape index: {0}]   ;;  %s292_s3 = inlined_call_operand.vmem [shape: f32[1,1,128], index: 3, kind: output, shape index: {1}]   ;;  %s293_s4 = inlined_call_operand.vmem [shape: f32[1,1,128], index: 4, kind: output, shape index: {2}]  }
   0x1   :  { %195 = vmatprep.subr.bf16.mxu0 %v226_v0  ;;  %v217_v1 = vld [vmem:[%s289_s1] sm:$0xff]   ;;  %211 = vmatprep.mubr.msk.bf16.mxu0 %vm227_vm0, %v226_v0  ;;  %v218_v2 = vld [vmem:[%s289_s1 + $0x8] sm:$0xff]   ;;  %v219_v3 = vld [vmem:[%s289_s1 + $0x10] sm:$0xff]  }
   0x2   :  { %196 = vmatpush3.bf16.msra.mxu0 %v217_v1  ;;  %v220_v4 = vld [vmem:[%s289_s1 + $0x18] sm:$0xff]   ;;  %v221_v5 = vld [vmem:[%s289_s1 + $0x20] sm:$0xff]   ;;  %v222_v6 = vld [vmem:[%s289_s1 + $0x28] sm:$0xff]  }
   0x3   :  { %197 = vmatprep.subr.bf16.mxu0 %v226_v0  ;;  %v223_v7 = vld [vmem:[%s289_s1 + $0x30] sm:$0xff]   ;;  %v224_v8 = vld [vmem:[%s289_s1 + $0x38] sm:$0xff]   ;;  %v225_v9 = vld [vmem:[%s290_s0] sm:$0xff]  }
   0x6   :  { %198 = vmatpush3.bf16.msra.mxu0 %v218_v2 }
   0x7   :  { %199 = vmatprep.subr.bf16.mxu0 %v226_v0 }
   0xa   :  { %200 = vmatpush3.bf16.msra.mxu0 %v219_v3 }
   0xb   :  { %201 = vmatprep.subr.bf16.mxu0 %v226_v0 }
   0xe   :  { %202 = vmatpush3.bf16.msra.mxu0 %v220_v4 }
   0xf   :  { %203 = vmatprep.subr.bf16.mxu0 %v226_v0 }
  0x12   :  { %204 = vmatpush3.bf16.msra.mxu0 %v221_v5 }
  0x13   :  { %205 = vmatprep.subr.bf16.mxu0 %v226_v0 }
  0x16   :  { %206 = vmatpush3.bf16.msra.mxu0 %v222_v6 }
  0x17   :  { %207 = vmatprep.subr.bf16.mxu0 %v226_v0 }
  0x1a   :  { %208 = vmatpush3.bf16.msra.mxu0 %v223_v7 }
  0x1b   :  { %209 = vmatprep.subr.bf16.mxu0 %v226_v0 }
  0x1e   :  { %210 = vmatpush3.bf16.msra.mxu0 %v224_v8 }
  0x21   :  { %212 = vmatmul.mubr.bf16.vlgmr.msra.gmra.mrb[0].mxu0 %v225_v9 }
  0xf4   :  { %v121_v10 = vpop.f32.mrb[0].mxu0 }
  0xf5   :  { %v213_v11 = vpop.f32.mrb[1].mxu0  ;;  %v136_v13 = vmul.f32 %v121_v10, %v121_v10 }
  0xf6   :  { %v124_v12 = vpop.f32.mrb[2].mxu0 }
  0xf7   :  { %v128_v14 = vadd.f32 %v124_v12, %v121_v10  ;;  %v137_v15 = vmul.f32 %v124_v12, %v124_v12  ;;  %v184_v16 = vpack.c.bf16 %v124_v12, %v121_v10  ;;  %v214_v17 = vpop.f32.mrb[3].mxu0 }
  0xf9   :  { %v129_v18 = vrot.slane %v128_v14, 4  ;;  %v138_v19 = vadd.f32 %v137_v15, %v136_v13  ;;  %185 = vst [vmem:[%s291_s2] sm:$0xff] %v184_v16  }
  0xfb   :  { %v130_v20 = vadd.f32 %v129_v18, %v128_v14  ;;  %v139_v21 = vrot.slane %v138_v19, 4 }
  0xfd   :  { %v131_v22 = vrot.slane %v130_v20, 2  ;;  %v140_v23 = vadd.f32 %v139_v21, %v138_v19 }
  0xff   :  { %v132_v24 = vadd.f32 %v131_v22, %v130_v20  ;;  %v141_v25 = vrot.slane %v140_v23, 2 }
 0x101   :  { %v133_v26 = vrot.slane %v132_v24, 1  ;;  %v142_v27 = vadd.f32 %v141_v25, %v140_v23 }
 0x103   :  { %v134_v28 = vadd.f32 %v133_v26, %v132_v24  ;;  %v143_v29 = vrot.slane %v142_v27, 1 }
 0x105   :  { %135 = vst [vmem:[%s292_s3] sm:$0x1] %v134_v28  ;;  %v144_v30 = vadd.f32 %v143_v29, %v142_v27 }
 0x107   :  { %145 = vst [vmem:[%s293_s4] sm:$0x1] %v144_v30 }

// kernel: psp_forward.19
= control target key start
LH: loop header
LB: loop body
LE: loop exit
PB: predicated region body
PF: predicated region fallthrough
CT: control target
= control target key end

     0   :  { %s959_s0 = inlined_call_operand.vmem [shape: bf16[512,128], index: 0, kind: input, shape index: {}]   ;;  %s960_s1 = inlined_call_operand.vmem [shape: f32[1,128], index: 1, kind: input, shape index: {}]   ;;  %s961_s2 = inlined_call_operand.vmem [shape: f32[1,128], index: 2, kind: input, shape index: {}]   ;;  %s962_s3 = inlined_call_operand.vmem [shape: f32[512,128], index: 3, kind: output, shape index: {}]  }
   0x1   :  { %v355_v0 = vld [vmem:[%s959_s0] sm:$0xff]   ;;  %v482_v4 = vld [vmem:[%s959_s0 + $0x8] sm:$0xff]   ;;  %v483_v5 = vld [vmem:[%s959_s0 + $0x10] sm:$0xff]  }
   0x2   :  { %v539_v1 = vld [vmem:[%s960_s1] ss:$0 sm:$0xff]  ;;  %v356_v2 = vunpack.c.l.bf16 %v355_v0  ;;  %v357_v3 = vunpack.c.h.bf16 %v355_v0  ;;  %v484_v6 = vld [vmem:[%s959_s0 + $0x18] sm:$0xff]   ;;  %v360_v8 = vunpack.c.l.bf16 %v482_v4  ;;  %v361_v9 = vunpack.c.h.bf16 %v482_v4  ;;  %v486_v25 = vld [vmem:[%s959_s0 + $0x28] sm:$0xff]  }
   0x3   :  { %v553_v7 = vld [vmem:[%s961_s2] ss:$0 sm:$0xff]  ;;  %v364_v10 = vunpack.c.l.bf16 %v483_v5  ;;  %v365_v11 = vunpack.c.h.bf16 %v483_v5  ;;  %v368_v14 = vunpack.c.l.bf16 %v484_v6  ;;  %v369_v15 = vunpack.c.h.bf16 %v484_v6  ;;  %v487_v26 = vld [vmem:[%s959_s0 + $0x30] sm:$0xff]   ;;  %v488_v31 = vld [vmem:[%s959_s0 + $0x38] sm:$0xff]  }
   0x4   :  { %v149_v12 = vmul.f32 %v356_v2, %v539_v1  ;;  %v150_v13 = vmul.f32 %v357_v3, %v539_v1  ;;  %v151_v16 = vmul.f32 %v360_v8, %v539_v1  ;;  %v152_v17 = vmul.f32 %v361_v9, %v539_v1  ;;  %v485_v20 = vld [vmem:[%s959_s0 + $0x20] sm:$0xff]   ;;  %v490_v53 = vld [vmem:[%s959_s0 + $0x48] sm:$0xff]   ;;  %v491_v54 = vld [vmem:[%s959_s0 + $0x50] sm:$0xff]  }
   0x5   :  { %v153_v18 = vmul.f32 %v364_v10, %v539_v1  ;;  %v154_v19 = vmul.f32 %v365_v11, %v539_v1  ;;  %v155_v23 = vmul.f32 %v368_v14, %v539_v1  ;;  %v156_v24 = vmul.f32 %v369_v15, %v539_v1  ;;  %v489_v48 = vld [vmem:[%s959_s0 + $0x40] sm:$0xff]   ;;  %v492_v59 = vld [vmem:[%s959_s0 + $0x58] sm:$0xff]  }
   0x6   :  { %v220_v21 = vadd.f32 %v553_v7, %v149_v12  ;;  %v221_v22 = vadd.f32 %v553_v7, %v150_v13  ;;  %v222_v27 = vadd.f32 %v553_v7, %v151_v16  ;;  %v223_v28 = vadd.f32 %v553_v7, %v152_v17  ;;  %v493_v14 = vld [vmem:[%s959_s0 + $0x60] sm:$0xff]  }
   0x7   :  { %v224_v29 = vadd.f32 %v553_v7, %v153_v18  ;;  %v225_v30 = vadd.f32 %v553_v7, %v154_v19  ;;  %v226_v32 = vadd.f32 %v553_v7, %v155_v23  ;;  %v227_v33 = vadd.f32 %v553_v7, %v156_v24  ;;  %v494_v19 = vld [vmem:[%s959_s0 + $0x68] sm:$0xff]  }
   0x8   :  { %284 = vst [vmem:[%s962_s3] sm:$0xff] %v220_v21  ;;  %285 = vst [vmem:[%s962_s3 + $0x8] sm:$0xff] %v221_v22  ;;  %v372_v34 = vunpack.c.l.bf16 %v485_v20  ;;  %v373_v35 = vunpack.c.h.bf16 %v485_v20  ;;  %v376_v36 = vunpack.c.l.bf16 %v486_v25  ;;  %v377_v37 = vunpack.c.h.bf16 %v486_v25  ;;  %v495_v20 = vld [vmem:[%s959_s0 + $0x70] sm:$0xff]   ;;  %v496_v25 = vld [vmem:[%s959_s0 + $0x78] sm:$0xff]  }
   0x9   :  { %286 = vst [vmem:[%s962_s3 + $0x10] sm:$0xff] %v222_v27  ;;  %287 = vst [vmem:[%s962_s3 + $0x18] sm:$0xff] %v223_v28  ;;  %v380_v38 = vunpack.c.l.bf16 %v487_v26  ;;  %v381_v39 = vunpack.c.h.bf16 %v487_v26  ;;  %v384_v42 = vunpack.c.l.bf16 %v488_v31  ;;  %v385_v43 = vunpack.c.h.bf16 %v488_v31 }
   0xa   :  { %288 = vst [vmem:[%s962_s3 + $0x20] sm:$0xff] %v224_v29  ;;  %289 = vst [vmem:[%s962_s3 + $0x28] sm:$0xff] %v225_v30  ;;  %v157_v40 = vmul.f32 %v372_v34, %v539_v1  ;;  %v158_v41 = vmul.f32 %v373_v35, %v539_v1  ;;  %v159_v44 = vmul.f32 %v376_v36, %v539_v1  ;;  %v388_v62 = vunpack.c.l.bf16 %v489_v48 }
   0xb   :  { %290 = vst [vmem:[%s962_s3 + $0x30] sm:$0xff] %v226_v32  ;;  %291 = vst [vmem:[%s962_s3 + $0x38] sm:$0xff] %v227_v33  ;;  %v160_v45 = vmul.f32 %v377_v37, %v539_v1  ;;  %v161_v46 = vmul.f32 %v380_v38, %v539_v1  ;;  %v162_v47 = vmul.f32 %v381_v39, %v539_v1  ;;  %v389_v63 = vunpack.c.h.bf16 %v489_v48  ;;  %v499_v48 = vld [vmem:[%s959_s0 + $0x90] sm:$0xff]  }
   0xc   :  { %v228_v49 = vadd.f32 %v553_v7, %v157_v40  ;;  %v229_v50 = vadd.f32 %v553_v7, %v158_v41  ;;  %v163_v51 = vmul.f32 %v384_v42, %v539_v1  ;;  %v164_v52 = vmul.f32 %v385_v43, %v539_v1  ;;  %v497_v42 = vld [vmem:[%s959_s0 + $0x80] sm:$0xff]  }
   0xd   :  { %v230_v55 = vadd.f32 %v553_v7, %v159_v44  ;;  %v231_v56 = vadd.f32 %v553_v7, %v160_v45  ;;  %v232_v57 = vadd.f32 %v553_v7, %v161_v46  ;;  %v233_v58 = vadd.f32 %v553_v7, %v162_v47  ;;  %v498_v47 = vld [vmem:[%s959_s0 + $0x88] sm:$0xff]  }
   0xe   :  { %292 = vst [vmem:[%s962_s3 + $0x40] sm:$0xff] %v228_v49  ;;  %293 = vst [vmem:[%s962_s3 + $0x48] sm:$0xff] %v229_v50  ;;  %v234_v60 = vadd.f32 %v553_v7, %v163_v51  ;;  %v235_v61 = vadd.f32 %v553_v7, %v164_v52  ;;  %v392_v0 = vunpack.c.l.bf16 %v490_v53  ;;  %v393_v2 = vunpack.c.h.bf16 %v490_v53  ;;  %v500_v53 = vld [vmem:[%s959_s0 + $0x98] sm:$0xff]  }
   0xf   :  { %294 = vst [vmem:[%s962_s3 + $0x50] sm:$0xff] %v230_v55  ;;  %295 = vst [vmem:[%s962_s3 + $0x58] sm:$0xff] %v231_v56  ;;  %v396_v3 = vunpack.c.l.bf16 %v491_v54  ;;  %v397_v4 = vunpack.c.h.bf16 %v491_v54  ;;  %v165_v5 = vmul.f32 %v388_v62, %v539_v1  ;;  %v166_v6 = vmul.f32 %v389_v63, %v539_v1 }
  0x10   :  { %296 = vst [vmem:[%s962_s3 + $0x60] sm:$0xff] %v232_v57  ;;  %297 = vst [vmem:[%s962_s3 + $0x68] sm:$0xff] %v233_v58  ;;  %v400_v8 = vunpack.c.l.bf16 %v492_v59  ;;  %v401_v9 = vunpack.c.h.bf16 %v492_v59  ;;  %v167_v10 = vmul.f32 %v392_v0, %v539_v1  ;;  %v168_v11 = vmul.f32 %v393_v2, %v539_v1 }
  0x11   :  { %298 = vst [vmem:[%s962_s3 + $0x70] sm:$0xff] %v234_v60  ;;  %299 = vst [vmem:[%s962_s3 + $0x78] sm:$0xff] %v235_v61  ;;  %v169_v12 = vmul.f32 %v396_v3, %v539_v1  ;;  %v170_v13 = vmul.f32 %v397_v4, %v539_v1  ;;  %v236_v15 = vadd.f32 %v553_v7, %v165_v5  ;;  %v404_v28 = vunpack.c.l.bf16 %v493_v14 }
  0x12   :  { %v237_v16 = vadd.f32 %v553_v7, %v166_v6  ;;  %v171_v17 = vmul.f32 %v400_v8, %v539_v1  ;;  %v172_v18 = vmul.f32 %v401_v9, %v539_v1  ;;  %v238_v21 = vadd.f32 %v553_v7, %v167_v10  ;;  %v501_v8 = vld [vmem:[%s959_s0 + $0xa0] sm:$0xff]  }
  0x13   :  { %v239_v22 = vadd.f32 %v553_v7, %v168_v11  ;;  %v240_v23 = vadd.f32 %v553_v7, %v169_v12  ;;  %v241_v24 = vadd.f32 %v553_v7, %v170_v13  ;;  %300 = vst [vmem:[%s962_s3 + $0x80] sm:$0xff] %v236_v15  ;;  %v405_v29 = vunpack.c.h.bf16 %v493_v14  ;;  %v502_v13 = vld [vmem:[%s959_s0 + $0xa8] sm:$0xff]   ;;  %v503_v14 = vld [vmem:[%s959_s0 + $0xb0] sm:$0xff]  }
  0x14   :  { %301 = vst [vmem:[%s962_s3 + $0x88] sm:$0xff] %v237_v16  ;;  %v242_v26 = vadd.f32 %v553_v7, %v171_v17  ;;  %v243_v27 = vadd.f32 %v553_v7, %v172_v18  ;;  %302 = vst [vmem:[%s962_s3 + $0x90] sm:$0xff] %v238_v21  ;;  %v408_v30 = vunpack.c.l.bf16 %v494_v19  ;;  %v409_v31 = vunpack.c.h.bf16 %v494_v19  ;;  %v504_v19 = vld [vmem:[%s959_s0 + $0xb8] sm:$0xff]  }
  0x15   :  { %303 = vst [vmem:[%s962_s3 + $0x98] sm:$0xff] %v239_v22  ;;  %304 = vst [vmem:[%s962_s3 + $0xa0] sm:$0xff] %v240_v23  ;;  %v412_v32 = vunpack.c.l.bf16 %v495_v20  ;;  %v413_v33 = vunpack.c.h.bf16 %v495_v20  ;;  %v173_v34 = vmul.f32 %v404_v28, %v539_v1  ;;  %v174_v35 = vmul.f32 %v405_v29, %v539_v1 }
  0x16   :  { %305 = vst [vmem:[%s962_s3 + $0xa8] sm:$0xff] %v241_v24  ;;  %306 = vst [vmem:[%s962_s3 + $0xb0] sm:$0xff] %v242_v26  ;;  %v416_v36 = vunpack.c.l.bf16 %v496_v25  ;;  %v417_v37 = vunpack.c.h.bf16 %v496_v25  ;;  %v175_v38 = vmul.f32 %v408_v30, %v539_v1  ;;  %v176_v39 = vmul.f32 %v409_v31, %v539_v1 }
  0x17   :  { %307 = vst [vmem:[%s962_s3 + $0xb8] sm:$0xff] %v243_v27  ;;  %v177_v40 = vmul.f32 %v412_v32, %v539_v1  ;;  %v178_v41 = vmul.f32 %v413_v33, %v539_v1  ;;  %v244_v43 = vadd.f32 %v553_v7, %v173_v34  ;;  %v245_v44 = vadd.f32 %v553_v7, %v174_v35 }
  0x18   :  { %v179_v45 = vmul.f32 %v416_v36, %v539_v1  ;;  %v180_v46 = vmul.f32 %v417_v37, %v539_v1  ;;  %v246_v49 = vadd.f32 %v553_v7, %v175_v38  ;;  %v247_v50 = vadd.f32 %v553_v7, %v176_v39  ;;  %v505_v36 = vld [vmem:[%s959_s0 + $0xc0] sm:$0xff]  }
  0x19   :  { %v248_v51 = vadd.f32 %v553_v7, %v177_v40  ;;  %v249_v52 = vadd.f32 %v553_v7, %v178_v41  ;;  %308 = vst [vmem:[%s962_s3 + $0xc0] sm:$0xff] %v244_v43  ;;  %309 = vst [vmem:[%s962_s3 + $0xc8] sm:$0xff] %v245_v44  ;;  %v420_v56 = vunpack.c.l.bf16 %v497_v42  ;;  %v421_v57 = vunpack.c.h.bf16 %v497_v42  ;;  %v506_v41 = vld [vmem:[%s959_s0 + $0xc8] sm:$0xff]   ;;  %v507_v42 = vld [vmem:[%s959_s0 + $0xd0] sm:$0xff]  }
  0x1a   :  { %v250_v54 = vadd.f32 %v553_v7, %v179_v45  ;;  %v251_v55 = vadd.f32 %v553_v7, %v180_v46  ;;  %310 = vst [vmem:[%s962_s3 + $0xd0] sm:$0xff] %v246_v49  ;;  %311 = vst [vmem:[%s962_s3 + $0xd8] sm:$0xff] %v247_v50  ;;  %v424_v58 = vunpack.c.l.bf16 %v498_v47  ;;  %v425_v59 = vunpack.c.h.bf16 %v498_v47  ;;  %v508_v47 = vld [vmem:[%s959_s0 + $0xd8] sm:$0xff]  }
  0x1b   :  { %312 = vst [vmem:[%s962_s3 + $0xe0] sm:$0xff] %v248_v51  ;;  %313 = vst [vmem:[%s962_s3 + $0xe8] sm:$0xff] %v249_v52  ;;  %v428_v60 = vunpack.c.l.bf16 %v499_v48  ;;  %v429_v61 = vunpack.c.h.bf16 %v499_v48  ;;  %v181_v62 = vmul.f32 %v420_v56, %v539_v1  ;;  %v182_v63 = vmul.f32 %v421_v57, %v539_v1 }
  0x1c   :  { %314 = vst [vmem:[%s962_s3 + $0xf0] sm:$0xff] %v250_v54  ;;  %315 = vst [vmem:[%s962_s3 + $0xf8] sm:$0xff] %v251_v55  ;;  %v432_v0 = vunpack.c.l.bf16 %v500_v53  ;;  %v433_v2 = vunpack.c.h.bf16 %v500_v53  ;;  %v183_v3 = vmul.f32 %v424_v58, %v539_v1  ;;  %v184_v4 = vmul.f32 %v425_v59, %v539_v1 }
  0x1d   :  { %v185_v5 = vmul.f32 %v428_v60, %v539_v1  ;;  %v186_v6 = vmul.f32 %v429_v61, %v539_v1  ;;  %v252_v9 = vadd.f32 %v553_v7, %v181_v62  ;;  %v253_v10 = vadd.f32 %v553_v7, %v182_v63 }
  0x1e   :  { %v187_v11 = vmul.f32 %v432_v0, %v539_v1  ;;  %v188_v12 = vmul.f32 %v433_v2, %v539_v1  ;;  %v254_v15 = vadd.f32 %v553_v7, %v183_v3  ;;  %v255_v16 = vadd.f32 %v553_v7, %v184_v4  ;;  %v509_v0 = vld [vmem:[%s959_s0 + $0xe0] sm:$0xff]  }
  0x1f   :  { %v256_v17 = vadd.f32 %v553_v7, %v185_v5  ;;  %v257_v18 = vadd.f32 %v553_v7, %v186_v6  ;;  %316 = vst [vmem:[%s962_s3 + $0x100] sm:$0xff] %v252_v9  ;;  %317 = vst [vmem:[%s962_s3 + $0x108] sm:$0xff] %v253_v10  ;;  %v436_v22 = vunpack.c.l.bf16 %v501_v8  ;;  %v437_v23 = vunpack.c.h.bf16 %v501_v8  ;;  %v510_v6 = vld [vmem:[%s959_s0 + $0xe8] sm:$0xff]   ;;  %v511_v8 = vld [vmem:[%s959_s0 + $0xf0] sm:$0xff]  }
  0x20   :  { %v258_v20 = vadd.f32 %v553_v7, %v187_v11  ;;  %v259_v21 = vadd.f32 %v553_v7, %v188_v12  ;;  %318 = vst [vmem:[%s962_s3 + $0x110] sm:$0xff] %v254_v15  ;;  %319 = vst [vmem:[%s962_s3 + $0x118] sm:$0xff] %v255_v16  ;;  %v440_v24 = vunpack.c.l.bf16 %v502_v13  ;;  %v441_v25 = vunpack.c.h.bf16 %v502_v13  ;;  %v512_v13 = vld [vmem:[%s959_s0 + $0xf8] sm:$0xff]  }
  0x21   :  { %320 = vst [vmem:[%s962_s3 + $0x120] sm:$0xff] %v256_v17  ;;  %321 = vst [vmem:[%s962_s3 + $0x128] sm:$0xff] %v257_v18  ;;  %v444_v26 = vunpack.c.l.bf16 %v503_v14  ;;  %v445_v27 = vunpack.c.h.bf16 %v503_v14  ;;  %v189_v28 = vmul.f32 %v436_v22, %v539_v1  ;;  %v190_v29 = vmul.f32 %v437_v23, %v539_v1 }
  0x22   :  { %322 = vst [vmem:[%s962_s3 + $0x130] sm:$0xff] %v258_v20  ;;  %323 = vst [vmem:[%s962_s3 + $0x138] sm:$0xff] %v259_v21  ;;  %v448_v30 = vunpack.c.l.bf16 %v504_v19  ;;  %v449_v31 = vunpack.c.h.bf16 %v504_v19  ;;  %v191_v32 = vmul.f32 %v440_v24, %v539_v1  ;;  %v192_v33 = vmul.f32 %v441_v25, %v539_v1 }
  0x23   :  { %v193_v34 = vmul.f32 %v444_v26, %v539_v1  ;;  %v194_v35 = vmul.f32 %v445_v27, %v539_v1  ;;  %v260_v37 = vadd.f32 %v553_v7, %v189_v28  ;;  %v261_v38 = vadd.f32 %v553_v7, %v190_v29 }
  0x24   :  { %v195_v39 = vmul.f32 %v448_v30, %v539_v1  ;;  %v196_v40 = vmul.f32 %v449_v31, %v539_v1  ;;  %v262_v43 = vadd.f32 %v553_v7, %v191_v32  ;;  %v263_v44 = vadd.f32 %v553_v7, %v192_v33 }
  0x25   :  { %v264_v45 = vadd.f32 %v553_v7, %v193_v34  ;;  %v265_v46 = vadd.f32 %v553_v7, %v194_v35  ;;  %324 = vst [vmem:[%s962_s3 + $0x140] sm:$0xff] %v260_v37  ;;  %325 = vst [vmem:[%s962_s3 + $0x148] sm:$0xff] %v261_v38  ;;  %v452_v50 = vunpack.c.l.bf16 %v505_v36  ;;  %v453_v51 = vunpack.c.h.bf16 %v505_v36 }
  0x26   :  { %v266_v48 = vadd.f32 %v553_v7, %v195_v39  ;;  %v267_v49 = vadd.f32 %v553_v7, %v196_v40  ;;  %326 = vst [vmem:[%s962_s3 + $0x150] sm:$0xff] %v262_v43  ;;  %327 = vst [vmem:[%s962_s3 + $0x158] sm:$0xff] %v263_v44  ;;  %v456_v52 = vunpack.c.l.bf16 %v506_v41  ;;  %v457_v53 = vunpack.c.h.bf16 %v506_v41 }
  0x27   :  { %328 = vst [vmem:[%s962_s3 + $0x160] sm:$0xff] %v264_v45  ;;  %329 = vst [vmem:[%s962_s3 + $0x168] sm:$0xff] %v265_v46  ;;  %v460_v54 = vunpack.c.l.bf16 %v507_v42  ;;  %v461_v55 = vunpack.c.h.bf16 %v507_v42  ;;  %v197_v56 = vmul.f32 %v452_v50, %v539_v1  ;;  %v198_v57 = vmul.f32 %v453_v51, %v539_v1 }
  0x28   :  { %330 = vst [vmem:[%s962_s3 + $0x170] sm:$0xff] %v266_v48  ;;  %331 = vst [vmem:[%s962_s3 + $0x178] sm:$0xff] %v267_v49  ;;  %v464_v58 = vunpack.c.l.bf16 %v508_v47  ;;  %v465_v59 = vunpack.c.h.bf16 %v508_v47  ;;  %v199_v60 = vmul.f32 %v456_v52, %v539_v1  ;;  %v200_v61 = vmul.f32 %v457_v53, %v539_v1 }
  0x29   :  { %v201_v62 = vmul.f32 %v460_v54, %v539_v1  ;;  %v202_v63 = vmul.f32 %v461_v55, %v539_v1  ;;  %v268_v2 = vadd.f32 %v553_v7, %v197_v56  ;;  %v269_v3 = vadd.f32 %v553_v7, %v198_v57 }
  0x2a   :  { %v203_v4 = vmul.f32 %v464_v58, %v539_v1  ;;  %v204_v5 = vmul.f32 %v465_v59, %v539_v1  ;;  %v270_v9 = vadd.f32 %v553_v7, %v199_v60  ;;  %v271_v10 = vadd.f32 %v553_v7, %v200_v61 }
  0x2b   :  { %v272_v11 = vadd.f32 %v553_v7, %v201_v62  ;;  %v273_v12 = vadd.f32 %v553_v7, %v202_v63  ;;  %332 = vst [vmem:[%s962_s3 + $0x180] sm:$0xff] %v268_v2  ;;  %333 = vst [vmem:[%s962_s3 + $0x188] sm:$0xff] %v269_v3  ;;  %v468_v16 = vunpack.c.l.bf16 %v509_v0  ;;  %v469_v17 = vunpack.c.h.bf16 %v509_v0 }
  0x2c   :  { %v274_v14 = vadd.f32 %v553_v7, %v203_v4  ;;  %v275_v15 = vadd.f32 %v553_v7, %v204_v5  ;;  %334 = vst [vmem:[%s962_s3 + $0x190] sm:$0xff] %v270_v9  ;;  %335 = vst [vmem:[%s962_s3 + $0x198] sm:$0xff] %v271_v10  ;;  %v472_v18 = vunpack.c.l.bf16 %v510_v6  ;;  %v473_v19 = vunpack.c.h.bf16 %v510_v6 }
  0x2d   :  { %336 = vst [vmem:[%s962_s3 + $0x1a0] sm:$0xff] %v272_v11  ;;  %337 = vst [vmem:[%s962_s3 + $0x1a8] sm:$0xff] %v273_v12  ;;  %v476_v20 = vunpack.c.l.bf16 %v511_v8  ;;  %v477_v21 = vunpack.c.h.bf16 %v511_v8  ;;  %v205_v22 = vmul.f32 %v468_v16, %v539_v1  ;;  %v206_v23 = vmul.f32 %v469_v17, %v539_v1 }
  0x2e   :  { %338 = vst [vmem:[%s962_s3 + $0x1b0] sm:$0xff] %v274_v14  ;;  %339 = vst [vmem:[%s962_s3 + $0x1b8] sm:$0xff] %v275_v15  ;;  %v480_v24 = vunpack.c.l.bf16 %v512_v13  ;;  %v481_v25 = vunpack.c.h.bf16 %v512_v13  ;;  %v207_v26 = vmul.f32 %v472_v18, %v539_v1  ;;  %v208_v27 = vmul.f32 %v473_v19, %v539_v1 }
  0x2f   :  { %v209_v28 = vmul.f32 %v476_v20, %v539_v1  ;;  %v210_v29 = vmul.f32 %v477_v21, %v539_v1  ;;  %v276_v30 = vadd.f32 %v553_v7, %v205_v22  ;;  %v277_v31 = vadd.f32 %v553_v7, %v206_v23 }
  0x30   :  { %v211_v32 = vmul.f32 %v480_v24, %v539_v1  ;;  %v212_v33 = vmul.f32 %v481_v25, %v539_v1  ;;  %v278_v34 = vadd.f32 %v553_v7, %v207_v26  ;;  %v279_v35 = vadd.f32 %v553_v7, %v208_v27 }
  0x31   :  { %v280_v36 = vadd.f32 %v553_v7, %v209_v28  ;;  %v281_v37 = vadd.f32 %v553_v7, %v210_v29  ;;  %340 = vst [vmem:[%s962_s3 + $0x1c0] sm:$0xff] %v276_v30  ;;  %341 = vst [vmem:[%s962_s3 + $0x1c8] sm:$0xff] %v277_v31 }
  0x32   :  { %v282_v38 = vadd.f32 %v553_v7, %v211_v32  ;;  %v283_v1 = vadd.f32 %v553_v7, %v212_v33  ;;  %342 = vst [vmem:[%s962_s3 + $0x1d0] sm:$0xff] %v278_v34  ;;  %343 = vst [vmem:[%s962_s3 + $0x1d8] sm:$0xff] %v279_v35 }
  0x33   :  { %344 = vst [vmem:[%s962_s3 + $0x1e0] sm:$0xff] %v280_v36  ;;  %345 = vst [vmem:[%s962_s3 + $0x1e8] sm:$0xff] %v281_v37 }
  0x34   :  { %346 = vst [vmem:[%s962_s3 + $0x1f0] sm:$0xff] %v282_v38  ;;  %347 = vst [vmem:[%s962_s3 + $0x1f8] sm:$0xff] %v283_v1 }

// kernel: psp_forward.18
= control target key start
LH: loop header
LB: loop body
LE: loop exit
PB: predicated region body
PF: predicated region fallthrough
CT: control target
= control target key end

     0   :  { %s2935_s3 = inlined_call_operand.vmem [shape: bf16[128,128], index: 3, kind: input, shape index: {}]   ;;  %s2936_s2 = inlined_call_operand.vmem [shape: bf16[128,128], index: 2, kind: input, shape index: {}]   ;;  %s2937_s1 = inlined_call_operand.vmem [shape: bf16[512,128], index: 1, kind: input, shape index: {}]   ;;  %s2938_s0 = inlined_call_operand.vmem [shape: bf16[512,128], index: 0, kind: input, shape index: {}]   ;;  %s2939_s4 = inlined_call_operand.vmem [shape: bf16[512,128], index: 4, kind: output, shape index: {0}]   ;;  %s2940_s5 = inlined_call_operand.vmem [shape: f32[1,1,128], index: 5, kind: output, shape index: {1}]   ;;  %s2941_s6 = inlined_call_operand.vmem [shape: f32[1,1,128], index: 6, kind: output, shape index: {2}]  }
   0x1   :  { %v2478_v0 = vld [vmem:[%s2935_s3] sm:$0xff]   ;;  %v2480_v2 = vld [vmem:[%s2935_s3 + $0x8] sm:$0xff]   ;;  %v2482_v4 = vld [vmem:[%s2935_s3 + $0x10] sm:$0xff]  }
   0x2   :  { %v2479_v1 = vld [vmem:[%s2936_s2] sm:$0xff]   ;;  %2254 = vmatprep.subr.bf16.mxu1 %v2478_v0  ;;  %v2481_v3 = vld [vmem:[%s2936_s2 + $0x8] sm:$0xff]   ;;  %v2483_v5 = vld [vmem:[%s2936_s2 + $0x10] sm:$0xff]  }
   0x3   :  { %2334 = vmatprep.subr.bf16.mxu0 %v2479_v1  ;;  %2255 = vmatpush3.bf16.msra.mxu1 %v2478_v0  ;;  %v2484_v6 = vld [vmem:[%s2935_s3 + $0x18] sm:$0xff]   ;;  %v2486_v8 = vld [vmem:[%s2935_s3 + $0x20] sm:$0xff]   ;;  %v2488_v10 = vld [vmem:[%s2935_s3 + $0x28] sm:$0xff]  }
   0x4   :  { %2335 = vmatpush3.bf16.msra.mxu0 %v2479_v1  ;;  %2256 = vmatprep.subr.bf16.mxu1 %v2480_v2  ;;  %v2485_v7 = vld [vmem:[%s2936_s2 + $0x18] sm:$0xff]   ;;  %v2487_v9 = vld [vmem:[%s2936_s2 + $0x20] sm:$0xff]   ;;  %v2489_v11 = vld [vmem:[%s2936_s2 + $0x28] sm:$0xff]  }
   0x5   :  { %2336 = vmatprep.subr.bf16.mxu0 %v2481_v3  ;;  %v2494_v12 = vld [vmem:[%s2937_s1] sm:$0xff]   ;;  %v2490_v14 = vld [vmem:[%s2935_s3 + $0x30] sm:$0xff]   ;;  %v2492_v16 = vld [vmem:[%s2935_s3 + $0x38] sm:$0xff]  }
   0x6   :  { %v2495_v13 = vld [vmem:[%s2938_s0] sm:$0xff]   ;;  %2270 = vmatprep.mubr.bf16.mxu1 %v2494_v12  ;;  %v2491_v15 = vld [vmem:[%s2936_s2 + $0x30] sm:$0xff]   ;;  %v2493_v17 = vld [vmem:[%s2936_s2 + $0x38] sm:$0xff]  }
   0x7   :  { %2257 = vmatpush3.bf16.msra.mxu1 %v2480_v2  ;;  %2350 = vmatprep.mubr.bf16.mxu0 %v2495_v13  ;;  %v2496_v18 = vld [vmem:[%s2937_s1 + $0x8] sm:$0xff]   ;;  %v2498_v20 = vld [vmem:[%s2937_s1 + $0x10] sm:$0xff]   ;;  %v2500_v22 = vld [vmem:[%s2937_s1 + $0x18] sm:$0xff]  }
   0x8   :  { %2337 = vmatpush3.bf16.msra.mxu0 %v2481_v3  ;;  %2258 = vmatprep.subr.bf16.mxu1 %v2482_v4  ;;  %v2497_v19 = vld [vmem:[%s2938_s0 + $0x8] sm:$0xff]   ;;  %v2499_v21 = vld [vmem:[%s2938_s0 + $0x10] sm:$0xff]   ;;  %v2501_v23 = vld [vmem:[%s2938_s0 + $0x18] sm:$0xff]  }
   0x9   :  { %2338 = vmatprep.subr.bf16.mxu0 %v2483_v5  ;;  %v2502_v24 = vld [vmem:[%s2937_s1 + $0x20] sm:$0xff]   ;;  %v2504_v26 = vld [vmem:[%s2937_s1 + $0x28] sm:$0xff]   ;;  %v2506_v28 = vld [vmem:[%s2937_s1 + $0x30] sm:$0xff]  }
   0xa   :  { %v2503_v25 = vld [vmem:[%s2938_s0 + $0x20] sm:$0xff]   ;;  %v2505_v27 = vld [vmem:[%s2938_s0 + $0x28] sm:$0xff]   ;;  %v2507_v29 = vld [vmem:[%s2938_s0 + $0x30] sm:$0xff]  }
   0xb   :  { %2259 = vmatpush3.bf16.msra.mxu1 %v2482_v4  ;;  %v2508_v30 = vld [vmem:[%s2937_s1 + $0x38] sm:$0xff]   ;;  %v2510_v32 = vld [vmem:[%s2937_s1 + $0x40] sm:$0xff]   ;;  %v2512_v34 = vld [vmem:[%s2937_s1 + $0x48] sm:$0xff]  }
   0xc   :  { %2339 = vmatpush3.bf16.msra.mxu0 %v2483_v5  ;;  %2260 = vmatprep.subr.bf16.mxu1 %v2484_v6  ;;  %v2509_v31 = vld [vmem:[%s2938_s0 + $0x38] sm:$0xff]   ;;  %v2511_v33 = vld [vmem:[%s2938_s0 + $0x40] sm:$0xff]   ;;  %v2513_v35 = vld [vmem:[%s2938_s0 + $0x48] sm:$0xff]  }
   0xd   :  { %2340 = vmatprep.subr.bf16.mxu0 %v2485_v7  ;;  %v2514_v36 = vld [vmem:[%s2937_s1 + $0x50] sm:$0xff]   ;;  %v2516_v38 = vld [vmem:[%s2937_s1 + $0x58] sm:$0xff]   ;;  %v2518_v40 = vld [vmem:[%s2937_s1 + $0x60] sm:$0xff]  }
   0xe   :  { %v2515_v37 = vld [vmem:[%s2938_s0 + $0x50] sm:$0xff]   ;;  %v2517_v39 = vld [vmem:[%s2938_s0 + $0x58] sm:$0xff]   ;;  %v2519_v41 = vld [vmem:[%s2938_s0 + $0x60] sm:$0xff]  }
   0xf   :  { %2261 = vmatpush3.bf16.msra.mxu1 %v2484_v6  ;;  %v2520_v42 = vld [vmem:[%s2937_s1 + $0x68] sm:$0xff]   ;;  %v2522_v44 = vld [vmem:[%s2937_s1 + $0x70] sm:$0xff]   ;;  %v2524_v46 = vld [vmem:[%s2937_s1 + $0x78] sm:$0xff]  }
  0x10   :  { %2341 = vmatpush3.bf16.msra.mxu0 %v2485_v7  ;;  %2262 = vmatprep.subr.bf16.mxu1 %v2486_v8  ;;  %v2521_v43 = vld [vmem:[%s2938_s0 + $0x68] sm:$0xff]   ;;  %v2523_v45 = vld [vmem:[%s2938_s0 + $0x70] sm:$0xff]   ;;  %v2525_v47 = vld [vmem:[%s2938_s0 + $0x78] sm:$0xff]  }
  0x11   :  { %2342 = vmatprep.subr.bf16.mxu0 %v2487_v9  ;;  %v2526_v48 = vld [vmem:[%s2937_s1 + $0x80] sm:$0xff]   ;;  %v2528_v50 = vld [vmem:[%s2937_s1 + $0x88] sm:$0xff]   ;;  %v2530_v52 = vld [vmem:[%s2937_s1 + $0x90] sm:$0xff]  }
  0x12   :  { %v2527_v49 = vld [vmem:[%s2938_s0 + $0x80] sm:$0xff]   ;;  %v2529_v51 = vld [vmem:[%s2938_s0 + $0x88] sm:$0xff]   ;;  %v2531_v53 = vld [vmem:[%s2938_s0 + $0x90] sm:$0xff]  }
  0x13   :  { %2263 = vmatpush3.bf16.msra.mxu1 %v2486_v8  ;;  %v2532_v54 = vld [vmem:[%s2937_s1 + $0x98] sm:$0xff]   ;;  %v2534_v56 = vld [vmem:[%s2937_s1 + $0xa0] sm:$0xff]   ;;  %v2536_v58 = vld [vmem:[%s2937_s1 + $0xa8] sm:$0xff]  }
  0x14   :  { %2343 = vmatpush3.bf16.msra.mxu0 %v2487_v9  ;;  %2264 = vmatprep.subr.bf16.mxu1 %v2488_v10  ;;  %v2533_v55 = vld [vmem:[%s2938_s0 + $0x98] sm:$0xff]   ;;  %v2535_v57 = vld [vmem:[%s2938_s0 + $0xa0] sm:$0xff]   ;;  %v2537_v59 = vld [vmem:[%s2938_s0 + $0xa8] sm:$0xff]  }
  0x15   :  { %2344 = vmatprep.subr.bf16.mxu0 %v2489_v11  ;;  %v2538_v60 = vld [vmem:[%s2937_s1 + $0xb0] sm:$0xff]   ;;  %v2540_v62 = vld [vmem:[%s2937_s1 + $0xb8] sm:$0xff]   ;;  %v2542_v0 = vld [vmem:[%s2937_s1 + $0xc0] sm:$0xff]  }
  0x16   :  { %v2539_v61 = vld [vmem:[%s2938_s0 + $0xb0] sm:$0xff]   ;;  %v2541_v63 = vld [vmem:[%s2938_s0 + $0xb8] sm:$0xff]   ;;  %v2543_v1 = vld [vmem:[%s2938_s0 + $0xc0] sm:$0xff]  }
  0x17   :  { %2265 = vmatpush3.bf16.msra.mxu1 %v2488_v10  ;;  %v2544_v2 = vld [vmem:[%s2937_s1 + $0xc8] sm:$0xff]   ;;  %v2546_v4 = vld [vmem:[%s2937_s1 + $0xd0] sm:$0xff]   ;;  %v2548_v6 = vld [vmem:[%s2937_s1 + $0xd8] sm:$0xff]  }
  0x18   :  { %2345 = vmatpush3.bf16.msra.mxu0 %v2489_v11  ;;  %2266 = vmatprep.subr.bf16.mxu1 %v2490_v14  ;;  %v2545_v3 = vld [vmem:[%s2938_s0 + $0xc8] sm:$0xff]   ;;  %v2547_v5 = vld [vmem:[%s2938_s0 + $0xd0] sm:$0xff]   ;;  %v2549_v7 = vld [vmem:[%s2938_s0 + $0xd8] sm:$0xff]  }
  0x19   :  { %2346 = vmatprep.subr.bf16.mxu0 %v2491_v15  ;;  %v2550_v8 = vld [vmem:[%s2937_s1 + $0xe0] sm:$0xff]   ;;  %v2552_v10 = vld [vmem:[%s2937_s1 + $0xe8] sm:$0xff]   ;;  %v2554_v12 = vld [vmem:[%s2937_s1 + $0xf0] sm:$0xff]  }
  0x1a   :  { %v2551_v9 = vld [vmem:[%s2938_s0 + $0xe0] sm:$0xff]   ;;  %v2553_v11 = vld [vmem:[%s2938_s0 + $0xe8] sm:$0xff]   ;;  %v2555_v13 = vld [vmem:[%s2938_s0 + $0xf0] sm:$0xff]  }
  0x1b   :  { %2267 = vmatpush3.bf16.msra.mxu1 %v2490_v14  ;;  %v2556_v14 = vld [vmem:[%s2937_s1 + $0xf8] sm:$0xff]  }
  0x1c   :  { %2347 = vmatpush3.bf16.msra.mxu0 %v2491_v15  ;;  %2268 = vmatprep.subr.bf16.mxu1 %v2492_v16  ;;  %v2557_v15 = vld [vmem:[%s2938_s0 + $0xf8] sm:$0xff]  }
  0x1d   :  { %2348 = vmatprep.subr.bf16.mxu0 %v2493_v17 }
  0x1f   :  { %2269 = vmatpush3.bf16.msra.mxu1 %v2492_v16 }
  0x20   :  { %2349 = vmatpush3.bf16.msra.mxu0 %v2493_v17 }
  0x22   :  { %2271 = vmatmul.mubr.bf16.vlgmr.msra.gmra.mrb[0].mxu1 %v2496_v18 }
  0x23   :  { %2351 = vmatmul.mubr.bf16.vlgmr.msra.gmra.mrb[0].mxu0 %v2497_v19  ;;  %2274 = vmatprep.mubr.bf16.mxu1 %v2498_v20 }
  0x24   :  { %2354 = vmatprep.mubr.bf16.mxu0 %v2499_v21 }
  0x2a   :  { %2275 = vmatmul.mubr.bf16.gmra.mrb[4].mxu1 %v2500_v22 }
  0x2b   :  { %2355 = vmatmul.mubr.bf16.gmra.mrb[4].mxu0 %v2501_v23  ;;  %2278 = vmatprep.mubr.bf16.mxu1 %v2502_v24 }
  0x2c   :  { %2358 = vmatprep.mubr.bf16.mxu0 %v2503_v25 }
  0x32   :  { %2279 = vmatmul.mubr.bf16.gmra.mrb[8].mxu1 %v2504_v26 }
  0x33   :  { %2359 = vmatmul.mubr.bf16.gmra.mrb[8].mxu0 %v2505_v27  ;;  %2282 = vmatprep.mubr.bf16.mxu1 %v2506_v28 }
  0x34   :  { %2362 = vmatprep.mubr.bf16.mxu0 %v2507_v29 }
  0x3a   :  { %2283 = vmatmul.mubr.bf16.gmra.mrb[12].mxu1 %v2508_v30 }
  0x3b   :  { %2363 = vmatmul.mubr.bf16.gmra.mrb[12].mxu0 %v2509_v31  ;;  %2286 = vmatprep.mubr.bf16.mxu1 %v2510_v32 }
  0x3c   :  { %2366 = vmatprep.mubr.bf16.mxu0 %v2511_v33 }
  0x42   :  { %2287 = vmatmul.mubr.bf16.gmra.mrb[16].mxu1 %v2512_v34 }
  0x43   :  { %2367 = vmatmul.mubr.bf16.gmra.mrb[16].mxu0 %v2513_v35  ;;  %2290 = vmatprep.mubr.bf16.mxu1 %v2514_v36 }
  0x44   :  { %2370 = vmatprep.mubr.bf16.mxu0 %v2515_v37 }
  0x4a   :  { %2291 = vmatmul.mubr.bf16.gmra.mrb[20].mxu1 %v2516_v38 }
  0x4b   :  { %2371 = vmatmul.mubr.bf16.gmra.mrb[20].mxu0 %v2517_v39  ;;  %2294 = vmatprep.mubr.bf16.mxu1 %v2518_v40 }
  0x4c   :  { %2374 = vmatprep.mubr.bf16.mxu0 %v2519_v41 }
  0x52   :  { %2295 = vmatmul.mubr.bf16.gmra.mrb[24].mxu1 %v2520_v42 }
  0x53   :  { %2375 = vmatmul.mubr.bf16.gmra.mrb[24].mxu0 %v2521_v43  ;;  %2298 = vmatprep.mubr.bf16.mxu1 %v2522_v44 }
  0x54   :  { %2378 = vmatprep.mubr.bf16.mxu0 %v2523_v45 }
  0x5a   :  { %2299 = vmatmul.mubr.bf16.gmra.mrb[28].mxu1 %v2524_v46 }
  0x5b   :  { %2379 = vmatmul.mubr.bf16.gmra.mrb[28].mxu0 %v2525_v47  ;;  %2302 = vmatprep.mubr.bf16.mxu1 %v2526_v48 }
  0x5c   :  { %2382 = vmatprep.mubr.bf16.mxu0 %v2527_v49 }
  0x62   :  { %2303 = vmatmul.mubr.bf16.gmra.mrb[32].mxu1 %v2528_v50 }
  0x63   :  { %2383 = vmatmul.mubr.bf16.gmra.mrb[32].mxu0 %v2529_v51  ;;  %2306 = vmatprep.mubr.bf16.mxu1 %v2530_v52 }
  0x64   :  { %2386 = vmatprep.mubr.bf16.mxu0 %v2531_v53 }
  0x6a   :  { %2307 = vmatmul.mubr.bf16.gmra.mrb[36].mxu1 %v2532_v54 }
  0x6b   :  { %2387 = vmatmul.mubr.bf16.gmra.mrb[36].mxu0 %v2533_v55  ;;  %2310 = vmatprep.mubr.bf16.mxu1 %v2534_v56 }
  0x6c   :  { %2390 = vmatprep.mubr.bf16.mxu0 %v2535_v57 }
  0x72   :  { %2311 = vmatmul.mubr.bf16.gmra.mrb[40].mxu1 %v2536_v58 }
  0x73   :  { %2391 = vmatmul.mubr.bf16.gmra.mrb[40].mxu0 %v2537_v59  ;;  %2314 = vmatprep.mubr.bf16.mxu1 %v2538_v60 }
  0x74   :  { %2394 = vmatprep.mubr.bf16.mxu0 %v2539_v61 }
  0x7a   :  { %2315 = vmatmul.mubr.bf16.gmra.mrb[44].mxu1 %v2540_v62 }
  0x7b   :  { %2395 = vmatmul.mubr.bf16.gmra.mrb[44].mxu0 %v2541_v63  ;;  %2318 = vmatprep.mubr.bf16.mxu1 %v2542_v0 }
  0x7c   :  { %2398 = vmatprep.mubr.bf16.mxu0 %v2543_v1 }
  0x82   :  { %2319 = vmatmul.mubr.bf16.gmra.mrb[48].mxu1 %v2544_v2 }
  0x83   :  { %2399 = vmatmul.mubr.bf16.gmra.mrb[48].mxu0 %v2545_v3  ;;  %2322 = vmatprep.mubr.bf16.mxu1 %v2546_v4 }
  0x84   :  { %2402 = vmatprep.mubr.bf16.mxu0 %v2547_v5 }
  0x8a   :  { %2323 = vmatmul.mubr.bf16.gmra.mrb[52].mxu1 %v2548_v6 }
  0x8b   :  { %2403 = vmatmul.mubr.bf16.gmra.mrb[52].mxu0 %v2549_v7  ;;  %2326 = vmatprep.mubr.bf16.mxu1 %v2550_v8 }
  0x8c   :  { %2406 = vmatprep.mubr.bf16.mxu0 %v2551_v9 }
  0x92   :  { %2327 = vmatmul.mubr.bf16.gmra.mrb[56].mxu1 %v2552_v10 }
  0x93   :  { %2407 = vmatmul.mubr.bf16.gmra.mrb[56].mxu0 %v2553_v11  ;;  %2330 = vmatprep.mubr.bf16.mxu1 %v2554_v12 }
  0x94   :  { %2410 = vmatprep.mubr.bf16.mxu0 %v2555_v13 }
  0x9a   :  { %2331 = vmatmul.mubr.bf16.gmra.mrb[60].mxu1 %v2556_v14 }
  0x9b   :  { %2411 = vmatmul.mubr.bf16.gmra.mrb[60].mxu0 %v2557_v15 }
  0xf5   :  { %v2272_v16 = vpop.f32.mrb[0].mxu1 }
  0xf6   :  { %v2352_v17 = vpop.f32.mrb[0].mxu0  ;;  %v455_v18 = vpop.f32.mrb[1].mxu1 }
  0xf7   :  { %v993_v19 = vadd.f32 %v2352_v17, %v2272_v16  ;;  %v984_v20 = vpop.f32.mrb[1].mxu0  ;;  %v2273_v21 = vpop.f32.mrb[2].mxu1 }
  0xf8   :  { %v985_v22 = vadd.f32 %v984_v20, %v455_v18  ;;  %v2353_v23 = vpop.f32.mrb[2].mxu0  ;;  %v458_v24 = vpop.f32.mrb[3].mxu1 }
  0xf9   :  { %v996_v25 = vadd.f32 %v2353_v23, %v2273_v21  ;;  %v987_v26 = vpop.f32.mrb[3].mxu0  ;;  %v1311_v34 = vmul.f32 %v993_v19, %v993_v19 }
  0xfa   :  { %v988_v27 = vadd.f32 %v987_v26, %v458_v24  ;;  %v1309_v29 = vmul.f32 %v985_v22, %v985_v22 }
  0xfb   :  { %v1991_v28 = vpack.c.bf16 %v996_v25, %v993_v19  ;;  %v1312_v42 = vmul.f32 %v996_v25, %v996_v25 }
  0xfc   :  { %v1239_v30 = vadd.f32 %v988_v27, %v985_v22  ;;  %v1310_v31 = vmul.f32 %v988_v27, %v988_v27  ;;  %v1986_v32 = vpack.c.bf16 %v988_v27, %v985_v22 }
  0xfd   :  { %2143 = vst [vmem:[%s2939_s4 + $0x8] sm:$0xff] %v1991_v28   ;;  %v2276_v33 = vpop.f32.mrb[4].mxu1 }
  0xfe   :  { %v1240_v35 = vadd.f32 %v1239_v30, %v993_v19  ;;  %v1373_v36 = vadd.f32 %v1310_v31, %v1309_v29  ;;  %1987 = vst [vmem:[%s2939_s4] sm:$0xff] %v1986_v32   ;;  %v2356_v37 = vpop.f32.mrb[4].mxu0  ;;  %v471_v38 = vpop.f32.mrb[5].mxu1 }
  0xff   :  { %v1009_v39 = vadd.f32 %v2356_v37, %v2276_v33  ;;  %v1000_v40 = vpop.f32.mrb[5].mxu0  ;;  %v2277_v41 = vpop.f32.mrb[6].mxu1 }
 0x100   :  { %v1374_v43 = vadd.f32 %v1373_v36, %v1311_v34  ;;  %v1001_v44 = vadd.f32 %v1000_v40, %v471_v38  ;;  %v1241_v45 = vadd.f32 %v1240_v35, %v996_v25  ;;  %v2357_v46 = vpop.f32.mrb[6].mxu0  ;;  %v474_v47 = vpop.f32.mrb[7].mxu1 }
 0x101   :  { %v1012_v48 = vadd.f32 %v2357_v46, %v2277_v41  ;;  %v1003_v49 = vpop.f32.mrb[7].mxu0  ;;  %v1315_v60 = vmul.f32 %v1009_v39, %v1009_v39 }
 0x102   :  { %v1242_v50 = vadd.f32 %v1241_v45, %v1001_v44  ;;  %v1313_v51 = vmul.f32 %v1001_v44, %v1001_v44  ;;  %v1375_v52 = vadd.f32 %v1374_v43, %v1312_v42  ;;  %v1004_v53 = vadd.f32 %v1003_v49, %v474_v47 }
 0x103   :  { %v2001_v54 = vpack.c.bf16 %v1012_v48, %v1009_v39  ;;  %v1316_v4 = vmul.f32 %v1012_v48, %v1012_v48 }
 0x104   :  { %v1376_v55 = vadd.f32 %v1375_v52, %v1313_v51  ;;  %v1243_v56 = vadd.f32 %v1242_v50, %v1004_v53  ;;  %v1314_v57 = vmul.f32 %v1004_v53, %v1004_v53  ;;  %v1996_v58 = vpack.c.bf16 %v1004_v53, %v1001_v44 }
 0x105   :  { %2145 = vst [vmem:[%s2939_s4 + $0x18] sm:$0xff] %v2001_v54   ;;  %v2280_v59 = vpop.f32.mrb[8].mxu1 }
 0x106   :  { %v1244_v61 = vadd.f32 %v1243_v56, %v1009_v39  ;;  %v1377_v62 = vadd.f32 %v1376_v55, %v1314_v57  ;;  %2144 = vst [vmem:[%s2939_s4 + $0x10] sm:$0xff] %v1996_v58   ;;  %v2360_v63 = vpop.f32.mrb[8].mxu0  ;;  %v487_v0 = vpop.f32.mrb[9].mxu1 }
 0x107   :  { %v1025_v1 = vadd.f32 %v2360_v63, %v2280_v59  ;;  %v1016_v2 = vpop.f32.mrb[9].mxu0  ;;  %v2281_v3 = vpop.f32.mrb[10].mxu1 }
 0x108   :  { %v1378_v5 = vadd.f32 %v1377_v62, %v1315_v60  ;;  %v1017_v6 = vadd.f32 %v1016_v2, %v487_v0  ;;  %v1245_v7 = vadd.f32 %v1244_v61, %v1012_v48  ;;  %v2361_v8 = vpop.f32.mrb[10].mxu0  ;;  %v490_v9 = vpop.f32.mrb[11].mxu1 }
 0x109   :  { %v1028_v10 = vadd.f32 %v2361_v8, %v2281_v3  ;;  %v1019_v11 = vpop.f32.mrb[11].mxu0  ;;  %v1319_v22 = vmul.f32 %v1025_v1, %v1025_v1 }
 0x10a   :  { %v1246_v12 = vadd.f32 %v1245_v7, %v1017_v6  ;;  %v1317_v13 = vmul.f32 %v1017_v6, %v1017_v6  ;;  %v1379_v14 = vadd.f32 %v1378_v5, %v1316_v4  ;;  %v1020_v15 = vadd.f32 %v1019_v11, %v490_v9 }
 0x10b   :  { %v2011_v16 = vpack.c.bf16 %v1028_v10, %v1025_v1  ;;  %v1320_v30 = vmul.f32 %v1028_v10, %v1028_v10 }
 0x10c   :  { %v1380_v17 = vadd.f32 %v1379_v14, %v1317_v13  ;;  %v1247_v18 = vadd.f32 %v1246_v12, %v1020_v15  ;;  %v1318_v19 = vmul.f32 %v1020_v15, %v1020_v15  ;;  %v2006_v20 = vpack.c.bf16 %v1020_v15, %v1017_v6 }
 0x10d   :  { %2147 = vst [vmem:[%s2939_s4 + $0x28] sm:$0xff] %v2011_v16   ;;  %v2284_v21 = vpop.f32.mrb[12].mxu1 }
 0x10e   :  { %v1248_v23 = vadd.f32 %v1247_v18, %v1025_v1  ;;  %v1381_v24 = vadd.f32 %v1380_v17, %v1318_v19  ;;  %2146 = vst [vmem:[%s2939_s4 + $0x20] sm:$0xff] %v2006_v20   ;;  %v2364_v25 = vpop.f32.mrb[12].mxu0  ;;  %v503_v26 = vpop.f32.mrb[13].mxu1 }
 0x10f   :  { %v1041_v27 = vadd.f32 %v2364_v25, %v2284_v21  ;;  %v1032_v28 = vpop.f32.mrb[13].mxu0  ;;  %v2285_v29 = vpop.f32.mrb[14].mxu1 }
 0x110   :  { %v1382_v31 = vadd.f32 %v1381_v24, %v1319_v22  ;;  %v1033_v32 = vadd.f32 %v1032_v28, %v503_v26  ;;  %v1249_v33 = vadd.f32 %v1248_v23, %v1028_v10  ;;  %v2365_v34 = vpop.f32.mrb[14].mxu0  ;;  %v506_v35 = vpop.f32.mrb[15].mxu1 }
 0x111   :  { %v1044_v36 = vadd.f32 %v2365_v34, %v2285_v29  ;;  %v1035_v37 = vpop.f32.mrb[15].mxu0  ;;  %v1323_v48 = vmul.f32 %v1041_v27, %v1041_v27 }
 0x112   :  { %v1250_v38 = vadd.f32 %v1249_v33, %v1033_v32  ;;  %v1321_v39 = vmul.f32 %v1033_v32, %v1033_v32  ;;  %v1383_v40 = vadd.f32 %v1382_v31, %v1320_v30  ;;  %v1036_v41 = vadd.f32 %v1035_v37, %v506_v35 }
 0x113   :  { %v2021_v42 = vpack.c.bf16 %v1044_v36, %v1041_v27  ;;  %v1324_v56 = vmul.f32 %v1044_v36, %v1044_v36 }
 0x114   :  { %v1384_v43 = vadd.f32 %v1383_v40, %v1321_v39  ;;  %v1251_v44 = vadd.f32 %v1250_v38, %v1036_v41  ;;  %v1322_v45 = vmul.f32 %v1036_v41, %v1036_v41  ;;  %v2016_v46 = vpack.c.bf16 %v1036_v41, %v1033_v32 }
 0x115   :  { %2149 = vst [vmem:[%s2939_s4 + $0x38] sm:$0xff] %v2021_v42   ;;  %v2288_v47 = vpop.f32.mrb[16].mxu1 }
 0x116   :  { %v1252_v49 = vadd.f32 %v1251_v44, %v1041_v27  ;;  %v1385_v50 = vadd.f32 %v1384_v43, %v1322_v45  ;;  %2148 = vst [vmem:[%s2939_s4 + $0x30] sm:$0xff] %v2016_v46   ;;  %v2368_v51 = vpop.f32.mrb[16].mxu0  ;;  %v519_v52 = vpop.f32.mrb[17].mxu1 }
 0x117   :  { %v1057_v53 = vadd.f32 %v2368_v51, %v2288_v47  ;;  %v1048_v54 = vpop.f32.mrb[17].mxu0  ;;  %v2289_v55 = vpop.f32.mrb[18].mxu1 }
 0x118   :  { %v1386_v57 = vadd.f32 %v1385_v50, %v1323_v48  ;;  %v1049_v58 = vadd.f32 %v1048_v54, %v519_v52  ;;  %v1253_v59 = vadd.f32 %v1252_v49, %v1044_v36  ;;  %v2369_v60 = vpop.f32.mrb[18].mxu0  ;;  %v522_v61 = vpop.f32.mrb[19].mxu1 }
 0x119   :  { %v1060_v62 = vadd.f32 %v2369_v60, %v2289_v55  ;;  %v1051_v63 = vpop.f32.mrb[19].mxu0  ;;  %v1327_v10 = vmul.f32 %v1057_v53, %v1057_v53 }
 0x11a   :  { %v1254_v0 = vadd.f32 %v1253_v59, %v1049_v58  ;;  %v1325_v1 = vmul.f32 %v1049_v58, %v1049_v58  ;;  %v1387_v2 = vadd.f32 %v1386_v57, %v1324_v56  ;;  %v1052_v3 = vadd.f32 %v1051_v63, %v522_v61 }
 0x11b   :  { %v2031_v4 = vpack.c.bf16 %v1060_v62, %v1057_v53  ;;  %v1328_v18 = vmul.f32 %v1060_v62, %v1060_v62 }
 0x11c   :  { %v1388_v5 = vadd.f32 %v1387_v2, %v1325_v1  ;;  %v1255_v6 = vadd.f32 %v1254_v0, %v1052_v3  ;;  %v1326_v7 = vmul.f32 %v1052_v3, %v1052_v3  ;;  %v2026_v8 = vpack.c.bf16 %v1052_v3, %v1049_v58 }
 0x11d   :  { %2151 = vst [vmem:[%s2939_s4 + $0x48] sm:$0xff] %v2031_v4   ;;  %v2292_v9 = vpop.f32.mrb[20].mxu1 }
 0x11e   :  { %v1256_v11 = vadd.f32 %v1255_v6, %v1057_v53  ;;  %v1389_v12 = vadd.f32 %v1388_v5, %v1326_v7  ;;  %2150 = vst [vmem:[%s2939_s4 + $0x40] sm:$0xff] %v2026_v8   ;;  %v2372_v13 = vpop.f32.mrb[20].mxu0  ;;  %v535_v14 = vpop.f32.mrb[21].mxu1 }
 0x11f   :  { %v1073_v15 = vadd.f32 %v2372_v13, %v2292_v9  ;;  %v1064_v16 = vpop.f32.mrb[21].mxu0  ;;  %v2293_v17 = vpop.f32.mrb[22].mxu1 }
 0x120   :  { %v1390_v19 = vadd.f32 %v1389_v12, %v1327_v10  ;;  %v1065_v20 = vadd.f32 %v1064_v16, %v535_v14  ;;  %v1257_v21 = vadd.f32 %v1256_v11, %v1060_v62  ;;  %v2373_v22 = vpop.f32.mrb[22].mxu0  ;;  %v538_v23 = vpop.f32.mrb[23].mxu1 }
 0x121   :  { %v1076_v24 = vadd.f32 %v2373_v22, %v2293_v17  ;;  %v1067_v25 = vpop.f32.mrb[23].mxu0  ;;  %v1331_v36 = vmul.f32 %v1073_v15, %v1073_v15 }
 0x122   :  { %v1258_v26 = vadd.f32 %v1257_v21, %v1065_v20  ;;  %v1329_v27 = vmul.f32 %v1065_v20, %v1065_v20  ;;  %v1391_v28 = vadd.f32 %v1390_v19, %v1328_v18  ;;  %v1068_v29 = vadd.f32 %v1067_v25, %v538_v23 }
 0x123   :  { %v2041_v30 = vpack.c.bf16 %v1076_v24, %v1073_v15  ;;  %v1332_v44 = vmul.f32 %v1076_v24, %v1076_v24 }
 0x124   :  { %v1392_v31 = vadd.f32 %v1391_v28, %v1329_v27  ;;  %v1259_v32 = vadd.f32 %v1258_v26, %v1068_v29  ;;  %v1330_v33 = vmul.f32 %v1068_v29, %v1068_v29  ;;  %v2036_v34 = vpack.c.bf16 %v1068_v29, %v1065_v20 }
 0x125   :  { %2153 = vst [vmem:[%s2939_s4 + $0x58] sm:$0xff] %v2041_v30   ;;  %v2296_v35 = vpop.f32.mrb[24].mxu1 }
 0x126   :  { %v1260_v37 = vadd.f32 %v1259_v32, %v1073_v15  ;;  %v1393_v38 = vadd.f32 %v1392_v31, %v1330_v33  ;;  %2152 = vst [vmem:[%s2939_s4 + $0x50] sm:$0xff] %v2036_v34   ;;  %v2376_v39 = vpop.f32.mrb[24].mxu0  ;;  %v551_v40 = vpop.f32.mrb[25].mxu1 }
 0x127   :  { %v1089_v41 = vadd.f32 %v2376_v39, %v2296_v35  ;;  %v1080_v42 = vpop.f32.mrb[25].mxu0  ;;  %v2297_v43 = vpop.f32.mrb[26].mxu1 }
 0x128   :  { %v1394_v45 = vadd.f32 %v1393_v38, %v1331_v36  ;;  %v1081_v46 = vadd.f32 %v1080_v42, %v551_v40  ;;  %v1261_v47 = vadd.f32 %v1260_v37, %v1076_v24  ;;  %v2377_v48 = vpop.f32.mrb[26].mxu0  ;;  %v554_v49 = vpop.f32.mrb[27].mxu1 }
 0x129   :  { %v1092_v50 = vadd.f32 %v2377_v48, %v2297_v43  ;;  %v1083_v51 = vpop.f32.mrb[27].mxu0  ;;  %v1335_v62 = vmul.f32 %v1089_v41, %v1089_v41 }
 0x12a   :  { %v1262_v52 = vadd.f32 %v1261_v47, %v1081_v46  ;;  %v1333_v53 = vmul.f32 %v1081_v46, %v1081_v46  ;;  %v1395_v54 = vadd.f32 %v1394_v45, %v1332_v44  ;;  %v1084_v55 = vadd.f32 %v1083_v51, %v554_v49 }
 0x12b   :  { %v2051_v56 = vpack.c.bf16 %v1092_v50, %v1089_v41  ;;  %v1336_v6 = vmul.f32 %v1092_v50, %v1092_v50 }
 0x12c   :  { %v1396_v57 = vadd.f32 %v1395_v54, %v1333_v53  ;;  %v1263_v58 = vadd.f32 %v1262_v52, %v1084_v55  ;;  %v1334_v59 = vmul.f32 %v1084_v55, %v1084_v55  ;;  %v2046_v60 = vpack.c.bf16 %v1084_v55, %v1081_v46 }
 0x12d   :  { %2155 = vst [vmem:[%s2939_s4 + $0x68] sm:$0xff] %v2051_v56   ;;  %v2300_v61 = vpop.f32.mrb[28].mxu1 }
 0x12e   :  { %v1264_v63 = vadd.f32 %v1263_v58, %v1089_v41  ;;  %v1397_v0 = vadd.f32 %v1396_v57, %v1334_v59  ;;  %2154 = vst [vmem:[%s2939_s4 + $0x60] sm:$0xff] %v2046_v60   ;;  %v2380_v1 = vpop.f32.mrb[28].mxu0  ;;  %v567_v2 = vpop.f32.mrb[29].mxu1 }
 0x12f   :  { %v1105_v3 = vadd.f32 %v2380_v1, %v2300_v61  ;;  %v1096_v4 = vpop.f32.mrb[29].mxu0  ;;  %v2301_v5 = vpop.f32.mrb[30].mxu1 }
 0x130   :  { %v1398_v7 = vadd.f32 %v1397_v0, %v1335_v62  ;;  %v1097_v8 = vadd.f32 %v1096_v4, %v567_v2  ;;  %v1265_v9 = vadd.f32 %v1264_v63, %v1092_v50  ;;  %v2381_v10 = vpop.f32.mrb[30].mxu0  ;;  %v570_v11 = vpop.f32.mrb[31].mxu1 }
 0x131   :  { %v1108_v12 = vadd.f32 %v2381_v10, %v2301_v5  ;;  %v1099_v13 = vpop.f32.mrb[31].mxu0  ;;  %v1339_v24 = vmul.f32 %v1105_v3, %v1105_v3 }
 0x132   :  { %v1266_v14 = vadd.f32 %v1265_v9, %v1097_v8  ;;  %v1337_v15 = vmul.f32 %v1097_v8, %v1097_v8  ;;  %v1399_v16 = vadd.f32 %v1398_v7, %v1336_v6  ;;  %v1100_v17 = vadd.f32 %v1099_v13, %v570_v11 }
 0x133   :  { %v2061_v18 = vpack.c.bf16 %v1108_v12, %v1105_v3  ;;  %v1340_v32 = vmul.f32 %v1108_v12, %v1108_v12 }
 0x134   :  { %v1400_v19 = vadd.f32 %v1399_v16, %v1337_v15  ;;  %v1267_v20 = vadd.f32 %v1266_v14, %v1100_v17  ;;  %v1338_v21 = vmul.f32 %v1100_v17, %v1100_v17  ;;  %v2056_v22 = vpack.c.bf16 %v1100_v17, %v1097_v8 }
 0x135   :  { %2157 = vst [vmem:[%s2939_s4 + $0x78] sm:$0xff] %v2061_v18   ;;  %v2304_v23 = vpop.f32.mrb[32].mxu1 }
 0x136   :  { %v1268_v25 = vadd.f32 %v1267_v20, %v1105_v3  ;;  %v1401_v26 = vadd.f32 %v1400_v19, %v1338_v21  ;;  %2156 = vst [vmem:[%s2939_s4 + $0x70] sm:$0xff] %v2056_v22   ;;  %v2384_v27 = vpop.f32.mrb[32].mxu0  ;;  %v583_v28 = vpop.f32.mrb[33].mxu1 }
 0x137   :  { %v1121_v29 = vadd.f32 %v2384_v27, %v2304_v23  ;;  %v1112_v30 = vpop.f32.mrb[33].mxu0  ;;  %v2305_v31 = vpop.f32.mrb[34].mxu1 }
 0x138   :  { %v1402_v33 = vadd.f32 %v1401_v26, %v1339_v24  ;;  %v1113_v34 = vadd.f32 %v1112_v30, %v583_v28  ;;  %v1269_v35 = vadd.f32 %v1268_v25, %v1108_v12  ;;  %v2385_v36 = vpop.f32.mrb[34].mxu0  ;;  %v586_v37 = vpop.f32.mrb[35].mxu1 }
 0x139   :  { %v1124_v38 = vadd.f32 %v2385_v36, %v2305_v31  ;;  %v1115_v39 = vpop.f32.mrb[35].mxu0  ;;  %v1343_v50 = vmul.f32 %v1121_v29, %v1121_v29 }
 0x13a   :  { %v1270_v40 = vadd.f32 %v1269_v35, %v1113_v34  ;;  %v1341_v41 = vmul.f32 %v1113_v34, %v1113_v34  ;;  %v1403_v42 = vadd.f32 %v1402_v33, %v1340_v32  ;;  %v1116_v43 = vadd.f32 %v1115_v39, %v586_v37 }
 0x13b   :  { %v2071_v44 = vpack.c.bf16 %v1124_v38, %v1121_v29  ;;  %v1344_v58 = vmul.f32 %v1124_v38, %v1124_v38 }
 0x13c   :  { %v1404_v45 = vadd.f32 %v1403_v42, %v1341_v41  ;;  %v1271_v46 = vadd.f32 %v1270_v40, %v1116_v43  ;;  %v1342_v47 = vmul.f32 %v1116_v43, %v1116_v43  ;;  %v2066_v48 = vpack.c.bf16 %v1116_v43, %v1113_v34 }
 0x13d   :  { %2159 = vst [vmem:[%s2939_s4 + $0x88] sm:$0xff] %v2071_v44   ;;  %v2308_v49 = vpop.f32.mrb[36].mxu1 }
 0x13e   :  { %v1272_v51 = vadd.f32 %v1271_v46, %v1121_v29  ;;  %v1405_v52 = vadd.f32 %v1404_v45, %v1342_v47  ;;  %2158 = vst [vmem:[%s2939_s4 + $0x80] sm:$0xff] %v2066_v48   ;;  %v2388_v53 = vpop.f32.mrb[36].mxu0  ;;  %v599_v54 = vpop.f32.mrb[37].mxu1 }
 0x13f   :  { %v1137_v55 = vadd.f32 %v2388_v53, %v2308_v49  ;;  %v1128_v56 = vpop.f32.mrb[37].mxu0  ;;  %v2309_v57 = vpop.f32.mrb[38].mxu1 }
 0x140   :  { %v1406_v59 = vadd.f32 %v1405_v52, %v1343_v50  ;;  %v1129_v60 = vadd.f32 %v1128_v56, %v599_v54  ;;  %v1273_v61 = vadd.f32 %v1272_v51, %v1124_v38  ;;  %v2389_v62 = vpop.f32.mrb[38].mxu0  ;;  %v602_v63 = vpop.f32.mrb[39].mxu1 }
 0x141   :  { %v1140_v0 = vadd.f32 %v2389_v62, %v2309_v57  ;;  %v1131_v1 = vpop.f32.mrb[39].mxu0  ;;  %v1347_v12 = vmul.f32 %v1137_v55, %v1137_v55 }
 0x142   :  { %v1274_v2 = vadd.f32 %v1273_v61, %v1129_v60  ;;  %v1345_v3 = vmul.f32 %v1129_v60, %v1129_v60  ;;  %v1407_v4 = vadd.f32 %v1406_v59, %v1344_v58  ;;  %v1132_v5 = vadd.f32 %v1131_v1, %v602_v63 }
 0x143   :  { %v2081_v6 = vpack.c.bf16 %v1140_v0, %v1137_v55  ;;  %v1348_v20 = vmul.f32 %v1140_v0, %v1140_v0 }
 0x144   :  { %v1408_v7 = vadd.f32 %v1407_v4, %v1345_v3  ;;  %v1275_v8 = vadd.f32 %v1274_v2, %v1132_v5  ;;  %v1346_v9 = vmul.f32 %v1132_v5, %v1132_v5  ;;  %v2076_v10 = vpack.c.bf16 %v1132_v5, %v1129_v60 }
 0x145   :  { %2161 = vst [vmem:[%s2939_s4 + $0x98] sm:$0xff] %v2081_v6   ;;  %v2312_v11 = vpop.f32.mrb[40].mxu1 }
 0x146   :  { %v1276_v13 = vadd.f32 %v1275_v8, %v1137_v55  ;;  %v1409_v14 = vadd.f32 %v1408_v7, %v1346_v9  ;;  %2160 = vst [vmem:[%s2939_s4 + $0x90] sm:$0xff] %v2076_v10   ;;  %v2392_v15 = vpop.f32.mrb[40].mxu0  ;;  %v615_v16 = vpop.f32.mrb[41].mxu1 }
 0x147   :  { %v1153_v17 = vadd.f32 %v2392_v15, %v2312_v11  ;;  %v1144_v18 = vpop.f32.mrb[41].mxu0  ;;  %v2313_v19 = vpop.f32.mrb[42].mxu1 }
 0x148   :  { %v1410_v21 = vadd.f32 %v1409_v14, %v1347_v12  ;;  %v1145_v22 = vadd.f32 %v1144_v18, %v615_v16  ;;  %v1277_v23 = vadd.f32 %v1276_v13, %v1140_v0  ;;  %v2393_v24 = vpop.f32.mrb[42].mxu0  ;;  %v618_v25 = vpop.f32.mrb[43].mxu1 }
 0x149   :  { %v1156_v26 = vadd.f32 %v2393_v24, %v2313_v19  ;;  %v1147_v27 = vpop.f32.mrb[43].mxu0  ;;  %v1351_v38 = vmul.f32 %v1153_v17, %v1153_v17 }
 0x14a   :  { %v1278_v28 = vadd.f32 %v1277_v23, %v1145_v22  ;;  %v1349_v29 = vmul.f32 %v1145_v22, %v1145_v22  ;;  %v1411_v30 = vadd.f32 %v1410_v21, %v1348_v20  ;;  %v1148_v31 = vadd.f32 %v1147_v27, %v618_v25 }
 0x14b   :  { %v2091_v32 = vpack.c.bf16 %v1156_v26, %v1153_v17  ;;  %v1352_v46 = vmul.f32 %v1156_v26, %v1156_v26 }
 0x14c   :  { %v1412_v33 = vadd.f32 %v1411_v30, %v1349_v29  ;;  %v1279_v34 = vadd.f32 %v1278_v28, %v1148_v31  ;;  %v1350_v35 = vmul.f32 %v1148_v31, %v1148_v31  ;;  %v2086_v36 = vpack.c.bf16 %v1148_v31, %v1145_v22 }
 0x14d   :  { %2163 = vst [vmem:[%s2939_s4 + $0xa8] sm:$0xff] %v2091_v32   ;;  %v2316_v37 = vpop.f32.mrb[44].mxu1 }
 0x14e   :  { %v1280_v39 = vadd.f32 %v1279_v34, %v1153_v17  ;;  %v1413_v40 = vadd.f32 %v1412_v33, %v1350_v35  ;;  %2162 = vst [vmem:[%s2939_s4 + $0xa0] sm:$0xff] %v2086_v36   ;;  %v2396_v41 = vpop.f32.mrb[44].mxu0  ;;  %v631_v42 = vpop.f32.mrb[45].mxu1 }
 0x14f   :  { %v1169_v43 = vadd.f32 %v2396_v41, %v2316_v37  ;;  %v1160_v44 = vpop.f32.mrb[45].mxu0  ;;  %v2317_v45 = vpop.f32.mrb[46].mxu1 }
 0x150   :  { %v1414_v47 = vadd.f32 %v1413_v40, %v1351_v38  ;;  %v1161_v48 = vadd.f32 %v1160_v44, %v631_v42  ;;  %v1281_v49 = vadd.f32 %v1280_v39, %v1156_v26  ;;  %v2397_v50 = vpop.f32.mrb[46].mxu0  ;;  %v634_v51 = vpop.f32.mrb[47].mxu1 }
 0x151   :  { %v1172_v52 = vadd.f32 %v2397_v50, %v2317_v45  ;;  %v1163_v53 = vpop.f32.mrb[47].mxu0  ;;  %v1355_v0 = vmul.f32 %v1169_v43, %v1169_v43 }
 0x152   :  { %v1282_v54 = vadd.f32 %v1281_v49, %v1161_v48  ;;  %v1353_v55 = vmul.f32 %v1161_v48, %v1161_v48  ;;  %v1415_v56 = vadd.f32 %v1414_v47, %v1352_v46  ;;  %v1164_v57 = vadd.f32 %v1163_v53, %v634_v51 }
 0x153   :  { %v2101_v58 = vpack.c.bf16 %v1172_v52, %v1169_v43  ;;  %v1356_v8 = vmul.f32 %v1172_v52, %v1172_v52 }
 0x154   :  { %v1416_v59 = vadd.f32 %v1415_v56, %v1353_v55  ;;  %v1283_v60 = vadd.f32 %v1282_v54, %v1164_v57  ;;  %v1354_v61 = vmul.f32 %v1164_v57, %v1164_v57  ;;  %v2096_v62 = vpack.c.bf16 %v1164_v57, %v1161_v48 }
 0x155   :  { %2165 = vst [vmem:[%s2939_s4 + $0xb8] sm:$0xff] %v2101_v58   ;;  %v2320_v63 = vpop.f32.mrb[48].mxu1 }
 0x156   :  { %v1284_v1 = vadd.f32 %v1283_v60, %v1169_v43  ;;  %v1417_v2 = vadd.f32 %v1416_v59, %v1354_v61  ;;  %2164 = vst [vmem:[%s2939_s4 + $0xb0] sm:$0xff] %v2096_v62   ;;  %v2400_v3 = vpop.f32.mrb[48].mxu0  ;;  %v647_v4 = vpop.f32.mrb[49].mxu1 }
 0x157   :  { %v1185_v5 = vadd.f32 %v2400_v3, %v2320_v63  ;;  %v1176_v6 = vpop.f32.mrb[49].mxu0  ;;  %v2321_v7 = vpop.f32.mrb[50].mxu1 }
 0x158   :  { %v1418_v9 = vadd.f32 %v1417_v2, %v1355_v0  ;;  %v1177_v10 = vadd.f32 %v1176_v6, %v647_v4  ;;  %v1285_v11 = vadd.f32 %v1284_v1, %v1172_v52  ;;  %v2401_v12 = vpop.f32.mrb[50].mxu0  ;;  %v650_v13 = vpop.f32.mrb[51].mxu1 }
 0x159   :  { %v1188_v14 = vadd.f32 %v2401_v12, %v2321_v7  ;;  %v1179_v15 = vpop.f32.mrb[51].mxu0  ;;  %v1359_v26 = vmul.f32 %v1185_v5, %v1185_v5 }
 0x15a   :  { %v1286_v16 = vadd.f32 %v1285_v11, %v1177_v10  ;;  %v1357_v17 = vmul.f32 %v1177_v10, %v1177_v10  ;;  %v1419_v18 = vadd.f32 %v1418_v9, %v1356_v8  ;;  %v1180_v19 = vadd.f32 %v1179_v15, %v650_v13 }
 0x15b   :  { %v2111_v20 = vpack.c.bf16 %v1188_v14, %v1185_v5  ;;  %v1360_v34 = vmul.f32 %v1188_v14, %v1188_v14 }
 0x15c   :  { %v1420_v21 = vadd.f32 %v1419_v18, %v1357_v17  ;;  %v1287_v22 = vadd.f32 %v1286_v16, %v1180_v19  ;;  %v1358_v23 = vmul.f32 %v1180_v19, %v1180_v19  ;;  %v2106_v24 = vpack.c.bf16 %v1180_v19, %v1177_v10 }
 0x15d   :  { %2167 = vst [vmem:[%s2939_s4 + $0xc8] sm:$0xff] %v2111_v20   ;;  %v2324_v25 = vpop.f32.mrb[52].mxu1 }
 0x15e   :  { %v1288_v27 = vadd.f32 %v1287_v22, %v1185_v5  ;;  %v1421_v28 = vadd.f32 %v1420_v21, %v1358_v23  ;;  %2166 = vst [vmem:[%s2939_s4 + $0xc0] sm:$0xff] %v2106_v24   ;;  %v2404_v29 = vpop.f32.mrb[52].mxu0  ;;  %v663_v30 = vpop.f32.mrb[53].mxu1 }
 0x15f   :  { %v1201_v31 = vadd.f32 %v2404_v29, %v2324_v25  ;;  %v1192_v32 = vpop.f32.mrb[53].mxu0  ;;  %v2325_v33 = vpop.f32.mrb[54].mxu1 }
 0x160   :  { %v1422_v35 = vadd.f32 %v1421_v28, %v1359_v26  ;;  %v1193_v36 = vadd.f32 %v1192_v32, %v663_v30  ;;  %v1289_v37 = vadd.f32 %v1288_v27, %v1188_v14  ;;  %v2405_v38 = vpop.f32.mrb[54].mxu0  ;;  %v666_v39 = vpop.f32.mrb[55].mxu1 }
 0x161   :  { %v1204_v40 = vadd.f32 %v2405_v38, %v2325_v33  ;;  %v1195_v41 = vpop.f32.mrb[55].mxu0  ;;  %v1363_v52 = vmul.f32 %v1201_v31, %v1201_v31 }
 0x162   :  { %v1290_v42 = vadd.f32 %v1289_v37, %v1193_v36  ;;  %v1361_v43 = vmul.f32 %v1193_v36, %v1193_v36  ;;  %v1423_v44 = vadd.f32 %v1422_v35, %v1360_v34  ;;  %v1196_v45 = vadd.f32 %v1195_v41, %v666_v39 }
 0x163   :  { %v2121_v46 = vpack.c.bf16 %v1204_v40, %v1201_v31  ;;  %v1364_v60 = vmul.f32 %v1204_v40, %v1204_v40 }
 0x164   :  { %v1424_v47 = vadd.f32 %v1423_v44, %v1361_v43  ;;  %v1291_v48 = vadd.f32 %v1290_v42, %v1196_v45  ;;  %v1362_v49 = vmul.f32 %v1196_v45, %v1196_v45  ;;  %v2116_v50 = vpack.c.bf16 %v1196_v45, %v1193_v36 }
 0x165   :  { %2169 = vst [vmem:[%s2939_s4 + $0xd8] sm:$0xff] %v2121_v46   ;;  %v2328_v51 = vpop.f32.mrb[56].mxu1 }
 0x166   :  { %v1292_v53 = vadd.f32 %v1291_v48, %v1201_v31  ;;  %v1425_v54 = vadd.f32 %v1424_v47, %v1362_v49  ;;  %2168 = vst [vmem:[%s2939_s4 + $0xd0] sm:$0xff] %v2116_v50   ;;  %v2408_v55 = vpop.f32.mrb[56].mxu0  ;;  %v679_v56 = vpop.f32.mrb[57].mxu1 }
 0x167   :  { %v1217_v57 = vadd.f32 %v2408_v55, %v2328_v51  ;;  %v1208_v58 = vpop.f32.mrb[57].mxu0  ;;  %v2329_v59 = vpop.f32.mrb[58].mxu1 }
 0x168   :  { %v1426_v61 = vadd.f32 %v1425_v54, %v1363_v52  ;;  %v1209_v62 = vadd.f32 %v1208_v58, %v679_v56  ;;  %v1293_v63 = vadd.f32 %v1292_v53, %v1204_v40  ;;  %v2409_v0 = vpop.f32.mrb[58].mxu0  ;;  %v682_v1 = vpop.f32.mrb[59].mxu1 }
 0x169   :  { %v1220_v2 = vadd.f32 %v2409_v0, %v2329_v59  ;;  %v1211_v3 = vpop.f32.mrb[59].mxu0  ;;  %v1367_v14 = vmul.f32 %v1217_v57, %v1217_v57 }
 0x16a   :  { %v1294_v4 = vadd.f32 %v1293_v63, %v1209_v62  ;;  %v1365_v5 = vmul.f32 %v1209_v62, %v1209_v62  ;;  %v1427_v6 = vadd.f32 %v1426_v61, %v1364_v60  ;;  %v1212_v7 = vadd.f32 %v1211_v3, %v682_v1 }
 0x16b   :  { %v2131_v8 = vpack.c.bf16 %v1220_v2, %v1217_v57  ;;  %v1368_v22 = vmul.f32 %v1220_v2, %v1220_v2 }
 0x16c   :  { %v1428_v9 = vadd.f32 %v1427_v6, %v1365_v5  ;;  %v1295_v10 = vadd.f32 %v1294_v4, %v1212_v7  ;;  %v1366_v11 = vmul.f32 %v1212_v7, %v1212_v7  ;;  %v2126_v12 = vpack.c.bf16 %v1212_v7, %v1209_v62 }
 0x16d   :  { %2171 = vst [vmem:[%s2939_s4 + $0xe8] sm:$0xff] %v2131_v8   ;;  %v2332_v13 = vpop.f32.mrb[60].mxu1 }
 0x16e   :  { %v1296_v15 = vadd.f32 %v1295_v10, %v1217_v57  ;;  %v1429_v16 = vadd.f32 %v1428_v9, %v1366_v11  ;;  %2170 = vst [vmem:[%s2939_s4 + $0xe0] sm:$0xff] %v2126_v12   ;;  %v2412_v17 = vpop.f32.mrb[60].mxu0  ;;  %v695_v18 = vpop.f32.mrb[61].mxu1 }
 0x16f   :  { %v1233_v19 = vadd.f32 %v2412_v17, %v2332_v13  ;;  %v1224_v20 = vpop.f32.mrb[61].mxu0  ;;  %v2333_v21 = vpop.f32.mrb[62].mxu1 }
 0x170   :  { %v1430_v23 = vadd.f32 %v1429_v16, %v1367_v14  ;;  %v1225_v24 = vadd.f32 %v1224_v20, %v695_v18  ;;  %v1297_v25 = vadd.f32 %v1296_v15, %v1220_v2  ;;  %v2413_v26 = vpop.f32.mrb[62].mxu0  ;;  %v698_v27 = vpop.f32.mrb[63].mxu1 }
 0x171   :  { %v1236_v28 = vadd.f32 %v2413_v26, %v2333_v21  ;;  %v1227_v29 = vpop.f32.mrb[63].mxu0  ;;  %v1371_v39 = vmul.f32 %v1233_v19, %v1233_v19 }
 0x172   :  { %v1298_v30 = vadd.f32 %v1297_v25, %v1225_v24  ;;  %v1369_v31 = vmul.f32 %v1225_v24, %v1225_v24  ;;  %v1431_v32 = vadd.f32 %v1430_v23, %v1368_v22  ;;  %v1228_v33 = vadd.f32 %v1227_v29, %v698_v27 }
 0x173   :  { %v2141_v34 = vpack.c.bf16 %v1236_v28, %v1233_v19  ;;  %v1372_v42 = vmul.f32 %v1236_v28, %v1236_v28 }
 0x174   :  { %v1432_v35 = vadd.f32 %v1431_v32, %v1369_v31  ;;  %v1299_v36 = vadd.f32 %v1298_v30, %v1228_v33  ;;  %v1370_v37 = vmul.f32 %v1228_v33, %v1228_v33  ;;  %v2136_v38 = vpack.c.bf16 %v1228_v33, %v1225_v24 }
 0x175   :  { %2173 = vst [vmem:[%s2939_s4 + $0xf8] sm:$0xff] %v2141_v34  }
 0x176   :  { %v1300_v40 = vadd.f32 %v1299_v36, %v1233_v19  ;;  %v1433_v41 = vadd.f32 %v1432_v35, %v1370_v37  ;;  %2172 = vst [vmem:[%s2939_s4 + $0xf0] sm:$0xff] %v2136_v38  }
 0x178   :  { %v1301_v43 = vadd.f32 %v1300_v40, %v1236_v28  ;;  %v1434_v44 = vadd.f32 %v1433_v41, %v1371_v39 }
 0x17a   :  { %v1302_v45 = vrot.slane %v1301_v43, 4  ;;  %v1435_v46 = vadd.f32 %v1434_v44, %v1372_v42 }
 0x17c   :  { %v1303_v47 = vadd.f32 %v1302_v45, %v1301_v43  ;;  %v1436_v48 = vrot.slane %v1435_v46, 4 }
 0x17e   :  { %v1304_v49 = vrot.slane %v1303_v47, 2  ;;  %v1437_v50 = vadd.f32 %v1436_v48, %v1435_v46 }
 0x180   :  { %v1305_v51 = vadd.f32 %v1304_v49, %v1303_v47  ;;  %v1438_v52 = vrot.slane %v1437_v50, 2 }
 0x182   :  { %v1306_v53 = vrot.slane %v1305_v51, 1  ;;  %v1439_v54 = vadd.f32 %v1438_v52, %v1437_v50 }
 0x184   :  { %v1307_v55 = vadd.f32 %v1306_v53, %v1305_v51  ;;  %v1440_v56 = vrot.slane %v1439_v54, 1 }
 0x186   :  { %1308 = vst [vmem:[%s2940_s5] sm:$0x1] %v1307_v55  ;;  %v1441_v57 = vadd.f32 %v1440_v56, %v1439_v54 }
 0x188   :  { %1442 = vst [vmem:[%s2941_s6] sm:$0x1] %v1441_v57 }

</bundles_post_ra>
